<compile_context>
chip_gen: v6e
topology: v6e:2x2x1
jax: 0.10.0
libtpu: 0.0.40
codegen_flags: <defaults>
</compile_context>

<pallas_src>
import jax
import jax.numpy as jnp
from jax import lax
from jax.experimental import pallas as pl
from jax.experimental.pallas import tpu as pltpu


def _round_up(x, m):
    return ((x + m - 1) // m) * m


# ---------------------------------------------------------------------------
# Fused Pallas kernel (built per (n_layers, T, Bp, Hp, Tc) configuration)
# ---------------------------------------------------------------------------
def _make_fused_lstm_kernel(n_layers, T, Bp, Hp, Tc):
    """Ref order (positional):
        x_ref                                   (T*Bp, D)   time-major, flattened
        [wih_l (in_l,4Hp), whh_l (Hp,4Hp), b_l (1,4Hp)]   for l in range(n_layers)
        wfc_ref (Hp, O), bfc_ref (1, O)
        out_ref (Bp, O)
        zin_scr (Tc*Bp, 4Hp)                    chunked hoisted input projection
        hseq_scr (T*Bp, Hp)                     only present when n_layers > 1
    """
    n_w = 3 * n_layers
    have_hseq = n_layers > 1
    chunk_starts = list(range(0, T, Tc))

    def kernel(*refs):
        x_ref = refs[0]
        w_refs = refs[1:1 + n_w]
        wfc_ref = refs[1 + n_w]
        bfc_ref = refs[2 + n_w]
        out_ref = refs[3 + n_w]
        zin_scr = refs[4 + n_w]
        hseq_scr = refs[5 + n_w] if have_hseq else None

        h_last = jnp.zeros((Bp, Hp), jnp.float32)

        for l in range(n_layers):
            wih = w_refs[3 * l][...]        # (in_l, 4Hp)
            whh = w_refs[3 * l + 1][...]    # (Hp, 4Hp)
            b = w_refs[3 * l + 2][...]      # (1, 4Hp)
            src_ref = x_ref if l == 0 else hseq_scr
            write_hseq = l < (n_layers - 1)   # last layer's sequence is never read

            h = jnp.zeros((Bp, Hp), jnp.float32)
            c = jnp.zeros((Bp, Hp), jnp.float32)

            for c0 in chunk_starts:            # static time-chunking
                tc = min(Tc, T - c0)
                rows = tc * Bp

                # Hoisted input projection for this chunk: one big MXU matmul
                # over tc*Bp rows, outside the serial h-dependency chain.
                zin_scr[pl.ds(0, rows), :] = (
                    jnp.dot(src_ref[pl.ds(c0 * Bp, rows), :], wih,
                            preferred_element_type=jnp.float32) + b
                )

                def step(t, carry, _c0=c0, _write=write_hseq, _whh=whh):
                    h_prev, c_prev = carry
                    row = pl.multiple_of(t * Bp, Bp)
                    z = zin_scr[pl.ds(row, Bp), :] + jnp.dot(
                        h_prev, _whh, preferred_element_type=jnp.float32
                    )                                   # (Bp, 4Hp)
                    # PyTorch gate order [i, f, g, o]; each gate is a full
                    # lane-aligned Hp-wide slab (no cross-lane extracts).
                    i_g = jax.nn.sigmoid(z[:, 0 * Hp:1 * Hp])
                    f_g = jax.nn.sigmoid(z[:, 1 * Hp:2 * Hp])
                    g_g = jnp.tanh(z[:, 2 * Hp:3 * Hp])
                    o_g = jax.nn.sigmoid(z[:, 3 * Hp:4 * Hp])
                    c_new = f_g * c_prev + i_g * g_g
                    h_new = o_g * jnp.tanh(c_new)
                    if _write:   # skipped (statically) for the last layer
                        grow = pl.multiple_of(_c0 * Bp + t * Bp, Bp)
                        hseq_scr[pl.ds(grow, Bp), :] = h_new
                    return h_new, c_new

                unroll = tc if tc <= 16 else 8        # partial unroll for long chunks
                h, c = lax.fori_loop(0, tc, step, (h, c), unroll=unroll)

            h_last = h

        # Final FC on the last timestep's hidden state of the last layer.
        out_ref[...] = (
            jnp.dot(h_last, wfc_ref[...], preferred_element_type=jnp.float32)
            + bfc_ref[...]
        )

    return kernel


# ---------------------------------------------------------------------------
# Weight packing: pad every gate block (i,f,g,o) to Hp lanes, pad H-rows to Hp
# ---------------------------------------------------------------------------
def _pack_gate_cols(w, H, Hp):
    """w: (rows, 4H) gate-stacked along columns -> (rows, 4Hp), zero-padded per gate."""
    if Hp == H:
        return w
    blocks = [jnp.pad(w[:, g * H:(g + 1) * H], ((0, 0), (0, Hp - H)))
              for g in range(4)]
    return jnp.concatenate(blocks, axis=1)


# ---------------------------------------------------------------------------
# Wrapper
# ---------------------------------------------------------------------------
@jax.jit
def lstm_predictor_forward(params, x_btd):
    """x_btd: (B, T, D) batch_first, like the PyTorch module. Returns (B, output_dim)."""
    x = jnp.asarray(x_btd, jnp.float32)
    B, T, D = x.shape
    n_layers = len(params["lstm"])
    H = params["lstm"][0]["w_hh_t"].shape[0]
    O = params["fc"]["w_t"].shape[1]
    Hp = _round_up(H, 128)          # lane-aligned gate width
    Bp = _round_up(B, 8)            # sublane-aligned batch

    x_tm = jnp.transpose(x, (1, 0, 2))                      # (T, B, D) time-major
    if Bp != B:
        x_tm = jnp.pad(x_tm, ((0, 0), (0, Bp - B), (0, 0)))
    x_flat = x_tm.reshape(T * Bp, D)                        # (T*Bp, D)

    inputs = [x_flat]
    for l, lp in enumerate(params["lstm"]):
        w_ih = _pack_gate_cols(lp["w_ih_t"], H, Hp)         # (in_l, 4Hp)
        if l > 0 and Hp != H:                                # in_l == H for layers > 0
            w_ih = jnp.pad(w_ih, ((0, Hp - H), (0, 0)))
        w_hh = _pack_gate_cols(lp["w_hh_t"], H, Hp)
        if Hp != H:
            w_hh = jnp.pad(w_hh, ((0, Hp - H), (0, 0)))      # (Hp, 4Hp)
        bias = _pack_gate_cols(lp["b"].reshape(1, 4 * H), H, Hp)
        inputs += [w_ih, w_hh, bias]
    w_fc = params["fc"]["w_t"]
    if Hp != H:
        w_fc = jnp.pad(w_fc, ((0, Hp - H), (0, 0)))          # (Hp, O)
    inputs += [w_fc, params["fc"]["b"].reshape(1, O)]

    # Time-chunk the hoisted projection so zin scratch stays ~<= 8 MiB.
    zin_bytes_per_step = Bp * 4 * Hp * 4
    Tc = int(max(1, min(T, (8 * 1024 * 1024) // zin_bytes_per_step)))

    kernel = _make_fused_lstm_kernel(n_layers, T, Bp, Hp, Tc)

    scratch = [pltpu.VMEM((Tc * Bp, 4 * Hp), jnp.float32)]   # chunked zin
    if n_layers > 1:
        scratch.append(pltpu.VMEM((T * Bp, Hp), jnp.float32))  # inter-layer hidden seq

    # Size the scoped-VMEM limit to actual residency (+ generous headroom for
    # in-kernel temporaries / internal scratch), instead of the default limit.
    resident_bytes = 4 * (
        x_flat.size
        + sum(int(a.size) for a in inputs[1:])
        + Bp * O
        + Tc * Bp * 4 * Hp
        + (T * Bp * Hp if n_layers > 1 else 0)
    )
    vmem_limit = int(min(max(2 * resident_bytes + (8 << 20), 16 << 20), 96 << 20))

    vmem = pl.BlockSpec(memory_space=pltpu.MemorySpace.VMEM)
    out_padded = pl.pallas_call(
        kernel,
        out_shape=jax.ShapeDtypeStruct((Bp, O), jnp.float32),
        in_specs=[vmem] * len(inputs),
        out_specs=vmem,
        scratch_shapes=scratch,
        compiler_params=pltpu.CompilerParams(vmem_limit_bytes=vmem_limit),
    )(*inputs)
    return out_padded[:B]


# ---------------------------------------------------------------------------
# Parameter init (deterministic PyTorch-style uniform(-1/sqrt(H), 1/sqrt(H)))
# ---------------------------------------------------------------------------
def init_params(key, input_dim, hidden_dim, n_layers, output_dim):
    params = {"lstm": []}
    k = 1.0 / jnp.sqrt(jnp.float32(hidden_dim))
    for layer in range(n_layers):
        in_dim = input_dim if layer == 0 else hidden_dim
        key, k1, k2, k3, k4 = jax.random.split(key, 5)
        w_ih = jax.random.uniform(k1, (4 * hidden_dim, in_dim), jnp.float32, -k, k)
        w_hh = jax.random.uniform(k2, (4 * hidden_dim, hidden_dim), jnp.float32, -k, k)
        b_ih = jax.random.uniform(k3, (4 * hidden_dim,), jnp.float32, -k, k)
        b_hh = jax.random.uniform(k4, (4 * hidden_dim,), jnp.float32, -k, k)
        params["lstm"].append(dict(w_ih_t=w_ih.T, w_hh_t=w_hh.T, b=b_ih + b_hh))
    key, k5, k6 = jax.random.split(key, 3)
    w_fc = jax.random.uniform(k5, (output_dim, hidden_dim), jnp.float32, -k, k)
    b_fc = jax.random.uniform(k6, (output_dim,), jnp.float32, -k, k)
    params["fc"] = dict(w_t=w_fc.T, b=b_fc)
    return params


# ---------------------------------------------------------------------------
# Pure-JAX reference (correctness check; unpadded params)
# ---------------------------------------------------------------------------
def reference_forward(params, x_btd):
    h_seq = jnp.transpose(x_btd, (1, 0, 2)).astype(jnp.float32)
    for lp in params["lstm"]:
        T, B, _ = h_seq.shape
        H = lp["w_hh_t"].shape[0]
        h = jnp.zeros((B, H), jnp.float32)
        c = jnp.zeros((B, H), jnp.float32)
        outs = []
        for t in range(T):
            z = h_seq[t] @ lp["w_ih_t"] + h @ lp["w_hh_t"] + lp["b"]
            i = jax.nn.sigmoid(z[:, 0 * H:1 * H])
            f = jax.nn.sigmoid(z[:, 1 * H:2 * H])
            g = jnp.tanh(z[:, 2 * H:3 * H])
            o = jax.nn.sigmoid(z[:, 3 * H:4 * H])
            c = f * c + i * g
            h = o * jnp.tanh(c)
            outs.append(h)
        h_seq = jnp.stack(outs, axis=0)
    return h_seq[-1] @ params["fc"]["w_t"] + params["fc"]["b"]


if __name__ == "__main__":
    # Small shapes consistent with the module's forward: x is (batch, seq, input_dim).
    batch, seq, input_dim = 2, 8, 16
    hidden_dim, n_layers, output_dim = 32, 2, 4

    key = jax.random.PRNGKey(0)
    key, kx, kp = jax.random.split(key, 3)
    x = jax.random.normal(kx, (batch, seq, input_dim), jnp.float32)
    params = init_params(kp, input_dim, hidden_dim, n_layers, output_dim)

    out = lstm_predictor_forward(params, x)
    out = jax.block_until_ready(out)

    ref = reference_forward(params, x)
    assert out.shape == (batch, output_dim), out.shape
    assert jnp.allclose(out, ref, atol=1e-4, rtol=1e-4), (out, ref)

    print("KERNEL_OK")
</pallas_src>

<mosaic_0001>
module attributes {stable_mosaic.version = 11 : i64} {
  func.func @kernel(%arg0: memref<64x16xf32, #tpu.memory_space<vmem>>, %arg1: memref<16x512xf32, #tpu.memory_space<vmem>>, %arg2: memref<128x512xf32, #tpu.memory_space<vmem>>, %arg3: memref<1x512xf32, #tpu.memory_space<vmem>>, %arg4: memref<128x512xf32, #tpu.memory_space<vmem>>, %arg5: memref<128x512xf32, #tpu.memory_space<vmem>>, %arg6: memref<1x512xf32, #tpu.memory_space<vmem>>, %arg7: memref<128x4xf32, #tpu.memory_space<vmem>>, %arg8: memref<1x4xf32, #tpu.memory_space<vmem>>, %arg9: memref<8x4xf32, #tpu.memory_space<vmem>>, %arg10: memref<64x512xf32, #tpu.memory_space<vmem>>, %arg11: memref<64x128xf32, #tpu.memory_space<vmem>>) attributes {dimension_semantics = [], scalar_prefetch = 0 : i64, scratch_operands = 2 : i64, tpu.core_type = #tpu.core_type<tc>} {
    %c0 = arith.constant 0 : index
    %c0_0 = arith.constant 0 : index
    %0 = vector.load %arg1[%c0, %c0_0] : memref<16x512xf32, #tpu.memory_space<vmem>>, vector<16x512xf32>
    %c0_1 = arith.constant 0 : index
    %c0_2 = arith.constant 0 : index
    %1 = vector.load %arg2[%c0_1, %c0_2] : memref<128x512xf32, #tpu.memory_space<vmem>>, vector<128x512xf32>
    %c0_3 = arith.constant 0 : index
    %c0_4 = arith.constant 0 : index
    %2 = vector.load %arg3[%c0_3, %c0_4] : memref<1x512xf32, #tpu.memory_space<vmem>>, vector<1x512xf32>
    %cst = arith.constant 0.000000e+00 : f32
    %3 = vector.broadcast %cst : f32 to vector<8x128xf32>
    %cst_5 = arith.constant 0.000000e+00 : f32
    %4 = vector.broadcast %cst_5 : f32 to vector<8x128xf32>
    %c0_6 = arith.constant 0 : index
    %c0_7 = arith.constant 0 : index
    %5 = vector.load %arg0[%c0_6, %c0_7] : memref<64x16xf32, #tpu.memory_space<vmem>>, vector<64x16xf32>
    %cst_8 = arith.constant dense<0.000000e+00> : vector<64x512xf32>
    %6 = tpu.matmul %5, %0, %cst_8 {dimension_numbers = #tpu.dot_dimension_numbers<[1], [0], [0], [1], [0, 0, 1, 1], [], []>} : vector<64x16xf32>, vector<16x512xf32>, vector<64x512xf32> -> vector<64x512xf32>
    %7 = vector.broadcast %2 : vector<1x512xf32> to vector<64x512xf32>
    %8 = arith.addf %6, %7 : vector<64x512xf32>
    %c0_9 = arith.constant 0 : index
    %c0_10 = arith.constant 0 : index
    %9 = vector.load %arg10[%c0_9, %c0_10] : memref<64x512xf32, #tpu.memory_space<vmem>>, vector<64x512xf32>
    tpu.vector_store %arg10[%c0_9, %c0_10], %8 {strides = array<i32>} : memref<64x512xf32, #tpu.memory_space<vmem>>, vector<64x512xf32>,
    %c0_i32 = arith.constant 0 : i32
    %c8_i32 = arith.constant 8 : i32
    %10 = arith.muli %c0_i32, %c8_i32 : i32
    %11 = tpu.assume_multiple %10, 8 : i32
    %12 = arith.index_cast %11 : i32 to index
    %c0_11 = arith.constant 0 : index
    %13 = vector.load %arg10[%12, %c0_11] : memref<64x512xf32, #tpu.memory_space<vmem>>, vector<8x512xf32>
    %cst_12 = arith.constant dense<0.000000e+00> : vector<8x512xf32>
    %14 = tpu.matmul %3, %1, %cst_12 {dimension_numbers = #tpu.dot_dimension_numbers<[1], [0], [0], [1], [0, 0, 1, 1], [], []>} : vector<8x128xf32>, vector<128x512xf32>, vector<8x512xf32> -> vector<8x512xf32>
    %15 = arith.addf %13, %14 : vector<8x512xf32>
    %16 = vector.extract_strided_slice %15 {offsets = [0, 0], sizes = [8, 128], strides = [1, 1]} : vector<8x512xf32> to vector<8x128xf32>
    %17 = arith.negf %16 : vector<8x128xf32>
    %18 = math.exp %17 : vector<8x128xf32>
    %cst_13 = arith.constant 1.000000e+00 : f32
    %19 = vector.broadcast %cst_13 : f32 to vector<8x128xf32>
    %20 = arith.addf %19, %18 : vector<8x128xf32>
    %21 = arith.divf %19, %20 : vector<8x128xf32>
    %22 = vector.extract_strided_slice %15 {offsets = [0, 128], sizes = [8, 128], strides = [1, 1]} : vector<8x512xf32> to vector<8x128xf32>
    %23 = arith.negf %22 : vector<8x128xf32>
    %24 = math.exp %23 : vector<8x128xf32>
    %cst_14 = arith.constant 1.000000e+00 : f32
    %25 = vector.broadcast %cst_14 : f32 to vector<8x128xf32>
    %26 = arith.addf %25, %24 : vector<8x128xf32>
    %27 = arith.divf %25, %26 : vector<8x128xf32>
    %28 = vector.extract_strided_slice %15 {offsets = [0, 256], sizes = [8, 128], strides = [1, 1]} : vector<8x512xf32> to vector<8x128xf32>
    %29 = math.tanh %28 : vector<8x128xf32>
    %30 = vector.extract_strided_slice %15 {offsets = [0, 384], sizes = [8, 128], strides = [1, 1]} : vector<8x512xf32> to vector<8x128xf32>
    %31 = arith.negf %30 : vector<8x128xf32>
    %32 = math.exp %31 : vector<8x128xf32>
    %cst_15 = arith.constant 1.000000e+00 : f32
    %33 = vector.broadcast %cst_15 : f32 to vector<8x128xf32>
    %34 = arith.addf %33, %32 : vector<8x128xf32>
    %35 = arith.divf %33, %34 : vector<8x128xf32>
    %36 = arith.mulf %27, %4 : vector<8x128xf32>
    %37 = arith.mulf %21, %29 : vector<8x128xf32>
    %38 = arith.addf %36, %37 : vector<8x128xf32>
    %39 = math.tanh %38 : vector<8x128xf32>
    %40 = arith.mulf %35, %39 : vector<8x128xf32>
    %c8_i32_16 = arith.constant 8 : i32
    %41 = arith.muli %c0_i32, %c8_i32_16 : i32
    %c0_i32_17 = arith.constant 0 : i32
    %42 = arith.addi %c0_i32_17, %41 : i32
    %43 = tpu.assume_multiple %42, 8 : i32
    %44 = arith.index_cast %43 : i32 to index
    %c0_18 = arith.constant 0 : index
    %45 = vector.load %arg11[%44, %c0_18] : memref<64x128xf32, #tpu.memory_space<vmem>>, vector<8x128xf32>
    tpu.vector_store %arg11[%44, %c0_18], %40 {strides = array<i32>} : memref<64x128xf32, #tpu.memory_space<vmem>>, vector<8x128xf32>,
    %c1_i32 = arith.constant 1 : i32
    %c8_i32_19 = arith.constant 8 : i32
    %46 = arith.muli %c1_i32, %c8_i32_19 : i32
    %47 = tpu.assume_multiple %46, 8 : i32
    %48 = arith.index_cast %47 : i32 to index
    %c0_20 = arith.constant 0 : index
    %49 = vector.load %arg10[%48, %c0_20] : memref<64x512xf32, #tpu.memory_space<vmem>>, vector<8x512xf32>
    %cst_21 = arith.constant dense<0.000000e+00> : vector<8x512xf32>
    %50 = tpu.matmul %40, %1, %cst_21 {dimension_numbers = #tpu.dot_dimension_numbers<[1], [0], [0], [1], [0, 0, 1, 1], [], []>} : vector<8x128xf32>, vector<128x512xf32>, vector<8x512xf32> -> vector<8x512xf32>
    %51 = arith.addf %49, %50 : vector<8x512xf32>
    %52 = vector.extract_strided_slice %51 {offsets = [0, 0], sizes = [8, 128], strides = [1, 1]} : vector<8x512xf32> to vector<8x128xf32>
    %53 = arith.negf %52 : vector<8x128xf32>
    %54 = math.exp %53 : vector<8x128xf32>
    %cst_22 = arith.constant 1.000000e+00 : f32
    %55 = vector.broadcast %cst_22 : f32 to vector<8x128xf32>
    %56 = arith.addf %55, %54 : vector<8x128xf32>
    %57 = arith.divf %55, %56 : vector<8x128xf32>
    %58 = vector.extract_strided_slice %51 {offsets = [0, 128], sizes = [8, 128], strides = [1, 1]} : vector<8x512xf32> to vector<8x128xf32>
    %59 = arith.negf %58 : vector<8x128xf32>
    %60 = math.exp %59 : vector<8x128xf32>
    %cst_23 = arith.constant 1.000000e+00 : f32
    %61 = vector.broadcast %cst_23 : f32 to vector<8x128xf32>
    %62 = arith.addf %61, %60 : vector<8x128xf32>
    %63 = arith.divf %61, %62 : vector<8x128xf32>
    %64 = vector.extract_strided_slice %51 {offsets = [0, 256], sizes = [8, 128], strides = [1, 1]} : vector<8x512xf32> to vector<8x128xf32>
    %65 = math.tanh %64 : vector<8x128xf32>
    %66 = vector.extract_strided_slice %51 {offsets = [0, 384], sizes = [8, 128], strides = [1, 1]} : vector<8x512xf32> to vector<8x128xf32>
    %67 = arith.negf %66 : vector<8x128xf32>
    %68 = math.exp %67 : vector<8x128xf32>
    %cst_24 = arith.constant 1.000000e+00 : f32
    %69 = vector.broadcast %cst_24 : f32 to vector<8x128xf32>
    %70 = arith.addf %69, %68 : vector<8x128xf32>
    %71 = arith.divf %69, %70 : vector<8x128xf32>
    %72 = arith.mulf %63, %38 : vector<8x128xf32>
    %73 = arith.mulf %57, %65 : vector<8x128xf32>
    %74 = arith.addf %72, %73 : vector<8x128xf32>
    %75 = math.tanh %74 : vector<8x128xf32>
    %76 = arith.mulf %71, %75 : vector<8x128xf32>
    %c8_i32_25 = arith.constant 8 : i32
    %77 = arith.muli %c1_i32, %c8_i32_25 : i32
    %c0_i32_26 = arith.constant 0 : i32
    %78 = arith.addi %c0_i32_26, %77 : i32
    %79 = tpu.assume_multiple %78, 8 : i32
    %80 = arith.index_cast %79 : i32 to index
    %c0_27 = arith.constant 0 : index
    %81 = vector.load %arg11[%80, %c0_27] : memref<64x128xf32, #tpu.memory_space<vmem>>, vector<8x128xf32>
    tpu.vector_store %arg11[%80, %c0_27], %76 {strides = array<i32>} : memref<64x128xf32, #tpu.memory_space<vmem>>, vector<8x128xf32>,
    %c2_i32 = arith.constant 2 : i32
    %c8_i32_28 = arith.constant 8 : i32
    %82 = arith.muli %c2_i32, %c8_i32_28 : i32
    %83 = tpu.assume_multiple %82, 8 : i32
    %84 = arith.index_cast %83 : i32 to index
    %c0_29 = arith.constant 0 : index
    %85 = vector.load %arg10[%84, %c0_29] : memref<64x512xf32, #tpu.memory_space<vmem>>, vector<8x512xf32>
    %cst_30 = arith.constant dense<0.000000e+00> : vector<8x512xf32>
    %86 = tpu.matmul %76, %1, %cst_30 {dimension_numbers = #tpu.dot_dimension_numbers<[1], [0], [0], [1], [0, 0, 1, 1], [], []>} : vector<8x128xf32>, vector<128x512xf32>, vector<8x512xf32> -> vector<8x512xf32>
    %87 = arith.addf %85, %86 : vector<8x512xf32>
    %88 = vector.extract_strided_slice %87 {offsets = [0, 0], sizes = [8, 128], strides = [1, 1]} : vector<8x512xf32> to vector<8x128xf32>
    %89 = arith.negf %88 : vector<8x128xf32>
    %90 = math.exp %89 : vector<8x128xf32>
    %cst_31 = arith.constant 1.000000e+00 : f32
    %91 = vector.broadcast %cst_31 : f32 to vector<8x128xf32>
    %92 = arith.addf %91, %90 : vector<8x128xf32>
    %93 = arith.divf %91, %92 : vector<8x128xf32>
    %94 = vector.extract_strided_slice %87 {offsets = [0, 128], sizes = [8, 128], strides = [1, 1]} : vector<8x512xf32> to vector<8x128xf32>
    %95 = arith.negf %94 : vector<8x128xf32>
    %96 = math.exp %95 : vector<8x128xf32>
    %cst_32 = arith.constant 1.000000e+00 : f32
    %97 = vector.broadcast %cst_32 : f32 to vector<8x128xf32>
    %98 = arith.addf %97, %96 : vector<8x128xf32>
    %99 = arith.divf %97, %98 : vector<8x128xf32>
    %100 = vector.extract_strided_slice %87 {offsets = [0, 256], sizes = [8, 128], strides = [1, 1]} : vector<8x512xf32> to vector<8x128xf32>
    %101 = math.tanh %100 : vector<8x128xf32>
    %102 = vector.extract_strided_slice %87 {offsets = [0, 384], sizes = [8, 128], strides = [1, 1]} : vector<8x512xf32> to vector<8x128xf32>
    %103 = arith.negf %102 : vector<8x128xf32>
    %104 = math.exp %103 : vector<8x128xf32>
    %cst_33 = arith.constant 1.000000e+00 : f32
    %105 = vector.broadcast %cst_33 : f32 to vector<8x128xf32>
    %106 = arith.addf %105, %104 : vector<8x128xf32>
    %107 = arith.divf %105, %106 : vector<8x128xf32>
    %108 = arith.mulf %99, %74 : vector<8x128xf32>
    %109 = arith.mulf %93, %101 : vector<8x128xf32>
    %110 = arith.addf %108, %109 : vector<8x128xf32>
    %111 = math.tanh %110 : vector<8x128xf32>
    %112 = arith.mulf %107, %111 : vector<8x128xf32>
    %c8_i32_34 = arith.constant 8 : i32
    %113 = arith.muli %c2_i32, %c8_i32_34 : i32
    %c0_i32_35 = arith.constant 0 : i32
    %114 = arith.addi %c0_i32_35, %113 : i32
    %115 = tpu.assume_multiple %114, 8 : i32
    %116 = arith.index_cast %115 : i32 to index
    %c0_36 = arith.constant 0 : index
    %117 = vector.load %arg11[%116, %c0_36] : memref<64x128xf32, #tpu.memory_space<vmem>>, vector<8x128xf32>
    tpu.vector_store %arg11[%116, %c0_36], %112 {strides = array<i32>} : memref<64x128xf32, #tpu.memory_space<vmem>>, vector<8x128xf32>,
    %c3_i32 = arith.constant 3 : i32
    %c8_i32_37 = arith.constant 8 : i32
    %118 = arith.muli %c3_i32, %c8_i32_37 : i32
    %119 = tpu.assume_multiple %118, 8 : i32
    %120 = arith.index_cast %119 : i32 to index
    %c0_38 = arith.constant 0 : index
    %121 = vector.load %arg10[%120, %c0_38] : memref<64x512xf32, #tpu.memory_space<vmem>>, vector<8x512xf32>
    %cst_39 = arith.constant dense<0.000000e+00> : vector<8x512xf32>
    %122 = tpu.matmul %112, %1, %cst_39 {dimension_numbers = #tpu.dot_dimension_numbers<[1], [0], [0], [1], [0, 0, 1, 1], [], []>} : vector<8x128xf32>, vector<128x512xf32>, vector<8x512xf32> -> vector<8x512xf32>
    %123 = arith.addf %121, %122 : vector<8x512xf32>
    %124 = vector.extract_strided_slice %123 {offsets = [0, 0], sizes = [8, 128], strides = [1, 1]} : vector<8x512xf32> to vector<8x128xf32>
    %125 = arith.negf %124 : vector<8x128xf32>
    %126 = math.exp %125 : vector<8x128xf32>
    %cst_40 = arith.constant 1.000000e+00 : f32
    %127 = vector.broadcast %cst_40 : f32 to vector<8x128xf32>
    %128 = arith.addf %127, %126 : vector<8x128xf32>
    %129 = arith.divf %127, %128 : vector<8x128xf32>
    %130 = vector.extract_strided_slice %123 {offsets = [0, 128], sizes = [8, 128], strides = [1, 1]} : vector<8x512xf32> to vector<8x128xf32>
    %131 = arith.negf %130 : vector<8x128xf32>
    %132 = math.exp %131 : vector<8x128xf32>
    %cst_41 = arith.constant 1.000000e+00 : f32
    %133 = vector.broadcast %cst_41 : f32 to vector<8x128xf32>
    %134 = arith.addf %133, %132 : vector<8x128xf32>
    %135 = arith.divf %133, %134 : vector<8x128xf32>
    %136 = vector.extract_strided_slice %123 {offsets = [0, 256], sizes = [8, 128], strides = [1, 1]} : vector<8x512xf32> to vector<8x128xf32>
    %137 = math.tanh %136 : vector<8x128xf32>
    %138 = vector.extract_strided_slice %123 {offsets = [0, 384], sizes = [8, 128], strides = [1, 1]} : vector<8x512xf32> to vector<8x128xf32>
    %139 = arith.negf %138 : vector<8x128xf32>
    %140 = math.exp %139 : vector<8x128xf32>
    %cst_42 = arith.constant 1.000000e+00 : f32
    %141 = vector.broadcast %cst_42 : f32 to vector<8x128xf32>
    %142 = arith.addf %141, %140 : vector<8x128xf32>
    %143 = arith.divf %141, %142 : vector<8x128xf32>
    %144 = arith.mulf %135, %110 : vector<8x128xf32>
    %145 = arith.mulf %129, %137 : vector<8x128xf32>
    %146 = arith.addf %144, %145 : vector<8x128xf32>
    %147 = math.tanh %146 : vector<8x128xf32>
    %148 = arith.mulf %143, %147 : vector<8x128xf32>
    %c8_i32_43 = arith.constant 8 : i32
    %149 = arith.muli %c3_i32, %c8_i32_43 : i32
    %c0_i32_44 = arith.constant 0 : i32
    %150 = arith.addi %c0_i32_44, %149 : i32
    %151 = tpu.assume_multiple %150, 8 : i32
    %152 = arith.index_cast %151 : i32 to index
    %c0_45 = arith.constant 0 : index
    %153 = vector.load %arg11[%152, %c0_45] : memref<64x128xf32, #tpu.memory_space<vmem>>, vector<8x128xf32>
    tpu.vector_store %arg11[%152, %c0_45], %148 {strides = array<i32>} : memref<64x128xf32, #tpu.memory_space<vmem>>, vector<8x128xf32>,
    %c4_i32 = arith.constant 4 : i32
    %c8_i32_46 = arith.constant 8 : i32
    %154 = arith.muli %c4_i32, %c8_i32_46 : i32
    %155 = tpu.assume_multiple %154, 8 : i32
    %156 = arith.index_cast %155 : i32 to index
    %c0_47 = arith.constant 0 : index
    %157 = vector.load %arg10[%156, %c0_47] : memref<64x512xf32, #tpu.memory_space<vmem>>, vector<8x512xf32>
    %cst_48 = arith.constant dense<0.000000e+00> : vector<8x512xf32>
    %158 = tpu.matmul %148, %1, %cst_48 {dimension_numbers = #tpu.dot_dimension_numbers<[1], [0], [0], [1], [0, 0, 1, 1], [], []>} : vector<8x128xf32>, vector<128x512xf32>, vector<8x512xf32> -> vector<8x512xf32>
    %159 = arith.addf %157, %158 : vector<8x512xf32>
    %160 = vector.extract_strided_slice %159 {offsets = [0, 0], sizes = [8, 128], strides = [1, 1]} : vector<8x512xf32> to vector<8x128xf32>
    %161 = arith.negf %160 : vector<8x128xf32>
    %162 = math.exp %161 : vector<8x128xf32>
    %cst_49 = arith.constant 1.000000e+00 : f32
    %163 = vector.broadcast %cst_49 : f32 to vector<8x128xf32>
    %164 = arith.addf %163, %162 : vector<8x128xf32>
    %165 = arith.divf %163, %164 : vector<8x128xf32>
    %166 = vector.extract_strided_slice %159 {offsets = [0, 128], sizes = [8, 128], strides = [1, 1]} : vector<8x512xf32> to vector<8x128xf32>
    %167 = arith.negf %166 : vector<8x128xf32>
    %168 = math.exp %167 : vector<8x128xf32>
    %cst_50 = arith.constant 1.000000e+00 : f32
    %169 = vector.broadcast %cst_50 : f32 to vector<8x128xf32>
    %170 = arith.addf %169, %168 : vector<8x128xf32>
    %171 = arith.divf %169, %170 : vector<8x128xf32>
    %172 = vector.extract_strided_slice %159 {offsets = [0, 256], sizes = [8, 128], strides = [1, 1]} : vector<8x512xf32> to vector<8x128xf32>
    %173 = math.tanh %172 : vector<8x128xf32>
    %174 = vector.extract_strided_slice %159 {offsets = [0, 384], sizes = [8, 128], strides = [1, 1]} : vector<8x512xf32> to vector<8x128xf32>
    %175 = arith.negf %174 : vector<8x128xf32>
    %176 = math.exp %175 : vector<8x128xf32>
    %cst_51 = arith.constant 1.000000e+00 : f32
    %177 = vector.broadcast %cst_51 : f32 to vector<8x128xf32>
    %178 = arith.addf %177, %176 : vector<8x128xf32>
    %179 = arith.divf %177, %178 : vector<8x128xf32>
    %180 = arith.mulf %171, %146 : vector<8x128xf32>
    %181 = arith.mulf %165, %173 : vector<8x128xf32>
    %182 = arith.addf %180, %181 : vector<8x128xf32>
    %183 = math.tanh %182 : vector<8x128xf32>
    %184 = arith.mulf %179, %183 : vector<8x128xf32>
    %c8_i32_52 = arith.constant 8 : i32
    %185 = arith.muli %c4_i32, %c8_i32_52 : i32
    %c0_i32_53 = arith.constant 0 : i32
    %186 = arith.addi %c0_i32_53, %185 : i32
    %187 = tpu.assume_multiple %186, 8 : i32
    %188 = arith.index_cast %187 : i32 to index
    %c0_54 = arith.constant 0 : index
    %189 = vector.load %arg11[%188, %c0_54] : memref<64x128xf32, #tpu.memory_space<vmem>>, vector<8x128xf32>
    tpu.vector_store %arg11[%188, %c0_54], %184 {strides = array<i32>} : memref<64x128xf32, #tpu.memory_space<vmem>>, vector<8x128xf32>,
    %c5_i32 = arith.constant 5 : i32
    %c8_i32_55 = arith.constant 8 : i32
    %190 = arith.muli %c5_i32, %c8_i32_55 : i32
    %191 = tpu.assume_multiple %190, 8 : i32
    %192 = arith.index_cast %191 : i32 to index
    %c0_56 = arith.constant 0 : index
    %193 = vector.load %arg10[%192, %c0_56] : memref<64x512xf32, #tpu.memory_space<vmem>>, vector<8x512xf32>
    %cst_57 = arith.constant dense<0.000000e+00> : vector<8x512xf32>
    %194 = tpu.matmul %184, %1, %cst_57 {dimension_numbers = #tpu.dot_dimension_numbers<[1], [0], [0], [1], [0, 0, 1, 1], [], []>} : vector<8x128xf32>, vector<128x512xf32>, vector<8x512xf32> -> vector<8x512xf32>
    %195 = arith.addf %193, %194 : vector<8x512xf32>
    %196 = vector.extract_strided_slice %195 {offsets = [0, 0], sizes = [8, 128], strides = [1, 1]} : vector<8x512xf32> to vector<8x128xf32>
    %197 = arith.negf %196 : vector<8x128xf32>
    %198 = math.exp %197 : vector<8x128xf32>
    %cst_58 = arith.constant 1.000000e+00 : f32
    %199 = vector.broadcast %cst_58 : f32 to vector<8x128xf32>
    %200 = arith.addf %199, %198 : vector<8x128xf32>
    %201 = arith.divf %199, %200 : vector<8x128xf32>
    %202 = vector.extract_strided_slice %195 {offsets = [0, 128], sizes = [8, 128], strides = [1, 1]} : vector<8x512xf32> to vector<8x128xf32>
    %203 = arith.negf %202 : vector<8x128xf32>
    %204 = math.exp %203 : vector<8x128xf32>
    %cst_59 = arith.constant 1.000000e+00 : f32
    %205 = vector.broadcast %cst_59 : f32 to vector<8x128xf32>
    %206 = arith.addf %205, %204 : vector<8x128xf32>
    %207 = arith.divf %205, %206 : vector<8x128xf32>
    %208 = vector.extract_strided_slice %195 {offsets = [0, 256], sizes = [8, 128], strides = [1, 1]} : vector<8x512xf32> to vector<8x128xf32>
    %209 = math.tanh %208 : vector<8x128xf32>
    %210 = vector.extract_strided_slice %195 {offsets = [0, 384], sizes = [8, 128], strides = [1, 1]} : vector<8x512xf32> to vector<8x128xf32>
    %211 = arith.negf %210 : vector<8x128xf32>
    %212 = math.exp %211 : vector<8x128xf32>
    %cst_60 = arith.constant 1.000000e+00 : f32
    %213 = vector.broadcast %cst_60 : f32 to vector<8x128xf32>
    %214 = arith.addf %213, %212 : vector<8x128xf32>
    %215 = arith.divf %213, %214 : vector<8x128xf32>
    %216 = arith.mulf %207, %182 : vector<8x128xf32>
    %217 = arith.mulf %201, %209 : vector<8x128xf32>
    %218 = arith.addf %216, %217 : vector<8x128xf32>
    %219 = math.tanh %218 : vector<8x128xf32>
    %220 = arith.mulf %215, %219 : vector<8x128xf32>
    %c8_i32_61 = arith.constant 8 : i32
    %221 = arith.muli %c5_i32, %c8_i32_61 : i32
    %c0_i32_62 = arith.constant 0 : i32
    %222 = arith.addi %c0_i32_62, %221 : i32
    %223 = tpu.assume_multiple %222, 8 : i32
    %224 = arith.index_cast %223 : i32 to index
    %c0_63 = arith.constant 0 : index
    %225 = vector.load %arg11[%224, %c0_63] : memref<64x128xf32, #tpu.memory_space<vmem>>, vector<8x128xf32>
    tpu.vector_store %arg11[%224, %c0_63], %220 {strides = array<i32>} : memref<64x128xf32, #tpu.memory_space<vmem>>, vector<8x128xf32>,
    %c6_i32 = arith.constant 6 : i32
    %c8_i32_64 = arith.constant 8 : i32
    %226 = arith.muli %c6_i32, %c8_i32_64 : i32
    %227 = tpu.assume_multiple %226, 8 : i32
    %228 = arith.index_cast %227 : i32 to index
    %c0_65 = arith.constant 0 : index
    %229 = vector.load %arg10[%228, %c0_65] : memref<64x512xf32, #tpu.memory_space<vmem>>, vector<8x512xf32>
    %cst_66 = arith.constant dense<0.000000e+00> : vector<8x512xf32>
    %230 = tpu.matmul %220, %1, %cst_66 {dimension_numbers = #tpu.dot_dimension_numbers<[1], [0], [0], [1], [0, 0, 1, 1], [], []>} : vector<8x128xf32>, vector<128x512xf32>, vector<8x512xf32> -> vector<8x512xf32>
    %231 = arith.addf %229, %230 : vector<8x512xf32>
    %232 = vector.extract_strided_slice %231 {offsets = [0, 0], sizes = [8, 128], strides = [1, 1]} : vector<8x512xf32> to vector<8x128xf32>
    %233 = arith.negf %232 : vector<8x128xf32>
    %234 = math.exp %233 : vector<8x128xf32>
    %cst_67 = arith.constant 1.000000e+00 : f32
    %235 = vector.broadcast %cst_67 : f32 to vector<8x128xf32>
    %236 = arith.addf %235, %234 : vector<8x128xf32>
    %237 = arith.divf %235, %236 : vector<8x128xf32>
    %238 = vector.extract_strided_slice %231 {offsets = [0, 128], sizes = [8, 128], strides = [1, 1]} : vector<8x512xf32> to vector<8x128xf32>
    %239 = arith.negf %238 : vector<8x128xf32>
    %240 = math.exp %239 : vector<8x128xf32>
    %cst_68 = arith.constant 1.000000e+00 : f32
    %241 = vector.broadcast %cst_68 : f32 to vector<8x128xf32>
    %242 = arith.addf %241, %240 : vector<8x128xf32>
    %243 = arith.divf %241, %242 : vector<8x128xf32>
    %244 = vector.extract_strided_slice %231 {offsets = [0, 256], sizes = [8, 128], strides = [1, 1]} : vector<8x512xf32> to vector<8x128xf32>
    %245 = math.tanh %244 : vector<8x128xf32>
    %246 = vector.extract_strided_slice %231 {offsets = [0, 384], sizes = [8, 128], strides = [1, 1]} : vector<8x512xf32> to vector<8x128xf32>
    %247 = arith.negf %246 : vector<8x128xf32>
    %248 = math.exp %247 : vector<8x128xf32>
    %cst_69 = arith.constant 1.000000e+00 : f32
    %249 = vector.broadcast %cst_69 : f32 to vector<8x128xf32>
    %250 = arith.addf %249, %248 : vector<8x128xf32>
    %251 = arith.divf %249, %250 : vector<8x128xf32>
    %252 = arith.mulf %243, %218 : vector<8x128xf32>
    %253 = arith.mulf %237, %245 : vector<8x128xf32>
    %254 = arith.addf %252, %253 : vector<8x128xf32>
    %255 = math.tanh %254 : vector<8x128xf32>
    %256 = arith.mulf %251, %255 : vector<8x128xf32>
    %c8_i32_70 = arith.constant 8 : i32
    %257 = arith.muli %c6_i32, %c8_i32_70 : i32
    %c0_i32_71 = arith.constant 0 : i32
    %258 = arith.addi %c0_i32_71, %257 : i32
    %259 = tpu.assume_multiple %258, 8 : i32
    %260 = arith.index_cast %259 : i32 to index
    %c0_72 = arith.constant 0 : index
    %261 = vector.load %arg11[%260, %c0_72] : memref<64x128xf32, #tpu.memory_space<vmem>>, vector<8x128xf32>
    tpu.vector_store %arg11[%260, %c0_72], %256 {strides = array<i32>} : memref<64x128xf32, #tpu.memory_space<vmem>>, vector<8x128xf32>,
    %c7_i32 = arith.constant 7 : i32
    %c8_i32_73 = arith.constant 8 : i32
    %262 = arith.muli %c7_i32, %c8_i32_73 : i32
    %263 = tpu.assume_multiple %262, 8 : i32
    %264 = arith.index_cast %263 : i32 to index
    %c0_74 = arith.constant 0 : index
    %265 = vector.load %arg10[%264, %c0_74] : memref<64x512xf32, #tpu.memory_space<vmem>>, vector<8x512xf32>
    %cst_75 = arith.constant dense<0.000000e+00> : vector<8x512xf32>
    %266 = tpu.matmul %256, %1, %cst_75 {dimension_numbers = #tpu.dot_dimension_numbers<[1], [0], [0], [1], [0, 0, 1, 1], [], []>} : vector<8x128xf32>, vector<128x512xf32>, vector<8x512xf32> -> vector<8x512xf32>
    %267 = arith.addf %265, %266 : vector<8x512xf32>
    %268 = vector.extract_strided_slice %267 {offsets = [0, 0], sizes = [8, 128], strides = [1, 1]} : vector<8x512xf32> to vector<8x128xf32>
    %269 = arith.negf %268 : vector<8x128xf32>
    %270 = math.exp %269 : vector<8x128xf32>
    %cst_76 = arith.constant 1.000000e+00 : f32
    %271 = vector.broadcast %cst_76 : f32 to vector<8x128xf32>
    %272 = arith.addf %271, %270 : vector<8x128xf32>
    %273 = arith.divf %271, %272 : vector<8x128xf32>
    %274 = vector.extract_strided_slice %267 {offsets = [0, 128], sizes = [8, 128], strides = [1, 1]} : vector<8x512xf32> to vector<8x128xf32>
    %275 = arith.negf %274 : vector<8x128xf32>
    %276 = math.exp %275 : vector<8x128xf32>
    %cst_77 = arith.constant 1.000000e+00 : f32
    %277 = vector.broadcast %cst_77 : f32 to vector<8x128xf32>
    %278 = arith.addf %277, %276 : vector<8x128xf32>
    %279 = arith.divf %277, %278 : vector<8x128xf32>
    %280 = vector.extract_strided_slice %267 {offsets = [0, 256], sizes = [8, 128], strides = [1, 1]} : vector<8x512xf32> to vector<8x128xf32>
    %281 = math.tanh %280 : vector<8x128xf32>
    %282 = vector.extract_strided_slice %267 {offsets = [0, 384], sizes = [8, 128], strides = [1, 1]} : vector<8x512xf32> to vector<8x128xf32>
    %283 = arith.negf %282 : vector<8x128xf32>
    %284 = math.exp %283 : vector<8x128xf32>
    %cst_78 = arith.constant 1.000000e+00 : f32
    %285 = vector.broadcast %cst_78 : f32 to vector<8x128xf32>
    %286 = arith.addf %285, %284 : vector<8x128xf32>
    %287 = arith.divf %285, %286 : vector<8x128xf32>
    %288 = arith.mulf %279, %254 : vector<8x128xf32>
    %289 = arith.mulf %273, %281 : vector<8x128xf32>
    %290 = arith.addf %288, %289 : vector<8x128xf32>
    %291 = math.tanh %290 : vector<8x128xf32>
    %292 = arith.mulf %287, %291 : vector<8x128xf32>
    %c8_i32_79 = arith.constant 8 : i32
    %293 = arith.muli %c7_i32, %c8_i32_79 : i32
    %c0_i32_80 = arith.constant 0 : i32
    %294 = arith.addi %c0_i32_80, %293 : i32
    %295 = tpu.assume_multiple %294, 8 : i32
    %296 = arith.index_cast %295 : i32 to index
    %c0_81 = arith.constant 0 : index
    %297 = vector.load %arg11[%296, %c0_81] : memref<64x128xf32, #tpu.memory_space<vmem>>, vector<8x128xf32>
    tpu.vector_store %arg11[%296, %c0_81], %292 {strides = array<i32>} : memref<64x128xf32, #tpu.memory_space<vmem>>, vector<8x128xf32>,
    %c8_i32_82 = arith.constant 8 : i32
    %c0_83 = arith.constant 0 : index
    %c0_84 = arith.constant 0 : index
    %298 = vector.load %arg4[%c0_83, %c0_84] : memref<128x512xf32, #tpu.memory_space<vmem>>, vector<128x512xf32>
    %c0_85 = arith.constant 0 : index
    %c0_86 = arith.constant 0 : index
    %299 = vector.load %arg5[%c0_85, %c0_86] : memref<128x512xf32, #tpu.memory_space<vmem>>, vector<128x512xf32>
    %c0_87 = arith.constant 0 : index
    %c0_88 = arith.constant 0 : index
    %300 = vector.load %arg6[%c0_87, %c0_88] : memref<1x512xf32, #tpu.memory_space<vmem>>, vector<1x512xf32>
    %cst_89 = arith.constant 0.000000e+00 : f32
    %301 = vector.broadcast %cst_89 : f32 to vector<8x128xf32>
    %cst_90 = arith.constant 0.000000e+00 : f32
    %302 = vector.broadcast %cst_90 : f32 to vector<8x128xf32>
    %c0_91 = arith.constant 0 : index
    %c0_92 = arith.constant 0 : index
    %303 = vector.load %arg11[%c0_91, %c0_92] : memref<64x128xf32, #tpu.memory_space<vmem>>, vector<64x128xf32>
    %cst_93 = arith.constant dense<0.000000e+00> : vector<64x512xf32>
    %304 = tpu.matmul %303, %298, %cst_93 {dimension_numbers = #tpu.dot_dimension_numbers<[1], [0], [0], [1], [0, 0, 1, 1], [], []>} : vector<64x128xf32>, vector<128x512xf32>, vector<64x512xf32> -> vector<64x512xf32>
    %305 = vector.broadcast %300 : vector<1x512xf32> to vector<64x512xf32>
    %306 = arith.addf %304, %305 : vector<64x512xf32>
    %c0_94 = arith.constant 0 : index
    %c0_95 = arith.constant 0 : index
    %307 = vector.load %arg10[%c0_94, %c0_95] : memref<64x512xf32, #tpu.memory_space<vmem>>, vector<64x512xf32>
    tpu.vector_store %arg10[%c0_94, %c0_95], %306 {strides = array<i32>} : memref<64x512xf32, #tpu.memory_space<vmem>>, vector<64x512xf32>,
    %c0_i32_96 = arith.constant 0 : i32
    %c8_i32_97 = arith.constant 8 : i32
    %308 = arith.muli %c0_i32_96, %c8_i32_97 : i32
    %309 = tpu.assume_multiple %308, 8 : i32
    %310 = arith.index_cast %309 : i32 to index
    %c0_98 = arith.constant 0 : index
    %311 = vector.load %arg10[%310, %c0_98] : memref<64x512xf32, #tpu.memory_space<vmem>>, vector<8x512xf32>
    %cst_99 = arith.constant dense<0.000000e+00> : vector<8x512xf32>
    %312 = tpu.matmul %301, %299, %cst_99 {dimension_numbers = #tpu.dot_dimension_numbers<[1], [0], [0], [1], [0, 0, 1, 1], [], []>} : vector<8x128xf32>, vector<128x512xf32>, vector<8x512xf32> -> vector<8x512xf32>
    %313 = arith.addf %311, %312 : vector<8x512xf32>
    %314 = vector.extract_strided_slice %313 {offsets = [0, 0], sizes = [8, 128], strides = [1, 1]} : vector<8x512xf32> to vector<8x128xf32>
    %315 = arith.negf %314 : vector<8x128xf32>
    %316 = math.exp %315 : vector<8x128xf32>
    %cst_100 = arith.constant 1.000000e+00 : f32
    %317 = vector.broadcast %cst_100 : f32 to vector<8x128xf32>
    %318 = arith.addf %317, %316 : vector<8x128xf32>
    %319 = arith.divf %317, %318 : vector<8x128xf32>
    %320 = vector.extract_strided_slice %313 {offsets = [0, 128], sizes = [8, 128], strides = [1, 1]} : vector<8x512xf32> to vector<8x128xf32>
    %321 = arith.negf %320 : vector<8x128xf32>
    %322 = math.exp %321 : vector<8x128xf32>
    %cst_101 = arith.constant 1.000000e+00 : f32
    %323 = vector.broadcast %cst_101 : f32 to vector<8x128xf32>
    %324 = arith.addf %323, %322 : vector<8x128xf32>
    %325 = arith.divf %323, %324 : vector<8x128xf32>
    %326 = vector.extract_strided_slice %313 {offsets = [0, 256], sizes = [8, 128], strides = [1, 1]} : vector<8x512xf32> to vector<8x128xf32>
    %327 = math.tanh %326 : vector<8x128xf32>
    %328 = vector.extract_strided_slice %313 {offsets = [0, 384], sizes = [8, 128], strides = [1, 1]} : vector<8x512xf32> to vector<8x128xf32>
    %329 = arith.negf %328 : vector<8x128xf32>
    %330 = math.exp %329 : vector<8x128xf32>
    %cst_102 = arith.constant 1.000000e+00 : f32
    %331 = vector.broadcast %cst_102 : f32 to vector<8x128xf32>
    %332 = arith.addf %331, %330 : vector<8x128xf32>
    %333 = arith.divf %331, %332 : vector<8x128xf32>
    %334 = arith.mulf %325, %302 : vector<8x128xf32>
    %335 = arith.mulf %319, %327 : vector<8x128xf32>
    %336 = arith.addf %334, %335 : vector<8x128xf32>
    %337 = math.tanh %336 : vector<8x128xf32>
    %338 = arith.mulf %333, %337 : vector<8x128xf32>
    %c1_i32_103 = arith.constant 1 : i32
    %c8_i32_104 = arith.constant 8 : i32
    %339 = arith.muli %c1_i32_103, %c8_i32_104 : i32
    %340 = tpu.assume_multiple %339, 8 : i32
    %341 = arith.index_cast %340 : i32 to index
    %c0_105 = arith.constant 0 : index
    %342 = vector.load %arg10[%341, %c0_105] : memref<64x512xf32, #tpu.memory_space<vmem>>, vector<8x512xf32>
    %cst_106 = arith.constant dense<0.000000e+00> : vector<8x512xf32>
    %343 = tpu.matmul %338, %299, %cst_106 {dimension_numbers = #tpu.dot_dimension_numbers<[1], [0], [0], [1], [0, 0, 1, 1], [], []>} : vector<8x128xf32>, vector<128x512xf32>, vector<8x512xf32> -> vector<8x512xf32>
    %344 = arith.addf %342, %343 : vector<8x512xf32>
    %345 = vector.extract_strided_slice %344 {offsets = [0, 0], sizes = [8, 128], strides = [1, 1]} : vector<8x512xf32> to vector<8x128xf32>
    %346 = arith.negf %345 : vector<8x128xf32>
    %347 = math.exp %346 : vector<8x128xf32>
    %cst_107 = arith.constant 1.000000e+00 : f32
    %348 = vector.broadcast %cst_107 : f32 to vector<8x128xf32>
    %349 = arith.addf %348, %347 : vector<8x128xf32>
    %350 = arith.divf %348, %349 : vector<8x128xf32>
    %351 = vector.extract_strided_slice %344 {offsets = [0, 128], sizes = [8, 128], strides = [1, 1]} : vector<8x512xf32> to vector<8x128xf32>
    %352 = arith.negf %351 : vector<8x128xf32>
    %353 = math.exp %352 : vector<8x128xf32>
    %cst_108 = arith.constant 1.000000e+00 : f32
    %354 = vector.broadcast %cst_108 : f32 to vector<8x128xf32>
    %355 = arith.addf %354, %353 : vector<8x128xf32>
    %356 = arith.divf %354, %355 : vector<8x128xf32>
    %357 = vector.extract_strided_slice %344 {offsets = [0, 256], sizes = [8, 128], strides = [1, 1]} : vector<8x512xf32> to vector<8x128xf32>
    %358 = math.tanh %357 : vector<8x128xf32>
    %359 = vector.extract_strided_slice %344 {offsets = [0, 384], sizes = [8, 128], strides = [1, 1]} : vector<8x512xf32> to vector<8x128xf32>
    %360 = arith.negf %359 : vector<8x128xf32>
    %361 = math.exp %360 : vector<8x128xf32>
    %cst_109 = arith.constant 1.000000e+00 : f32
    %362 = vector.broadcast %cst_109 : f32 to vector<8x128xf32>
    %363 = arith.addf %362, %361 : vector<8x128xf32>
    %364 = arith.divf %362, %363 : vector<8x128xf32>
    %365 = arith.mulf %356, %336 : vector<8x128xf32>
    %366 = arith.mulf %350, %358 : vector<8x128xf32>
    %367 = arith.addf %365, %366 : vector<8x128xf32>
    %368 = math.tanh %367 : vector<8x128xf32>
    %369 = arith.mulf %364, %368 : vector<8x128xf32>
    %c2_i32_110 = arith.constant 2 : i32
    %c8_i32_111 = arith.constant 8 : i32
    %370 = arith.muli %c2_i32_110, %c8_i32_111 : i32
    %371 = tpu.assume_multiple %370, 8 : i32
    %372 = arith.index_cast %371 : i32 to index
    %c0_112 = arith.constant 0 : index
    %373 = vector.load %arg10[%372, %c0_112] : memref<64x512xf32, #tpu.memory_space<vmem>>, vector<8x512xf32>
    %cst_113 = arith.constant dense<0.000000e+00> : vector<8x512xf32>
    %374 = tpu.matmul %369, %299, %cst_113 {dimension_numbers = #tpu.dot_dimension_numbers<[1], [0], [0], [1], [0, 0, 1, 1], [], []>} : vector<8x128xf32>, vector<128x512xf32>, vector<8x512xf32> -> vector<8x512xf32>
    %375 = arith.addf %373, %374 : vector<8x512xf32>
    %376 = vector.extract_strided_slice %375 {offsets = [0, 0], sizes = [8, 128], strides = [1, 1]} : vector<8x512xf32> to vector<8x128xf32>
    %377 = arith.negf %376 : vector<8x128xf32>
    %378 = math.exp %377 : vector<8x128xf32>
    %cst_114 = arith.constant 1.000000e+00 : f32
    %379 = vector.broadcast %cst_114 : f32 to vector<8x128xf32>
    %380 = arith.addf %379, %378 : vector<8x128xf32>
    %381 = arith.divf %379, %380 : vector<8x128xf32>
    %382 = vector.extract_strided_slice %375 {offsets = [0, 128], sizes = [8, 128], strides = [1, 1]} : vector<8x512xf32> to vector<8x128xf32>
    %383 = arith.negf %382 : vector<8x128xf32>
    %384 = math.exp %383 : vector<8x128xf32>
    %cst_115 = arith.constant 1.000000e+00 : f32
    %385 = vector.broadcast %cst_115 : f32 to vector<8x128xf32>
    %386 = arith.addf %385, %384 : vector<8x128xf32>
    %387 = arith.divf %385, %386 : vector<8x128xf32>
    %388 = vector.extract_strided_slice %375 {offsets = [0, 256], sizes = [8, 128], strides = [1, 1]} : vector<8x512xf32> to vector<8x128xf32>
    %389 = math.tanh %388 : vector<8x128xf32>
    %390 = vector.extract_strided_slice %375 {offsets = [0, 384], sizes = [8, 128], strides = [1, 1]} : vector<8x512xf32> to vector<8x128xf32>
    %391 = arith.negf %390 : vector<8x128xf32>
    %392 = math.exp %391 : vector<8x128xf32>
    %cst_116 = arith.constant 1.000000e+00 : f32
    %393 = vector.broadcast %cst_116 : f32 to vector<8x128xf32>
    %394 = arith.addf %393, %392 : vector<8x128xf32>
    %395 = arith.divf %393, %394 : vector<8x128xf32>
    %396 = arith.mulf %387, %367 : vector<8x128xf32>
    %397 = arith.mulf %381, %389 : vector<8x128xf32>
    %398 = arith.addf %396, %397 : vector<8x128xf32>
    %399 = math.tanh %398 : vector<8x128xf32>
    %400 = arith.mulf %395, %399 : vector<8x128xf32>
    %c3_i32_117 = arith.constant 3 : i32
    %c8_i32_118 = arith.constant 8 : i32
    %401 = arith.muli %c3_i32_117, %c8_i32_118 : i32
    %402 = tpu.assume_multiple %401, 8 : i32
    %403 = arith.index_cast %402 : i32 to index
    %c0_119 = arith.constant 0 : index
    %404 = vector.load %arg10[%403, %c0_119] : memref<64x512xf32, #tpu.memory_space<vmem>>, vector<8x512xf32>
    %cst_120 = arith.constant dense<0.000000e+00> : vector<8x512xf32>
    %405 = tpu.matmul %400, %299, %cst_120 {dimension_numbers = #tpu.dot_dimension_numbers<[1], [0], [0], [1], [0, 0, 1, 1], [], []>} : vector<8x128xf32>, vector<128x512xf32>, vector<8x512xf32> -> vector<8x512xf32>
    %406 = arith.addf %404, %405 : vector<8x512xf32>
    %407 = vector.extract_strided_slice %406 {offsets = [0, 0], sizes = [8, 128], strides = [1, 1]} : vector<8x512xf32> to vector<8x128xf32>
    %408 = arith.negf %407 : vector<8x128xf32>
    %409 = math.exp %408 : vector<8x128xf32>
    %cst_121 = arith.constant 1.000000e+00 : f32
    %410 = vector.broadcast %cst_121 : f32 to vector<8x128xf32>
    %411 = arith.addf %410, %409 : vector<8x128xf32>
    %412 = arith.divf %410, %411 : vector<8x128xf32>
    %413 = vector.extract_strided_slice %406 {offsets = [0, 128], sizes = [8, 128], strides = [1, 1]} : vector<8x512xf32> to vector<8x128xf32>
    %414 = arith.negf %413 : vector<8x128xf32>
    %415 = math.exp %414 : vector<8x128xf32>
    %cst_122 = arith.constant 1.000000e+00 : f32
    %416 = vector.broadcast %cst_122 : f32 to vector<8x128xf32>
    %417 = arith.addf %416, %415 : vector<8x128xf32>
    %418 = arith.divf %416, %417 : vector<8x128xf32>
    %419 = vector.extract_strided_slice %406 {offsets = [0, 256], sizes = [8, 128], strides = [1, 1]} : vector<8x512xf32> to vector<8x128xf32>
    %420 = math.tanh %419 : vector<8x128xf32>
    %421 = vector.extract_strided_slice %406 {offsets = [0, 384], sizes = [8, 128], strides = [1, 1]} : vector<8x512xf32> to vector<8x128xf32>
    %422 = arith.negf %421 : vector<8x128xf32>
    %423 = math.exp %422 : vector<8x128xf32>
    %cst_123 = arith.constant 1.000000e+00 : f32
    %424 = vector.broadcast %cst_123 : f32 to vector<8x128xf32>
    %425 = arith.addf %424, %423 : vector<8x128xf32>
    %426 = arith.divf %424, %425 : vector<8x128xf32>
    %427 = arith.mulf %418, %398 : vector<8x128xf32>
    %428 = arith.mulf %412, %420 : vector<8x128xf32>
    %429 = arith.addf %427, %428 : vector<8x128xf32>
    %430 = math.tanh %429 : vector<8x128xf32>
    %431 = arith.mulf %426, %430 : vector<8x128xf32>
    %c4_i32_124 = arith.constant 4 : i32
    %c8_i32_125 = arith.constant 8 : i32
    %432 = arith.muli %c4_i32_124, %c8_i32_125 : i32
    %433 = tpu.assume_multiple %432, 8 : i32
    %434 = arith.index_cast %433 : i32 to index
    %c0_126 = arith.constant 0 : index
    %435 = vector.load %arg10[%434, %c0_126] : memref<64x512xf32, #tpu.memory_space<vmem>>, vector<8x512xf32>
    %cst_127 = arith.constant dense<0.000000e+00> : vector<8x512xf32>
    %436 = tpu.matmul %431, %299, %cst_127 {dimension_numbers = #tpu.dot_dimension_numbers<[1], [0], [0], [1], [0, 0, 1, 1], [], []>} : vector<8x128xf32>, vector<128x512xf32>, vector<8x512xf32> -> vector<8x512xf32>
    %437 = arith.addf %435, %436 : vector<8x512xf32>
    %438 = vector.extract_strided_slice %437 {offsets = [0, 0], sizes = [8, 128], strides = [1, 1]} : vector<8x512xf32> to vector<8x128xf32>
    %439 = arith.negf %438 : vector<8x128xf32>
    %440 = math.exp %439 : vector<8x128xf32>
    %cst_128 = arith.constant 1.000000e+00 : f32
    %441 = vector.broadcast %cst_128 : f32 to vector<8x128xf32>
    %442 = arith.addf %441, %440 : vector<8x128xf32>
    %443 = arith.divf %441, %442 : vector<8x128xf32>
    %444 = vector.extract_strided_slice %437 {offsets = [0, 128], sizes = [8, 128], strides = [1, 1]} : vector<8x512xf32> to vector<8x128xf32>
    %445 = arith.negf %444 : vector<8x128xf32>
    %446 = math.exp %445 : vector<8x128xf32>
    %cst_129 = arith.constant 1.000000e+00 : f32
    %447 = vector.broadcast %cst_129 : f32 to vector<8x128xf32>
    %448 = arith.addf %447, %446 : vector<8x128xf32>
    %449 = arith.divf %447, %448 : vector<8x128xf32>
    %450 = vector.extract_strided_slice %437 {offsets = [0, 256], sizes = [8, 128], strides = [1, 1]} : vector<8x512xf32> to vector<8x128xf32>
    %451 = math.tanh %450 : vector<8x128xf32>
    %452 = vector.extract_strided_slice %437 {offsets = [0, 384], sizes = [8, 128], strides = [1, 1]} : vector<8x512xf32> to vector<8x128xf32>
    %453 = arith.negf %452 : vector<8x128xf32>
    %454 = math.exp %453 : vector<8x128xf32>
    %cst_130 = arith.constant 1.000000e+00 : f32
    %455 = vector.broadcast %cst_130 : f32 to vector<8x128xf32>
    %456 = arith.addf %455, %454 : vector<8x128xf32>
    %457 = arith.divf %455, %456 : vector<8x128xf32>
    %458 = arith.mulf %449, %429 : vector<8x128xf32>
    %459 = arith.mulf %443, %451 : vector<8x128xf32>
    %460 = arith.addf %458, %459 : vector<8x128xf32>
    %461 = math.tanh %460 : vector<8x128xf32>
    %462 = arith.mulf %457, %461 : vector<8x128xf32>
    %c5_i32_131 = arith.constant 5 : i32
    %c8_i32_132 = arith.constant 8 : i32
    %463 = arith.muli %c5_i32_131, %c8_i32_132 : i32
    %464 = tpu.assume_multiple %463, 8 : i32
    %465 = arith.index_cast %464 : i32 to index
    %c0_133 = arith.constant 0 : index
    %466 = vector.load %arg10[%465, %c0_133] : memref<64x512xf32, #tpu.memory_space<vmem>>, vector<8x512xf32>
    %cst_134 = arith.constant dense<0.000000e+00> : vector<8x512xf32>
    %467 = tpu.matmul %462, %299, %cst_134 {dimension_numbers = #tpu.dot_dimension_numbers<[1], [0], [0], [1], [0, 0, 1, 1], [], []>} : vector<8x128xf32>, vector<128x512xf32>, vector<8x512xf32> -> vector<8x512xf32>
    %468 = arith.addf %466, %467 : vector<8x512xf32>
    %469 = vector.extract_strided_slice %468 {offsets = [0, 0], sizes = [8, 128], strides = [1, 1]} : vector<8x512xf32> to vector<8x128xf32>
    %470 = arith.negf %469 : vector<8x128xf32>
    %471 = math.exp %470 : vector<8x128xf32>
    %cst_135 = arith.constant 1.000000e+00 : f32
    %472 = vector.broadcast %cst_135 : f32 to vector<8x128xf32>
    %473 = arith.addf %472, %471 : vector<8x128xf32>
    %474 = arith.divf %472, %473 : vector<8x128xf32>
    %475 = vector.extract_strided_slice %468 {offsets = [0, 128], sizes = [8, 128], strides = [1, 1]} : vector<8x512xf32> to vector<8x128xf32>
    %476 = arith.negf %475 : vector<8x128xf32>
    %477 = math.exp %476 : vector<8x128xf32>
    %cst_136 = arith.constant 1.000000e+00 : f32
    %478 = vector.broadcast %cst_136 : f32 to vector<8x128xf32>
    %479 = arith.addf %478, %477 : vector<8x128xf32>
    %480 = arith.divf %478, %479 : vector<8x128xf32>
    %481 = vector.extract_strided_slice %468 {offsets = [0, 256], sizes = [8, 128], strides = [1, 1]} : vector<8x512xf32> to vector<8x128xf32>
    %482 = math.tanh %481 : vector<8x128xf32>
    %483 = vector.extract_strided_slice %468 {offsets = [0, 384], sizes = [8, 128], strides = [1, 1]} : vector<8x512xf32> to vector<8x128xf32>
    %484 = arith.negf %483 : vector<8x128xf32>
    %485 = math.exp %484 : vector<8x128xf32>
    %cst_137 = arith.constant 1.000000e+00 : f32
    %486 = vector.broadcast %cst_137 : f32 to vector<8x128xf32>
    %487 = arith.addf %486, %485 : vector<8x128xf32>
    %488 = arith.divf %486, %487 : vector<8x128xf32>
    %489 = arith.mulf %480, %460 : vector<8x128xf32>
    %490 = arith.mulf %474, %482 : vector<8x128xf32>
    %491 = arith.addf %489, %490 : vector<8x128xf32>
    %492 = math.tanh %491 : vector<8x128xf32>
    %493 = arith.mulf %488, %492 : vector<8x128xf32>
    %c6_i32_138 = arith.constant 6 : i32
    %c8_i32_139 = arith.constant 8 : i32
    %494 = arith.muli %c6_i32_138, %c8_i32_139 : i32
    %495 = tpu.assume_multiple %494, 8 : i32
    %496 = arith.index_cast %495 : i32 to index
    %c0_140 = arith.constant 0 : index
    %497 = vector.load %arg10[%496, %c0_140] : memref<64x512xf32, #tpu.memory_space<vmem>>, vector<8x512xf32>
    %cst_141 = arith.constant dense<0.000000e+00> : vector<8x512xf32>
    %498 = tpu.matmul %493, %299, %cst_141 {dimension_numbers = #tpu.dot_dimension_numbers<[1], [0], [0], [1], [0, 0, 1, 1], [], []>} : vector<8x128xf32>, vector<128x512xf32>, vector<8x512xf32> -> vector<8x512xf32>
    %499 = arith.addf %497, %498 : vector<8x512xf32>
    %500 = vector.extract_strided_slice %499 {offsets = [0, 0], sizes = [8, 128], strides = [1, 1]} : vector<8x512xf32> to vector<8x128xf32>
    %501 = arith.negf %500 : vector<8x128xf32>
    %502 = math.exp %501 : vector<8x128xf32>
    %cst_142 = arith.constant 1.000000e+00 : f32
    %503 = vector.broadcast %cst_142 : f32 to vector<8x128xf32>
    %504 = arith.addf %503, %502 : vector<8x128xf32>
    %505 = arith.divf %503, %504 : vector<8x128xf32>
    %506 = vector.extract_strided_slice %499 {offsets = [0, 128], sizes = [8, 128], strides = [1, 1]} : vector<8x512xf32> to vector<8x128xf32>
    %507 = arith.negf %506 : vector<8x128xf32>
    %508 = math.exp %507 : vector<8x128xf32>
    %cst_143 = arith.constant 1.000000e+00 : f32
    %509 = vector.broadcast %cst_143 : f32 to vector<8x128xf32>
    %510 = arith.addf %509, %508 : vector<8x128xf32>
    %511 = arith.divf %509, %510 : vector<8x128xf32>
    %512 = vector.extract_strided_slice %499 {offsets = [0, 256], sizes = [8, 128], strides = [1, 1]} : vector<8x512xf32> to vector<8x128xf32>
    %513 = math.tanh %512 : vector<8x128xf32>
    %514 = vector.extract_strided_slice %499 {offsets = [0, 384], sizes = [8, 128], strides = [1, 1]} : vector<8x512xf32> to vector<8x128xf32>
    %515 = arith.negf %514 : vector<8x128xf32>
    %516 = math.exp %515 : vector<8x128xf32>
    %cst_144 = arith.constant 1.000000e+00 : f32
    %517 = vector.broadcast %cst_144 : f32 to vector<8x128xf32>
    %518 = arith.addf %517, %516 : vector<8x128xf32>
    %519 = arith.divf %517, %518 : vector<8x128xf32>
    %520 = arith.mulf %511, %491 : vector<8x128xf32>
    %521 = arith.mulf %505, %513 : vector<8x128xf32>
    %522 = arith.addf %520, %521 : vector<8x128xf32>
    %523 = math.tanh %522 : vector<8x128xf32>
    %524 = arith.mulf %519, %523 : vector<8x128xf32>
    %c7_i32_145 = arith.constant 7 : i32
    %c8_i32_146 = arith.constant 8 : i32
    %525 = arith.muli %c7_i32_145, %c8_i32_146 : i32
    %526 = tpu.assume_multiple %525, 8 : i32
    %527 = arith.index_cast %526 : i32 to index
    %c0_147 = arith.constant 0 : index
    %528 = vector.load %arg10[%527, %c0_147] : memref<64x512xf32, #tpu.memory_space<vmem>>, vector<8x512xf32>
    %cst_148 = arith.constant dense<0.000000e+00> : vector<8x512xf32>
    %529 = tpu.matmul %524, %299, %cst_148 {dimension_numbers = #tpu.dot_dimension_numbers<[1], [0], [0], [1], [0, 0, 1, 1], [], []>} : vector<8x128xf32>, vector<128x512xf32>, vector<8x512xf32> -> vector<8x512xf32>
    %530 = arith.addf %528, %529 : vector<8x512xf32>
    %531 = vector.extract_strided_slice %530 {offsets = [0, 0], sizes = [8, 128], strides = [1, 1]} : vector<8x512xf32> to vector<8x128xf32>
    %532 = arith.negf %531 : vector<8x128xf32>
    %533 = math.exp %532 : vector<8x128xf32>
    %cst_149 = arith.constant 1.000000e+00 : f32
    %534 = vector.broadcast %cst_149 : f32 to vector<8x128xf32>
    %535 = arith.addf %534, %533 : vector<8x128xf32>
    %536 = arith.divf %534, %535 : vector<8x128xf32>
    %537 = vector.extract_strided_slice %530 {offsets = [0, 128], sizes = [8, 128], strides = [1, 1]} : vector<8x512xf32> to vector<8x128xf32>
    %538 = arith.negf %537 : vector<8x128xf32>
    %539 = math.exp %538 : vector<8x128xf32>
    %cst_150 = arith.constant 1.000000e+00 : f32
    %540 = vector.broadcast %cst_150 : f32 to vector<8x128xf32>
    %541 = arith.addf %540, %539 : vector<8x128xf32>
    %542 = arith.divf %540, %541 : vector<8x128xf32>
    %543 = vector.extract_strided_slice %530 {offsets = [0, 256], sizes = [8, 128], strides = [1, 1]} : vector<8x512xf32> to vector<8x128xf32>
    %544 = math.tanh %543 : vector<8x128xf32>
    %545 = vector.extract_strided_slice %530 {offsets = [0, 384], sizes = [8, 128], strides = [1, 1]} : vector<8x512xf32> to vector<8x128xf32>
    %546 = arith.negf %545 : vector<8x128xf32>
    %547 = math.exp %546 : vector<8x128xf32>
    %cst_151 = arith.constant 1.000000e+00 : f32
    %548 = vector.broadcast %cst_151 : f32 to vector<8x128xf32>
    %549 = arith.addf %548, %547 : vector<8x128xf32>
    %550 = arith.divf %548, %549 : vector<8x128xf32>
    %551 = arith.mulf %542, %522 : vector<8x128xf32>
    %552 = arith.mulf %536, %544 : vector<8x128xf32>
    %553 = arith.addf %551, %552 : vector<8x128xf32>
    %554 = math.tanh %553 : vector<8x128xf32>
    %555 = arith.mulf %550, %554 : vector<8x128xf32>
    %c8_i32_152 = arith.constant 8 : i32
    %c0_153 = arith.constant 0 : index
    %c0_154 = arith.constant 0 : index
    %556 = vector.load %arg7[%c0_153, %c0_154] : memref<128x4xf32, #tpu.memory_space<vmem>>, vector<128x4xf32>
    %cst_155 = arith.constant dense<0.000000e+00> : vector<8x4xf32>
    %557 = tpu.matmul %555, %556, %cst_155 {dimension_numbers = #tpu.dot_dimension_numbers<[1], [0], [0], [1], [0, 0, 1, 1], [], []>} : vector<8x128xf32>, vector<128x4xf32>, vector<8x4xf32> -> vector<8x4xf32>
    %c0_156 = arith.constant 0 : index
    %c0_157 = arith.constant 0 : index
    %558 = vector.load %arg8[%c0_156, %c0_157] : memref<1x4xf32, #tpu.memory_space<vmem>>, vector<1x4xf32>
    %559 = vector.broadcast %558 : vector<1x4xf32> to vector<8x4xf32>
    %560 = arith.addf %557, %559 : vector<8x4xf32>
    %c0_158 = arith.constant 0 : index
    %c0_159 = arith.constant 0 : index
    %561 = vector.load %arg9[%c0_158, %c0_159] : memref<8x4xf32, #tpu.memory_space<vmem>>, vector<8x4xf32>
    tpu.vector_store %arg9[%c0_158, %c0_159], %560 {strides = array<i32>} : memref<8x4xf32, #tpu.memory_space<vmem>>, vector<8x4xf32>,
    return
  }
}

</mosaic_0001>

<bundles_post_ra>
// kernel: lstm_predictor_forward.1
= control target key start
LH: loop header
LB: loop body
LE: loop exit
PB: predicated region body
PF: predicated region fallthrough
CT: control target
= control target key end

     0   :  { %v7392_v3 = vmov 0.0   ;;  %vm134_vm0 = vcmask 130048   ;;  %vm4266_vm1 = vmmov 0   ;;  %vm3749_vm2 = vcmask 31744   ;;  %s7382_s1 = inlined_call_operand.vmem [shape: f32[16,512], index: 1, kind: input, shape index: {}]   ;;  %s7383_s0 = inlined_call_operand.vmem [shape: f32[64,16], index: 0, kind: input, shape index: {}]   ;;  %s7384_s2 = inlined_call_operand.vmem [shape: f32[128,512], index: 2, kind: input, shape index: {}]   ;;  %s7385_s3 = inlined_call_operand.vmem [shape: f32[1,512], index: 3, kind: input, shape index: {}]   ;;  %s7386_s4 = inlined_call_operand.vmem [shape: f32[128,512], index: 4, kind: input, shape index: {}]   ;;  %s7387_s5 = inlined_call_operand.vmem [shape: f32[128,512], index: 5, kind: input, shape index: {}]   ;;  %s7388_s6 = inlined_call_operand.vmem [shape: f32[1,512], index: 6, kind: input, shape index: {}]   ;;  %s7389_s7 = inlined_call_operand.vmem [shape: f32[128,4], index: 7, kind: input, shape index: {}]   ;;  %s7390_s8 = inlined_call_operand.vmem [shape: f32[1,4], index: 8, kind: input, shape index: {}]   ;;  %s7391_s9 = inlined_call_operand.vmem [shape: f32[8,4], index: 9, kind: output, shape index: {}]  }
   0x1   :  { %v37_v0 = vld [vmem:[%s7382_s1 + $0x28] sm:$0xff]  ;;  %v39_v1 = vld [vmem:[%s7382_s1 + $0x38] sm:$0xff]  ;;  %v36_v2 = vld [vmem:[%s7382_s1 + $0x20] sm:$0xff]  ;;  %223 = vmatprep.mubr.f32.mxu0 %v7392_v3  ;;  %336 = vmatprep.mubr.f32.mxu1 %v7392_v3 }
   0x2   :  { %187 = vmatprep.subr.mxu0 %v37_v0  ;;  %300 = vmatprep.subr.mxu1 %v39_v1  ;;  %v38_v4 = vld [vmem:[%s7382_s1 + $0x30] sm:$0xff]  ;;  %v33_v5 = vld [vmem:[%s7382_s1 + $0x8] sm:$0xff]  ;;  %v35_v6 = vld [vmem:[%s7382_s1 + $0x18] sm:$0xff] }
   0x3   :  { %188 = vmatpush1.msra.mxu0 %v36_v2  ;;  %301 = vmatpush1.msra.mxu1 %v38_v4  ;;  %v32_v7 = vld [vmem:[%s7382_s1] sm:$0xff]  ;;  %v34_v8 = vld [vmem:[%s7382_s1 + $0x10] sm:$0xff]  ;;  %v4349_v10 = vld [vmem:[%s7384_s2 + $0x1e8] sm:$0xff] }
   0x4   :  { %v105_v9 = vld [vmem:[%s7383_s0] sm:$0xff]  ;;  %189 = vmatprep.subr.mxu0 %v33_v5  ;;  %302 = vmatprep.subr.mxu1 %v35_v6  ;;  %7598 = vst [vmem:[#allocation4_spill] sm:$0xff] %v4349_v10  ;;  %v4354_v11 = vld [vmem:[%s7384_s2 + $0x1f8] sm:$0xff]  ;;  %v4364_v13 = vld [vmem:[%s7384_s2 + $0x1f0] sm:$0xff] }
   0x5   :  { %7599 = vst [vmem:[#allocation5_spill] sm:$0xff] %v4354_v11  ;;  %190 = vmatpush1.msra.mxu0 %v32_v7  ;;  %303 = vmatpush1.msra.mxu1 %v34_v8  ;;  %v4359_v12 = vld [vmem:[%s7384_s2 + $0x1e0] sm:$0xff]  ;;  %v4371_v14 = vld [vmem:[%s7384_s2 + $0x1c8] sm:$0xff]  ;;  %v4376_v15 = vld [vmem:[%s7384_s2 + $0x1d8] sm:$0xff] }
   0x6   :  { %3762 = vmatmul.mubr.msk.f32.vlgmr.msra.gmra.mxu0 %vm134_vm0, %v105_v9  ;;  %3770 = vmatmul.mubr.msk.f32.vlgmr.msra.gmra.mxu1 %vm134_vm0, %v105_v9  ;;  %v4385_v16 = vld [vmem:[%s7384_s2 + $0x1c0] sm:$0xff]  ;;  %v4390_v17 = vld [vmem:[%s7384_s2 + $0x1d0] sm:$0xff]  ;;  %v106_v18 = vld [vmem:[%s7383_s0 + $0x8] sm:$0xff] }
   0x7   :  { %424 = vmatprep.subr.mxu0 %v4349_v10  ;;  %495 = vmatprep.subr.mxu1 %v4354_v11  ;;  %v4402_v19 = vld [vmem:[%s7384_s2 + $0x1a8] sm:$0xff]  ;;  %v4407_v20 = vld [vmem:[%s7384_s2 + $0x1b8] sm:$0xff]  ;;  %v4414_v21 = vld [vmem:[%s7384_s2 + $0x1a0] sm:$0xff] }
   0x8   :  { %425 = vmatpush1.msra.mxu0 %v4359_v12  ;;  %496 = vmatpush1.msra.mxu1 %v4364_v13  ;;  %v4419_v22 = vld [vmem:[%s7384_s2 + $0x1b0] sm:$0xff]  ;;  %v4426_v23 = vld [vmem:[%s7384_s2 + $0x188] sm:$0xff]  ;;  %v4431_v24 = vld [vmem:[%s7384_s2 + $0x198] sm:$0xff] }
   0x9   :  { %426 = vmatprep.subr.mxu0 %v4371_v14  ;;  %497 = vmatprep.subr.mxu1 %v4376_v15  ;;  %v4440_v25 = vld [vmem:[%s7384_s2 + $0x180] sm:$0xff]  ;;  %v4445_v26 = vld [vmem:[%s7384_s2 + $0x190] sm:$0xff]  ;;  %v4457_v28 = vld [vmem:[%s7384_s2 + $0x168] sm:$0xff] }
   0xa   :  { %229 = vmatprep.mubr.f32.mxu0 %v7392_v3  ;;  %342 = vmatprep.mubr.f32.mxu1 %v7392_v3  ;;  %v107_v27 = vld [vmem:[%s7383_s0 + $0x10] sm:$0xff]  ;;  %v4462_v29 = vld [vmem:[%s7384_s2 + $0x178] sm:$0xff]  ;;  %v4469_v30 = vld [vmem:[%s7384_s2 + $0x160] sm:$0xff] }
   0xb   :  { %427 = vmatpush1.msra.mxu0 %v4385_v16  ;;  %498 = vmatpush1.msra.mxu1 %v4390_v17  ;;  %v4474_v31 = vld [vmem:[%s7384_s2 + $0x170] sm:$0xff]  ;;  %v4481_v32 = vld [vmem:[%s7384_s2 + $0x148] sm:$0xff]  ;;  %v4486_v33 = vld [vmem:[%s7384_s2 + $0x158] sm:$0xff] }
   0xc   :  { %3763 = vmatmul.mubr.msk.f32.gmra.mxu0 %vm134_vm0, %v106_v18  ;;  %3771 = vmatmul.mubr.msk.f32.gmra.mxu1 %vm134_vm0, %v106_v18  ;;  %v4495_v34 = vld [vmem:[%s7384_s2 + $0x140] sm:$0xff]  ;;  %v4500_v35 = vld [vmem:[%s7384_s2 + $0x150] sm:$0xff]  ;;  %v108_v36 = vld [vmem:[%s7383_s0 + $0x18] sm:$0xff] }
   0xd   :  { %428 = vmatprep.subr.mxu0 %v4402_v19  ;;  %499 = vmatprep.subr.mxu1 %v4407_v20  ;;  %v4512_v37 = vld [vmem:[%s7384_s2 + $0x128] sm:$0xff]  ;;  %v4517_v38 = vld [vmem:[%s7384_s2 + $0x138] sm:$0xff]  ;;  %v4524_v39 = vld [vmem:[%s7384_s2 + $0x120] sm:$0xff] }
   0xe   :  { %429 = vmatpush1.msra.mxu0 %v4414_v21  ;;  %500 = vmatpush1.msra.mxu1 %v4419_v22  ;;  %v4529_v40 = vld [vmem:[%s7384_s2 + $0x130] sm:$0xff]  ;;  %v4536_v41 = vld [vmem:[%s7384_s2 + $0x108] sm:$0xff]  ;;  %v4541_v42 = vld [vmem:[%s7384_s2 + $0x118] sm:$0xff] }
   0xf   :  { %430 = vmatprep.subr.mxu0 %v4426_v23  ;;  %501 = vmatprep.subr.mxu1 %v4431_v24  ;;  %v4550_v43 = vld [vmem:[%s7384_s2 + $0x100] sm:$0xff]  ;;  %v4555_v44 = vld [vmem:[%s7384_s2 + $0x110] sm:$0xff]  ;;  %v4567_v46 = vld [vmem:[%s7384_s2 + $0xe8] sm:$0xff] }
  0x10   :  { %235 = vmatprep.mubr.f32.mxu0 %v7392_v3  ;;  %348 = vmatprep.mubr.f32.mxu1 %v7392_v3  ;;  %v109_v45 = vld [vmem:[%s7383_s0 + $0x20] sm:$0xff]  ;;  %v4572_v47 = vld [vmem:[%s7384_s2 + $0xf8] sm:$0xff]  ;;  %v4584_v49 = vld [vmem:[%s7384_s2 + $0xf0] sm:$0xff] }
  0x11   :  { %431 = vmatpush1.msra.mxu0 %v4440_v25  ;;  %502 = vmatpush1.msra.mxu1 %v4445_v26  ;;  %v4579_v48 = vld [vmem:[%s7384_s2 + $0xe0] sm:$0xff]  ;;  %v4591_v50 = vld [vmem:[%s7384_s2 + $0xc8] sm:$0xff]  ;;  %v4596_v51 = vld [vmem:[%s7384_s2 + $0xd8] sm:$0xff] }
  0x12   :  { %3764 = vmatmul.mubr.msk.f32.gmra.mxu0 %vm134_vm0, %v107_v27  ;;  %3772 = vmatmul.mubr.msk.f32.gmra.mxu1 %vm134_vm0, %v107_v27  ;;  %v4605_v52 = vld [vmem:[%s7384_s2 + $0xc0] sm:$0xff]  ;;  %v4610_v53 = vld [vmem:[%s7384_s2 + $0xd0] sm:$0xff]  ;;  %v110_v54 = vld [vmem:[%s7383_s0 + $0x28] sm:$0xff] }
  0x13   :  { %432 = vmatprep.subr.mxu0 %v4457_v28  ;;  %503 = vmatprep.subr.mxu1 %v4462_v29  ;;  %v4622_v55 = vld [vmem:[%s7384_s2 + $0xa8] sm:$0xff]  ;;  %v4627_v56 = vld [vmem:[%s7384_s2 + $0xb8] sm:$0xff]  ;;  %v4634_v57 = vld [vmem:[%s7384_s2 + $0xa0] sm:$0xff] }
  0x14   :  { %433 = vmatpush1.msra.mxu0 %v4469_v30  ;;  %504 = vmatpush1.msra.mxu1 %v4474_v31  ;;  %v4639_v58 = vld [vmem:[%s7384_s2 + $0xb0] sm:$0xff]  ;;  %v4646_v59 = vld [vmem:[%s7384_s2 + $0x88] sm:$0xff]  ;;  %v4651_v60 = vld [vmem:[%s7384_s2 + $0x98] sm:$0xff] }
  0x15   :  { %434 = vmatprep.subr.mxu0 %v4481_v32  ;;  %505 = vmatprep.subr.mxu1 %v4486_v33  ;;  %7600 = vst [vmem:[#allocation6_spill] sm:$0xff] %v4639_v58  ;;  %7601 = vst [vmem:[#allocation7_spill] sm:$0xff] %v4646_v59  ;;  %v4660_v61 = vld [vmem:[%s7384_s2 + $0x80] sm:$0xff]  ;;  %v4665_v62 = vld [vmem:[%s7384_s2 + $0x90] sm:$0xff] }
  0x16   :  { %241 = vmatprep.mubr.f32.mxu0 %v7392_v3  ;;  %354 = vmatprep.mubr.f32.mxu1 %v7392_v3  ;;  %7602 = vst [vmem:[#allocation8_spill] sm:$0xff] %v4651_v60  ;;  %7603 = vst [vmem:[#allocation9_spill] sm:$0xff] %v4660_v61  ;;  %v111_v63 = vld [vmem:[%s7383_s0 + $0x30] sm:$0xff]  ;;  %v4677_v0 = vld [vmem:[%s7384_s2 + $0x68] sm:$0xff] }
  0x17   :  { %435 = vmatpush1.msra.mxu0 %v4495_v34  ;;  %506 = vmatpush1.msra.mxu1 %v4500_v35  ;;  %7604 = vst [vmem:[#allocation10_spill] sm:$0xff] %v4665_v62  ;;  %7605 = vst [vmem:[#allocation11_spill] sm:$0xff] %v4677_v0  ;;  %v4682_v1 = vld [vmem:[%s7384_s2 + $0x78] sm:$0xff]  ;;  %v4689_v2 = vld [vmem:[%s7384_s2 + $0x60] sm:$0xff] }
  0x18   :  { %3765 = vmatmul.mubr.msk.f32.gmra.mxu0 %vm134_vm0, %v108_v36  ;;  %3773 = vmatmul.mubr.msk.f32.gmra.mxu1 %vm134_vm0, %v108_v36  ;;  %7606 = vst [vmem:[#allocation12_spill] sm:$0xff] %v4682_v1  ;;  %7607 = vst [vmem:[#allocation13_spill] sm:$0xff] %v4689_v2  ;;  %v4694_v4 = vld [vmem:[%s7384_s2 + $0x70] sm:$0xff]  ;;  %v4701_v5 = vld [vmem:[%s7384_s2 + $0x48] sm:$0xff] }
  0x19   :  { %436 = vmatprep.subr.mxu0 %v4512_v37  ;;  %507 = vmatprep.subr.mxu1 %v4517_v38  ;;  %7608 = vst [vmem:[#allocation14_spill] sm:$0xff] %v4694_v4  ;;  %7609 = vst [vmem:[#allocation15_spill] sm:$0xff] %v4701_v5  ;;  %v4706_v6 = vld [vmem:[%s7384_s2 + $0x58] sm:$0xff]  ;;  %v4715_v7 = vld [vmem:[%s7384_s2 + $0x40] sm:$0xff] }
  0x1a   :  { %437 = vmatpush1.msra.mxu0 %v4524_v39  ;;  %508 = vmatpush1.msra.mxu1 %v4529_v40  ;;  %7610 = vst [vmem:[#allocation16_spill] sm:$0xff] %v4706_v6  ;;  %7611 = vst [vmem:[#allocation17_spill] sm:$0xff] %v4715_v7  ;;  %v4720_v8 = vld [vmem:[%s7384_s2 + $0x50] sm:$0xff]  ;;  %v112_v9 = vld [vmem:[%s7383_s0 + $0x38] sm:$0xff] }
  0x1b   :  { %438 = vmatprep.subr.mxu0 %v4536_v41  ;;  %509 = vmatprep.subr.mxu1 %v4541_v42  ;;  %7612 = vst [vmem:[#allocation18_spill] sm:$0xff] %v4720_v8  ;;  %v4732_v18 = vld [vmem:[%s7384_s2 + $0x28] sm:$0xff]  ;;  %v4737_v27 = vld [vmem:[%s7384_s2 + $0x38] sm:$0xff]  ;;  %v4744_v36 = vld [vmem:[%s7384_s2 + $0x20] sm:$0xff] }
  0x1c   :  { %247 = vmatprep.mubr.f32.mxu0 %v7392_v3  ;;  %360 = vmatprep.mubr.f32.mxu1 %v7392_v3  ;;  %7613 = vst [vmem:[#allocation19_spill] sm:$0xff] %v4732_v18  ;;  %7614 = vst [vmem:[#allocation20_spill] sm:$0xff] %v4737_v27 }
  0x1d   :  { %439 = vmatpush1.msra.mxu0 %v4550_v43  ;;  %510 = vmatpush1.msra.mxu1 %v4555_v44  ;;  %7615 = vst [vmem:[#allocation21_spill] sm:$0xff] %v4744_v36 }
  0x1e   :  { %3766 = vmatmul.mubr.msk.f32.gmra.mxu0 %vm134_vm0, %v109_v45  ;;  %3774 = vmatmul.mubr.msk.f32.gmra.mxu1 %vm134_vm0, %v109_v45  ;;  %v4749_v45 = vld [vmem:[%s7384_s2 + $0x30] sm:$0xff] }
  0x1f   :  { %440 = vmatprep.subr.mxu0 %v4567_v46  ;;  %511 = vmatprep.subr.mxu1 %v4572_v47  ;;  %7616 = vst [vmem:[#allocation22_spill] sm:$0xff] %v4749_v45 }
  0x20   :  { %441 = vmatpush1.msra.mxu0 %v4579_v48  ;;  %512 = vmatpush1.msra.mxu1 %v4584_v49 }
  0x21   :  { %442 = vmatprep.subr.mxu0 %v4591_v50  ;;  %513 = vmatprep.subr.mxu1 %v4596_v51 }
  0x22   :  { %253 = vmatprep.mubr.f32.mxu0 %v7392_v3  ;;  %366 = vmatprep.mubr.f32.mxu1 %v7392_v3 }
  0x23   :  { %443 = vmatpush1.msra.mxu0 %v4605_v52  ;;  %514 = vmatpush1.msra.mxu1 %v4610_v53 }
  0x24   :  { %3767 = vmatmul.mubr.msk.f32.gmra.mxu0 %vm134_vm0, %v110_v54  ;;  %3775 = vmatmul.mubr.msk.f32.gmra.mxu1 %vm134_vm0, %v110_v54  ;;  %v4756_v54 = vld [vmem:[%s7384_s2 + $0x8] sm:$0xff] }
  0x25   :  { %444 = vmatprep.subr.mxu0 %v4622_v55  ;;  %515 = vmatprep.subr.mxu1 %v4627_v56  ;;  %7617 = vst [vmem:[#allocation23_spill] sm:$0xff] %v4756_v54 }
  0x26   :  { %445 = vmatpush1.msra.mxu0 %v4634_v57  ;;  %516 = vmatpush1.msra.mxu1 %v4639_v58 }
  0x27   :  { %446 = vmatprep.subr.mxu0 %v4646_v59  ;;  %517 = vmatprep.subr.mxu1 %v4651_v60 }
  0x28   :  { %259 = vmatprep.mubr.f32.mxu0 %v7392_v3  ;;  %372 = vmatprep.mubr.f32.mxu1 %v7392_v3 }
  0x29   :  { %447 = vmatpush1.msra.mxu0 %v4660_v61  ;;  %518 = vmatpush1.msra.mxu1 %v4665_v62 }
  0x2a   :  { %3768 = vmatmul.mubr.msk.f32.gmra.mxu0 %vm134_vm0, %v111_v63  ;;  %3776 = vmatmul.mubr.msk.f32.gmra.mxu1 %vm134_vm0, %v111_v63  ;;  %v4761_v63 = vld [vmem:[%s7384_s2 + $0x18] sm:$0xff] }
  0x2b   :  { %448 = vmatprep.subr.mxu0 %v4677_v0  ;;  %519 = vmatprep.subr.mxu1 %v4682_v1  ;;  %7618 = vst [vmem:[#allocation24_spill] sm:$0xff] %v4761_v63 }
  0x2c   :  { %449 = vmatpush1.msra.mxu0 %v4689_v2  ;;  %520 = vmatpush1.msra.mxu1 %v4694_v4 }
  0x2d   :  { %450 = vmatprep.subr.mxu0 %v4701_v5  ;;  %521 = vmatprep.subr.mxu1 %v4706_v6 }
  0x2e   :  { %265 = vmatprep.mubr.f32.mxu0 %v7392_v3  ;;  %378 = vmatprep.mubr.f32.mxu1 %v7392_v3  ;;  %v4768_v3 = vld [vmem:[%s7384_s2] sm:$0xff] }
  0x2f   :  { %451 = vmatpush1.msra.mxu0 %v4715_v7  ;;  %522 = vmatpush1.msra.mxu1 %v4720_v8  ;;  %7619 = vst [vmem:[#allocation25_spill] sm:$0xff] %v4768_v3 }
  0x30   :  { %3769 = vmatmul.mubr.msk.f32.gmra.mxu0 %vm134_vm0, %v112_v9  ;;  %3777 = vmatmul.mubr.msk.f32.gmra.mxu1 %vm134_vm0, %v112_v9  ;;  %v4775_v9 = vld [vmem:[%s7384_s2 + $0x10] sm:$0xff] }
  0x31   :  { %452 = vmatprep.subr.mxu0 %v4732_v18  ;;  %523 = vmatprep.subr.mxu1 %v4737_v27  ;;  %7620 = vst [vmem:[#allocation26_spill] sm:$0xff] %v4775_v9  ;;  %v7621_v27 = vmov 0.0  }
  0x32   :  { %453 = vmatpush1.msra.mxu0 %v4744_v36  ;;  %524 = vmatpush1.msra.mxu1 %v4749_v45 }
  0x33   :  { %454 = vmatprep.subr.mxu0 %v4756_v54  ;;  %525 = vmatprep.subr.mxu1 %v4761_v63 }
  0x34   :  { %455 = vmatpush1.msra.mxu0 %v4768_v3  ;;  %488 = vmatprep.mubr.f32.mxu0 %v7621_v27 }
  0x35   :  { %526 = vmatpush1.msra.mxu1 %v4775_v9  ;;  %559 = vmatprep.mubr.f32.mxu1 %v7621_v27 }
  0x36   :  { %489 = vmatmul.mubr.f32.vlgmr.msra.gmra.mxu0 %v7621_v27  ;;  %560 = vmatmul.mubr.f32.vlgmr.msra.gmra.mxu1 %v7621_v27 }
  0x37   :  { %602 = vmatprep.subr.mxu0 %v4349_v10  ;;  %673 = vmatprep.subr.mxu1 %v4354_v11 }
  0x38   :  { %603 = vmatpush1.msra.mxu0 %v4359_v12  ;;  %674 = vmatpush1.msra.mxu1 %v4364_v13 }
  0x39   :  { %604 = vmatprep.subr.mxu0 %v4371_v14  ;;  %675 = vmatprep.subr.mxu1 %v4376_v15 }
  0x3a   :  { %605 = vmatpush1.msra.mxu0 %v4385_v16  ;;  %676 = vmatpush1.msra.mxu1 %v4390_v17 }
  0x3b   :  { %606 = vmatprep.subr.mxu0 %v4402_v19  ;;  %677 = vmatprep.subr.mxu1 %v4407_v20 }
  0x3c   :  { %607 = vmatpush1.msra.mxu0 %v4414_v21  ;;  %678 = vmatpush1.msra.mxu1 %v4419_v22 }
  0x3d   :  { %608 = vmatprep.subr.mxu0 %v4426_v23  ;;  %679 = vmatprep.subr.mxu1 %v4431_v24 }
  0x3e   :  { %609 = vmatpush1.msra.mxu0 %v4440_v25  ;;  %680 = vmatpush1.msra.mxu1 %v4445_v26 }
  0x3f   :  { %610 = vmatprep.subr.mxu0 %v4457_v28  ;;  %681 = vmatprep.subr.mxu1 %v4462_v29 }
  0x40   :  { %611 = vmatpush1.msra.mxu0 %v4469_v30  ;;  %682 = vmatpush1.msra.mxu1 %v4474_v31 }
  0x41   :  { %612 = vmatprep.subr.mxu0 %v4481_v32  ;;  %683 = vmatprep.subr.mxu1 %v4486_v33 }
  0x42   :  { %613 = vmatpush1.msra.mxu0 %v4495_v34  ;;  %684 = vmatpush1.msra.mxu1 %v4500_v35 }
  0x43   :  { %614 = vmatprep.subr.mxu0 %v4512_v37  ;;  %685 = vmatprep.subr.mxu1 %v4517_v38 }
  0x44   :  { %615 = vmatpush1.msra.mxu0 %v4524_v39  ;;  %686 = vmatpush1.msra.mxu1 %v4529_v40 }
  0x45   :  { %616 = vmatprep.subr.mxu0 %v4536_v41  ;;  %687 = vmatprep.subr.mxu1 %v4541_v42 }
  0x46   :  { %617 = vmatpush1.msra.mxu0 %v4550_v43  ;;  %688 = vmatpush1.msra.mxu1 %v4555_v44 }
  0x47   :  { %618 = vmatprep.subr.mxu0 %v4567_v46  ;;  %689 = vmatprep.subr.mxu1 %v4572_v47 }
  0x48   :  { %619 = vmatpush1.msra.mxu0 %v4579_v48  ;;  %690 = vmatpush1.msra.mxu1 %v4584_v49 }
  0x49   :  { %620 = vmatprep.subr.mxu0 %v4591_v50  ;;  %691 = vmatprep.subr.mxu1 %v4596_v51 }
  0x4a   :  { %621 = vmatpush1.msra.mxu0 %v4605_v52  ;;  %692 = vmatpush1.msra.mxu1 %v4610_v53 }
  0x4b   :  { %622 = vmatprep.subr.mxu0 %v4622_v55  ;;  %693 = vmatprep.subr.mxu1 %v4627_v56 }
  0x4c   :  { %623 = vmatpush1.msra.mxu0 %v4634_v57  ;;  %694 = vmatpush1.msra.mxu1 %v4639_v58 }
  0x4d   :  { %624 = vmatprep.subr.mxu0 %v4646_v59  ;;  %695 = vmatprep.subr.mxu1 %v4651_v60 }
  0x4e   :  { %625 = vmatpush1.msra.mxu0 %v4660_v61  ;;  %696 = vmatpush1.msra.mxu1 %v4665_v62  ;;  %v7622_v61 = vld [vmem:[#allocation20_spill] sm:$0xff] }
  0x4f   :  { %626 = vmatprep.subr.mxu0 %v4677_v0  ;;  %697 = vmatprep.subr.mxu1 %v4682_v1 }
  0x50   :  { %627 = vmatpush1.msra.mxu0 %v4689_v2  ;;  %698 = vmatpush1.msra.mxu1 %v4694_v4 }
  0x51   :  { %628 = vmatprep.subr.mxu0 %v4701_v5  ;;  %699 = vmatprep.subr.mxu1 %v4706_v6 }
  0x52   :  { %629 = vmatpush1.msra.mxu0 %v4715_v7  ;;  %700 = vmatpush1.msra.mxu1 %v4720_v8 }
  0x53   :  { %630 = vmatprep.subr.mxu0 %v4732_v18  ;;  %701 = vmatprep.subr.mxu1 %v7622_v61  ;;  %v114_v61 = vlaneseq }
  0x54   :  { %631 = vmatpush1.msra.mxu0 %v4744_v36  ;;  %702 = vmatpush1.msra.mxu1 %v4749_v45 }
  0x55   :  { %632 = vmatprep.subr.mxu0 %v4756_v54  ;;  %703 = vmatprep.subr.mxu1 %v4761_v63  ;;  %v4853_v36 = vshrl.u32 %v114_v61, 7 }
  0x56   :  { %633 = vmatpush1.msra.mxu0 %v4768_v3  ;;  %666 = vmatprep.mubr.f32.mxu0 %v7621_v27 }
  0x57   :  { %704 = vmatpush1.msra.mxu1 %v4775_v9  ;;  %737 = vmatprep.mubr.f32.mxu1 %v7621_v27  ;;  %7623 = vst [vmem:[#allocation27_spill] sm:$0xff] %v4853_v36  ;;  %v7431_v63 = vsub.s32 0, %v4853_v36  ;;  %v7434_v3 = vsub.s32 2, %v4853_v36  ;;  %v104_v9 = vld [vmem:[%s7385_s3] sm:$0xf]  ;;  %v7442_v61 = vsub.s32 3, %v4853_v36 }
  0x58   :  { %781 = vmatprep.subr.mxu0 %v4349_v10  ;;  %852 = vmatprep.subr.mxu1 %v4354_v11  ;;  %v7441_v11 = vsub.s32 1, %v4853_v36 }
  0x59   :  { %v117_v18 = vrot.slane %v104_v9, %v7431_v63  ;;  %v4874_v8 = vrot.slane %v104_v9, %v7434_v3  ;;  %v4880_v4 = vrot.slane %v104_v9, %v7442_v61 }
  0x5a   :  { %v121_v5 = vrot.slane %v104_v9, %v7441_v11 }
  0xc6   :  { %v4855_v45 = vpop.f32.mrf.mxu0  ;;  %v4857_v54 = vpop.f32.mrf.mxu1 }
  0xc8   :  { %v4864_v27 = vpop.f32.mrf.mxu0  ;;  %v4866_v10 = vpop.f32.mrf.mxu1 }
  0xcc   :  { %v231_v7 = vpop.f32.mrf.mxu0  ;;  %v344_v6 = vpop.f32.mrf.mxu1 }
  0xcd   :  { %v4882_v2 = vadd.f32 %v231_v7, %v117_v18  ;;  %v4885_v1 = vadd.f32 %v344_v6, %v4874_v8 }
  0xce   :  { %v233_v0 = vpop.f32.mrf.mxu0  ;;  %v346_v63 = vpop.f32.mrf.mxu1 }
  0xcf   :  { %7624 = vst [vmem:[#allocation28_spill] sm:$0xff] %v4885_v1  ;;  %v4887_v62 = vadd.f32 %v233_v0, %v121_v5  ;;  %v4890_v3 = vadd.f32 %v346_v63, %v4880_v4 }
  0xd1   :  { %7625 = vst [vmem:[#allocation29_spill] sm:$0xff] %v4887_v62  ;;  %7626 = vst [vmem:[#allocation30_spill] sm:$0xff] %v4890_v3 }
  0xd2   :  { %v237_v60 = vpop.f32.mrf.mxu0  ;;  %v350_v59 = vpop.f32.mrf.mxu1 }
  0xd3   :  { %v4892_v58 = vadd.f32 %v237_v60, %v117_v18  ;;  %v4895_v11 = vadd.f32 %v350_v59, %v4874_v8 }
  0xd4   :  { %v239_v9 = vpop.f32.mrf.mxu0  ;;  %v352_v7 = vpop.f32.mrf.mxu1 }
  0xd5   :  { %7627 = vst [vmem:[#allocation31_spill] sm:$0xff] %v4892_v58  ;;  %7628 = vst [vmem:[#allocation32_spill] sm:$0xff] %v4895_v11  ;;  %v4897_v61 = vadd.f32 %v239_v9, %v121_v5  ;;  %v4900_v6 = vadd.f32 %v352_v7, %v4880_v4 }
  0xd7   :  { %7629 = vst [vmem:[#allocation33_spill] sm:$0xff] %v4897_v61  ;;  %7630 = vst [vmem:[#allocation34_spill] sm:$0xff] %v4900_v6 }
  0xd8   :  { %v243_v36 = vpop.f32.mrf.mxu0  ;;  %v356_v0 = vpop.f32.mrf.mxu1 }
  0xd9   :  { %v4902_v1 = vadd.f32 %v243_v36, %v117_v18  ;;  %v4905_v63 = vadd.f32 %v356_v0, %v4874_v8 }
  0xda   :  { %v245_v3 = vpop.f32.mrf.mxu0  ;;  %v358_v60 = vpop.f32.mrf.mxu1 }
  0xdb   :  { %7631 = vst [vmem:[#allocation35_spill] sm:$0xff] %v4902_v1  ;;  %7632 = vst [vmem:[#allocation36_spill] sm:$0xff] %v4905_v63  ;;  %v4907_v58 = vadd.f32 %v245_v3, %v121_v5  ;;  %v4910_v59 = vadd.f32 %v358_v60, %v4880_v4 }
  0xdd   :  { %7633 = vst [vmem:[#allocation37_spill] sm:$0xff] %v4907_v58  ;;  %7634 = vst [vmem:[#allocation38_spill] sm:$0xff] %v4910_v59 }
  0xde   :  { %v249_v11 = vpop.f32.mrf.mxu0  ;;  %v362_v9 = vpop.f32.mrf.mxu1 }
  0xdf   :  { %v4912_v61 = vadd.f32 %v249_v11, %v117_v18  ;;  %v4915_v7 = vadd.f32 %v362_v9, %v4874_v8 }
  0xe0   :  { %v251_v6 = vpop.f32.mrf.mxu0  ;;  %v364_v36 = vpop.f32.mrf.mxu1 }
  0xe1   :  { %7635 = vst [vmem:[#allocation39_spill] sm:$0xff] %v4912_v61  ;;  %7636 = vst [vmem:[#allocation40_spill] sm:$0xff] %v4915_v7  ;;  %v4917_v1 = vadd.f32 %v251_v6, %v121_v5  ;;  %v4920_v0 = vadd.f32 %v364_v36, %v4880_v4 }
  0xe3   :  { %7637 = vst [vmem:[#allocation41_spill] sm:$0xff] %v4917_v1  ;;  %7638 = vst [vmem:[#allocation42_spill] sm:$0xff] %v4920_v0 }
  0xe4   :  { %v255_v63 = vpop.f32.mrf.mxu0  ;;  %v368_v3 = vpop.f32.mrf.mxu1 }
  0xe5   :  { %v4922_v58 = vadd.f32 %v255_v63, %v117_v18  ;;  %v4925_v60 = vadd.f32 %v368_v3, %v4874_v8 }
  0xe6   :  { %v257_v59 = vpop.f32.mrf.mxu0  ;;  %v370_v11 = vpop.f32.mrf.mxu1 }
  0xe7   :  { %7639 = vst [vmem:[#allocation43_spill] sm:$0xff] %v4922_v58  ;;  %7640 = vst [vmem:[#allocation44_spill] sm:$0xff] %v4925_v60  ;;  %v4927_v61 = vadd.f32 %v257_v59, %v121_v5  ;;  %v4930_v9 = vadd.f32 %v370_v11, %v4880_v4 }
  0xe9   :  { %7641 = vst [vmem:[#allocation45_spill] sm:$0xff] %v4927_v61  ;;  %7642 = vst [vmem:[#allocation46_spill] sm:$0xff] %v4930_v9 }
  0xea   :  { %v261_v7 = vpop.f32.mrf.mxu0  ;;  %v374_v6 = vpop.f32.mrf.mxu1 }
  0xeb   :  { %v4932_v1 = vadd.f32 %v261_v7, %v117_v18  ;;  %v4935_v36 = vadd.f32 %v374_v6, %v4874_v8 }
  0xec   :  { %v263_v0 = vpop.f32.mrf.mxu0  ;;  %v376_v63 = vpop.f32.mrf.mxu1 }
  0xed   :  { %7643 = vst [vmem:[#allocation47_spill] sm:$0xff] %v4932_v1  ;;  %7644 = vst [vmem:[#allocation48_spill] sm:$0xff] %v4935_v36  ;;  %v4937_v58 = vadd.f32 %v263_v0, %v121_v5  ;;  %v4940_v3 = vadd.f32 %v376_v63, %v4880_v4  ;;  %v226_v0 = vadd.f32 %v4855_v45, %v117_v18 }
  0xee   :  { %v228_v63 = vadd.f32 %v4864_v27, %v121_v5 }
  0xef   :  { %7645 = vst [vmem:[#allocation49_spill] sm:$0xff] %v4937_v58  ;;  %7646 = vst [vmem:[#allocation50_spill] sm:$0xff] %v4940_v3 }
  0xf0   :  { %v267_v60 = vpop.f32.mrf.mxu0  ;;  %v380_v59 = vpop.f32.mrf.mxu1 }
  0xf1   :  { %v4942_v61 = vadd.f32 %v267_v60, %v117_v18  ;;  %v4945_v11 = vadd.f32 %v380_v59, %v4874_v8 }
  0xf2   :  { %v269_v9 = vpop.f32.mrf.mxu0  ;;  %v382_v7 = vpop.f32.mrf.mxu1 }
  0xf3   :  { %7647 = vst [vmem:[#allocation51_spill] sm:$0xff] %v4942_v61  ;;  %7648 = vst [vmem:[#allocation52_spill] sm:$0xff] %v4945_v11  ;;  %v4947_v1 = vadd.f32 %v269_v9, %v121_v5  ;;  %v4950_v6 = vadd.f32 %v382_v7, %v4880_v4  ;;  %v341_v9 = vadd.f32 %v4866_v10, %v4880_v4 }
  0xf4   :  { %v339_v7 = vadd.f32 %v4857_v54, %v4874_v8 }
  0xf5   :  { %7649 = vst [vmem:[#allocation53_spill] sm:$0xff] %v4947_v1  ;;  %7650 = vst [vmem:[#allocation54_spill] sm:$0xff] %v4950_v6 }
  0xf6   :  { %v490_v36 = vpop.f32.mrf.mxu0  ;;  %v561_v61 = vpop.f32.mrf.mxu1 }
  0xf7   :  { %v566_v3 = vadd.f32 %v490_v36, %v226_v0  ;;  %v568_v6 = vadd.f32 %v561_v61, %v339_v7  ;;  %v7652_v61 = vld [vmem:[#allocation6_spill] sm:$0xff]  ;;  %v7657_v7 = vld [vmem:[#allocation11_spill] sm:$0xff] }
  0xf8   :  { %v492_v58 = vpop.f32.mrf.mxu0  ;;  %v563_v11 = vpop.f32.mrf.mxu1 }
  0xf9   :  { %v3778_v62 = vmul.f32 -1.442695, %v566_v3  ;;  %v567_v60 = vadd.f32 %v492_v58, %v228_v63  ;;  %v569_v1 = vadd.f32 %v563_v11, %v341_v9  ;;  %v7656_v9 = vld [vmem:[#allocation10_spill] sm:$0xff] }
  0xfb   :  { %3881 = vpow2.f32 %v3778_v62  ;;  %v3779_v59 = vmul.f32 -1.442695, %v567_v60  ;;  %v3780_v18 = vmul.f32 -1.442695, %v569_v1  ;;  %v7654_v60 = vld [vmem:[#allocation8_spill] sm:$0xff] }
  0xfd   :  { %3883 = vpow2.f32 %v3779_v59  ;;  %v7655_v59 = vld [vmem:[#allocation9_spill] sm:$0xff] }
  0xfe   :  { %3885 = vpow2.f32 %v3780_v18  ;;  %v7658_v18 = vld [vmem:[#allocation12_spill] sm:$0xff] }
 0x108   :  { %v3882_v45 = vpop.eup %3881 }
 0x109   :  { %v573_v5 = vadd.f32 1.0, %v3882_v45  ;;  %v7659_v45 = vld [vmem:[#allocation13_spill] sm:$0xff] }
 0x10a   :  { %v3884_v27 = vpop.eup %3883 }
 0x10b   :  { %3887 = vrcp.f32 %v573_v5  ;;  %v579_v58 = vadd.f32 1.0, %v3884_v27  ;;  %v3886_v62 = vpop.eup %3885  ;;  %v7660_v5 = vld [vmem:[#allocation14_spill] sm:$0xff]  ;;  %v7661_v27 = vld [vmem:[#allocation15_spill] sm:$0xff] }
 0x10c   :  { %3889 = vtanh.f32 %v568_v6  ;;  %v586_v63 = vadd.f32 1.0, %v3886_v62  ;;  %v7653_v6 = vld [vmem:[#allocation7_spill] sm:$0xff]  ;;  %v7663_v62 = vld [vmem:[#allocation17_spill] sm:$0xff] }
 0x10d   :  { %3891 = vrcp.f32 %v579_v58  ;;  %v7662_v58 = vld [vmem:[#allocation16_spill] sm:$0xff] }
 0x10e   :  { %3893 = vrcp.f32 %v586_v63  ;;  %v7667_v63 = vld [vmem:[#allocation21_spill] sm:$0xff] }
 0x118   :  { %v3888_v36 = vpop.eup %3887 }
 0x119   :  { %v3890_v3 = vpop.eup %3889 }
 0x11a   :  { %v3892_v0 = vpop.eup %3891  ;;  %v590_v4 = vmul.f32 %v3890_v3, %v3888_v36  ;;  %v7664_v36 = vld [vmem:[#allocation18_spill] sm:$0xff]  ;;  %v7665_v3 = vld [vmem:[#allocation19_spill] sm:$0xff] }
 0x11b   :  { %v589_v10 = vmul.f32 0.0, %v3892_v0  ;;  %v3894_v1 = vpop.eup %3893  ;;  %v7666_v0 = vld [vmem:[#allocation20_spill] sm:$0xff] }
 0x11d   :  { %v4958_v11 = vadd.f32 %v590_v4, %v589_v10  ;;  %v7668_v10 = vld [vmem:[#allocation22_spill] sm:$0xff]  ;;  %v7669_v4 = vld [vmem:[#allocation23_spill] sm:$0xff] }
 0x11f   :  { %3895 = vtanh.f32 %v4958_v11 }
 0x12c   :  { %v3896_v8 = vpop.eup %3895 }
 0x12d   :  { %v4961_v54 = vmul.f32 %v3896_v8, %v3894_v1  ;;  %v7670_v1 = vld [vmem:[#allocation24_spill] sm:$0xff]  ;;  %v7671_v8 = vld [vmem:[#allocation25_spill] sm:$0xff] }
 0x12f   :  { %7651 = vst [vmem:[#allocation55_spill] sm:$0xff] %v4961_v54  ;;  %667 = vmatmul.mubr.f32.vlgmr.msra.gmra.mxu0 %v4961_v54  ;;  %738 = vmatmul.mubr.f32.vlgmr.msra.gmra.mxu1 %v4961_v54  ;;  %v7672_v54 = vmov 0.0  }
 0x130   :  { %782 = vmatpush1.msra.mxu0 %v4359_v12  ;;  %853 = vmatpush1.msra.mxu1 %v4364_v13 }
 0x131   :  { %783 = vmatprep.subr.mxu0 %v4371_v14  ;;  %854 = vmatprep.subr.mxu1 %v4376_v15 }
 0x132   :  { %784 = vmatpush1.msra.mxu0 %v4385_v16  ;;  %855 = vmatpush1.msra.mxu1 %v4390_v17 }
 0x133   :  { %785 = vmatprep.subr.mxu0 %v4402_v19  ;;  %856 = vmatprep.subr.mxu1 %v4407_v20 }
 0x134   :  { %786 = vmatpush1.msra.mxu0 %v4414_v21  ;;  %857 = vmatpush1.msra.mxu1 %v4419_v22 }
 0x135   :  { %787 = vmatprep.subr.mxu0 %v4426_v23  ;;  %858 = vmatprep.subr.mxu1 %v4431_v24 }
 0x136   :  { %788 = vmatpush1.msra.mxu0 %v4440_v25  ;;  %859 = vmatpush1.msra.mxu1 %v4445_v26 }
 0x137   :  { %789 = vmatprep.subr.mxu0 %v4457_v28  ;;  %860 = vmatprep.subr.mxu1 %v4462_v29 }
 0x138   :  { %790 = vmatpush1.msra.mxu0 %v4469_v30  ;;  %861 = vmatpush1.msra.mxu1 %v4474_v31 }
 0x139   :  { %791 = vmatprep.subr.mxu0 %v4481_v32  ;;  %862 = vmatprep.subr.mxu1 %v4486_v33 }
 0x13a   :  { %792 = vmatpush1.msra.mxu0 %v4495_v34  ;;  %863 = vmatpush1.msra.mxu1 %v4500_v35 }
 0x13b   :  { %793 = vmatprep.subr.mxu0 %v4512_v37  ;;  %864 = vmatprep.subr.mxu1 %v4517_v38 }
 0x13c   :  { %794 = vmatpush1.msra.mxu0 %v4524_v39  ;;  %865 = vmatpush1.msra.mxu1 %v4529_v40 }
 0x13d   :  { %795 = vmatprep.subr.mxu0 %v4536_v41  ;;  %866 = vmatprep.subr.mxu1 %v4541_v42 }
 0x13e   :  { %796 = vmatpush1.msra.mxu0 %v4550_v43  ;;  %867 = vmatpush1.msra.mxu1 %v4555_v44 }
 0x13f   :  { %797 = vmatprep.subr.mxu0 %v4567_v46  ;;  %868 = vmatprep.subr.mxu1 %v4572_v47 }
 0x140   :  { %798 = vmatpush1.msra.mxu0 %v4579_v48  ;;  %869 = vmatpush1.msra.mxu1 %v4584_v49 }
 0x141   :  { %799 = vmatprep.subr.mxu0 %v4591_v50  ;;  %870 = vmatprep.subr.mxu1 %v4596_v51 }
 0x142   :  { %800 = vmatpush1.msra.mxu0 %v4605_v52  ;;  %871 = vmatpush1.msra.mxu1 %v4610_v53 }
 0x143   :  { %801 = vmatprep.subr.mxu0 %v4622_v55  ;;  %872 = vmatprep.subr.mxu1 %v4627_v56 }
 0x144   :  { %802 = vmatpush1.msra.mxu0 %v4634_v57  ;;  %873 = vmatpush1.msra.mxu1 %v7652_v61 }
 0x145   :  { %803 = vmatprep.subr.mxu0 %v7653_v6  ;;  %874 = vmatprep.subr.mxu1 %v7654_v60 }
 0x146   :  { %804 = vmatpush1.msra.mxu0 %v7655_v59  ;;  %875 = vmatpush1.msra.mxu1 %v7656_v9 }
 0x147   :  { %805 = vmatprep.subr.mxu0 %v7657_v7  ;;  %876 = vmatprep.subr.mxu1 %v7658_v18  ;;  %v7678_v18 = vld [vmem:[#allocation28_spill] sm:$0xff] }
 0x148   :  { %806 = vmatpush1.msra.mxu0 %v7659_v45  ;;  %877 = vmatpush1.msra.mxu1 %v7660_v5  ;;  %v7677_v45 = vld [vmem:[#allocation30_spill] sm:$0xff] }
 0x149   :  { %807 = vmatprep.subr.mxu0 %v7661_v27  ;;  %878 = vmatprep.subr.mxu1 %v7662_v58  ;;  %v7673_v58 = vld [vmem:[#allocation26_spill] sm:$0xff] }
 0x14a   :  { %808 = vmatpush1.msra.mxu0 %v7663_v62  ;;  %879 = vmatpush1.msra.mxu1 %v7664_v36  ;;  %v7674_v36 = vld [vmem:[#allocation4_spill] sm:$0xff] }
 0x14b   :  { %809 = vmatprep.subr.mxu0 %v7665_v3  ;;  %880 = vmatprep.subr.mxu1 %v7666_v0  ;;  %v7675_v3 = vld [vmem:[#allocation5_spill] sm:$0xff] }
 0x14c   :  { %810 = vmatpush1.msra.mxu0 %v7667_v63  ;;  %881 = vmatpush1.msra.mxu1 %v7668_v10 }
 0x14d   :  { %811 = vmatprep.subr.mxu0 %v7669_v4  ;;  %882 = vmatprep.subr.mxu1 %v7670_v1  ;;  %v7676_v4 = vld [vmem:[#allocation29_spill] sm:$0xff] }
 0x14e   :  { %812 = vmatpush1.msra.mxu0 %v7671_v8  ;;  %845 = vmatprep.mubr.f32.mxu0 %v7672_v54 }
 0x14f   :  { %883 = vmatpush1.msra.mxu1 %v7673_v58  ;;  %916 = vmatprep.mubr.f32.mxu1 %v7672_v54 }
 0x150   :  { %960 = vmatprep.subr.mxu0 %v7674_v36  ;;  %1031 = vmatprep.subr.mxu1 %v7675_v3 }
 0x1ef   :  { %v668_v0 = vpop.f32.mrf.mxu0  ;;  %v739_v1 = vpop.f32.mrf.mxu1 }
 0x1f0   :  { %v744_v63 = vadd.f32 %v668_v0, %v4882_v2  ;;  %v746_v54 = vadd.f32 %v739_v1, %v7678_v18  ;;  %v7702_v1 = vld [vmem:[#allocation34_spill] sm:$0xff] }
 0x1f1   :  { %v670_v10 = vpop.f32.mrf.mxu0  ;;  %v741_v5 = vpop.f32.mrf.mxu1 }
 0x1f2   :  { %v3781_v62 = vmul.f32 -1.442695, %v744_v63  ;;  %v745_v27 = vadd.f32 %v670_v10, %v7676_v4  ;;  %v747_v58 = vadd.f32 %v741_v5, %v7677_v45 }
 0x1f4   :  { %3897 = vpow2.f32 %v3781_v62  ;;  %v3782_v8 = vmul.f32 -1.442695, %v745_v27  ;;  %v3783_v7 = vmul.f32 -1.442695, %v747_v58 }
 0x1f6   :  { %3899 = vpow2.f32 %v3782_v8 }
 0x1f7   :  { %3901 = vtanh.f32 %v746_v54 }
 0x1f8   :  { %3903 = vpow2.f32 %v3783_v7 }
 0x201   :  { %v3898_v36 = vpop.eup %3897 }
 0x202   :  { %v751_v9 = vadd.f32 1.0, %v3898_v36 }
 0x203   :  { %v3900_v3 = vpop.eup %3899 }
 0x204   :  { %3905 = vrcp.f32 %v751_v9  ;;  %v757_v2 = vadd.f32 1.0, %v3900_v3  ;;  %v3902_v0 = vpop.eup %3901  ;;  %v7703_v3 = vld [vmem:[#allocation32_spill] sm:$0xff] }
 0x205   :  { %v3904_v63 = vpop.eup %3903 }
 0x206   :  { %3907 = vrcp.f32 %v757_v2  ;;  %v764_v4 = vadd.f32 1.0, %v3904_v63 }
 0x208   :  { %3909 = vrcp.f32 %v764_v4 }
 0x211   :  { %v3906_v62 = vpop.eup %3905 }
 0x212   :  { %v768_v10 = vmul.f32 %v3906_v62, %v3902_v0 }
 0x213   :  { %v3908_v27 = vpop.eup %3907 }
 0x214   :  { %v767_v8 = vmul.f32 %v3908_v27, %v4958_v11 }
 0x215   :  { %v3910_v18 = vpop.eup %3909 }
 0x216   :  { %v5036_v45 = vadd.f32 %v768_v10, %v767_v8 }
 0x218   :  { %3911 = vtanh.f32 %v5036_v45 }
 0x225   :  { %v3912_v54 = vpop.eup %3911 }
 0x226   :  { %v5039_v5 = vmul.f32 %v3912_v54, %v3910_v18 }
 0x228   :  { %7679 = vst [vmem:[#allocation6_spill] sm:$0xff] %v5039_v5  ;;  %846 = vmatmul.mubr.f32.vlgmr.msra.gmra.mxu0 %v5039_v5  ;;  %917 = vmatmul.mubr.f32.vlgmr.msra.gmra.mxu1 %v5039_v5  ;;  %v5272_v5 = vld [vmem:[%s7384_s2 + $0x138] sm:$0xff] }
 0x229   :  { %961 = vmatpush1.msra.mxu0 %v4359_v12  ;;  %1032 = vmatpush1.msra.mxu1 %v4364_v13  ;;  %v7680_v12 = vld [vmem:[#allocation10_spill] sm:$0xff]  ;;  %v7681_v13 = vld [vmem:[#allocation11_spill] sm:$0xff] }
 0x22a   :  { %962 = vmatprep.subr.mxu0 %v4371_v14  ;;  %1033 = vmatprep.subr.mxu1 %v4376_v15  ;;  %v7682_v14 = vld [vmem:[#allocation12_spill] sm:$0xff]  ;;  %v7683_v15 = vld [vmem:[#allocation13_spill] sm:$0xff] }
 0x22b   :  { %963 = vmatpush1.msra.mxu0 %v4385_v16  ;;  %1034 = vmatpush1.msra.mxu1 %v4390_v17  ;;  %v7684_v16 = vld [vmem:[#allocation14_spill] sm:$0xff]  ;;  %v7685_v17 = vld [vmem:[#allocation15_spill] sm:$0xff] }
 0x22c   :  { %964 = vmatprep.subr.mxu0 %v4402_v19  ;;  %1035 = vmatprep.subr.mxu1 %v4407_v20  ;;  %v7686_v19 = vld [vmem:[#allocation16_spill] sm:$0xff]  ;;  %v7687_v20 = vld [vmem:[#allocation17_spill] sm:$0xff] }
 0x22d   :  { %965 = vmatpush1.msra.mxu0 %v4414_v21  ;;  %1036 = vmatpush1.msra.mxu1 %v4419_v22  ;;  %v7688_v21 = vld [vmem:[#allocation18_spill] sm:$0xff]  ;;  %v7689_v22 = vld [vmem:[#allocation19_spill] sm:$0xff] }
 0x22e   :  { %966 = vmatprep.subr.mxu0 %v4426_v23  ;;  %1037 = vmatprep.subr.mxu1 %v4431_v24  ;;  %v7690_v23 = vld [vmem:[#allocation20_spill] sm:$0xff]  ;;  %v7691_v24 = vld [vmem:[#allocation21_spill] sm:$0xff] }
 0x22f   :  { %967 = vmatpush1.msra.mxu0 %v4440_v25  ;;  %1038 = vmatpush1.msra.mxu1 %v4445_v26  ;;  %v7692_v25 = vld [vmem:[#allocation22_spill] sm:$0xff]  ;;  %v7693_v26 = vld [vmem:[#allocation23_spill] sm:$0xff] }
 0x230   :  { %968 = vmatprep.subr.mxu0 %v4457_v28  ;;  %1039 = vmatprep.subr.mxu1 %v4462_v29  ;;  %v7694_v28 = vld [vmem:[#allocation24_spill] sm:$0xff]  ;;  %v7695_v29 = vld [vmem:[#allocation25_spill] sm:$0xff] }
 0x231   :  { %969 = vmatpush1.msra.mxu0 %v4469_v30  ;;  %1040 = vmatpush1.msra.mxu1 %v4474_v31  ;;  %v7696_v30 = vmov 0.0   ;;  %v7697_v31 = vld [vmem:[#allocation26_spill] sm:$0xff] }
 0x232   :  { %970 = vmatprep.subr.mxu0 %v4481_v32  ;;  %1041 = vmatprep.subr.mxu1 %v4486_v33  ;;  %v5110_v32 = vld [vmem:[%s7384_s2 + $0x1e8] sm:$0xff]  ;;  %v5116_v33 = vld [vmem:[%s7384_s2 + $0x1f8] sm:$0xff] }
 0x233   :  { %971 = vmatpush1.msra.mxu0 %v4495_v34  ;;  %1042 = vmatpush1.msra.mxu1 %v4500_v35  ;;  %7698 = vst [vmem:[#allocation7_spill] sm:$0xff] %v5110_v32  ;;  %7699 = vst [vmem:[#allocation8_spill] sm:$0xff] %v5116_v33  ;;  %v7700_v35 = vld [vmem:[#allocation31_spill] sm:$0xff] }
 0x234   :  { %972 = vmatprep.subr.mxu0 %v4512_v37  ;;  %1043 = vmatprep.subr.mxu1 %v4517_v38 }
 0x235   :  { %973 = vmatpush1.msra.mxu0 %v4524_v39  ;;  %1044 = vmatpush1.msra.mxu1 %v4529_v40  ;;  %v7701_v40 = vld [vmem:[#allocation33_spill] sm:$0xff] }
 0x236   :  { %974 = vmatprep.subr.mxu0 %v4536_v41  ;;  %1045 = vmatprep.subr.mxu1 %v4541_v42 }
 0x237   :  { %975 = vmatpush1.msra.mxu0 %v4550_v43  ;;  %1046 = vmatpush1.msra.mxu1 %v4555_v44 }
 0x238   :  { %976 = vmatprep.subr.mxu0 %v4567_v46  ;;  %1047 = vmatprep.subr.mxu1 %v4572_v47 }
 0x239   :  { %977 = vmatpush1.msra.mxu0 %v4579_v48  ;;  %1048 = vmatpush1.msra.mxu1 %v4584_v49 }
 0x23a   :  { %978 = vmatprep.subr.mxu0 %v4591_v50  ;;  %1049 = vmatprep.subr.mxu1 %v4596_v51 }
 0x23b   :  { %979 = vmatpush1.msra.mxu0 %v4605_v52  ;;  %1050 = vmatpush1.msra.mxu1 %v4610_v53 }
 0x23c   :  { %980 = vmatprep.subr.mxu0 %v4622_v55  ;;  %1051 = vmatprep.subr.mxu1 %v4627_v56 }
 0x23d   :  { %981 = vmatpush1.msra.mxu0 %v4634_v57  ;;  %1052 = vmatpush1.msra.mxu1 %v7652_v61 }
 0x23e   :  { %982 = vmatprep.subr.mxu0 %v7653_v6  ;;  %1053 = vmatprep.subr.mxu1 %v7654_v60 }
 0x23f   :  { %983 = vmatpush1.msra.mxu0 %v7655_v59  ;;  %1054 = vmatpush1.msra.mxu1 %v7680_v12 }
 0x240   :  { %984 = vmatprep.subr.mxu0 %v7681_v13  ;;  %1055 = vmatprep.subr.mxu1 %v7682_v14 }
 0x241   :  { %985 = vmatpush1.msra.mxu0 %v7683_v15  ;;  %1056 = vmatpush1.msra.mxu1 %v7684_v16 }
 0x242   :  { %986 = vmatprep.subr.mxu0 %v7685_v17  ;;  %1057 = vmatprep.subr.mxu1 %v7686_v19 }
 0x243   :  { %987 = vmatpush1.msra.mxu0 %v7687_v20  ;;  %1058 = vmatpush1.msra.mxu1 %v7688_v21 }
 0x244   :  { %988 = vmatprep.subr.mxu0 %v7689_v22  ;;  %1059 = vmatprep.subr.mxu1 %v7690_v23 }
 0x245   :  { %989 = vmatpush1.msra.mxu0 %v7691_v24  ;;  %1060 = vmatpush1.msra.mxu1 %v7692_v25 }
 0x246   :  { %990 = vmatprep.subr.mxu0 %v7693_v26  ;;  %1061 = vmatprep.subr.mxu1 %v7694_v28 }
 0x247   :  { %991 = vmatpush1.msra.mxu0 %v7695_v29  ;;  %1024 = vmatprep.mubr.f32.mxu0 %v7696_v30 }
 0x248   :  { %1062 = vmatpush1.msra.mxu1 %v7697_v31  ;;  %1095 = vmatprep.mubr.f32.mxu1 %v7696_v30 }
 0x249   :  { %1139 = vmatprep.subr.mxu0 %v5110_v32  ;;  %1210 = vmatprep.subr.mxu1 %v5116_v33 }
 0x2e8   :  { %v847_v34 = vpop.f32.mrf.mxu0  ;;  %v918_v9 = vpop.f32.mrf.mxu1 }
 0x2e9   :  { %v923_v37 = vadd.f32 %v847_v34, %v7700_v35  ;;  %v925_v2 = vadd.f32 %v918_v9, %v7703_v3  ;;  %v5134_v9 = vld [vmem:[%s7384_s2 + $0x1e0] sm:$0xff]  ;;  %v5170_v3 = vld [vmem:[%s7384_s2 + $0x1a8] sm:$0xff] }
 0x2ea   :  { %v849_v38 = vpop.f32.mrf.mxu0  ;;  %v920_v58 = vpop.f32.mrf.mxu1 }
 0x2eb   :  { %v3784_v39 = vmul.f32 -1.442695, %v923_v37  ;;  %v924_v11 = vadd.f32 %v849_v38, %v7701_v40  ;;  %v926_v36 = vadd.f32 %v920_v58, %v7702_v1  ;;  %v5152_v58 = vld [vmem:[%s7384_s2 + $0x1d8] sm:$0xff]  ;;  %v5158_v1 = vld [vmem:[%s7384_s2 + $0x1c0] sm:$0xff] }
 0x2ed   :  { %3913 = vpow2.f32 %v3784_v39  ;;  %v3785_v7 = vmul.f32 -1.442695, %v924_v11  ;;  %v3786_v0 = vmul.f32 -1.442695, %v926_v36  ;;  %v5164_v36 = vld [vmem:[%s7384_s2 + $0x1d0] sm:$0xff] }
 0x2ef   :  { %3915 = vpow2.f32 %v3785_v7  ;;  %v5146_v7 = vld [vmem:[%s7384_s2 + $0x1c8] sm:$0xff] }
 0x2f0   :  { %3917 = vtanh.f32 %v925_v2  ;;  %v5176_v2 = vld [vmem:[%s7384_s2 + $0x1b8] sm:$0xff] }
 0x2f1   :  { %3919 = vpow2.f32 %v3786_v0  ;;  %v5182_v0 = vld [vmem:[%s7384_s2 + $0x1a0] sm:$0xff] }
 0x2fa   :  { %v3914_v63 = vpop.eup %3913 }
 0x2fb   :  { %v930_v62 = vadd.f32 1.0, %v3914_v63  ;;  %v5188_v63 = vld [vmem:[%s7384_s2 + $0x1b0] sm:$0xff] }
 0x2fc   :  { %v3916_v10 = vpop.eup %3915 }
 0x2fd   :  { %3921 = vrcp.f32 %v930_v62  ;;  %v936_v27 = vadd.f32 1.0, %v3916_v10  ;;  %v3918_v4 = vpop.eup %3917  ;;  %v5194_v62 = vld [vmem:[%s7384_s2 + $0x188] sm:$0xff]  ;;  %v5200_v10 = vld [vmem:[%s7384_s2 + $0x198] sm:$0xff] }
 0x2fe   :  { %v3920_v8 = vpop.eup %3919 }
 0x2ff   :  { %3923 = vrcp.f32 %v936_v27  ;;  %v943_v35 = vadd.f32 1.0, %v3920_v8  ;;  %v5206_v27 = vld [vmem:[%s7384_s2 + $0x180] sm:$0xff]  ;;  %v5218_v8 = vld [vmem:[%s7384_s2 + $0x168] sm:$0xff] }
 0x301   :  { %3925 = vrcp.f32 %v943_v35  ;;  %v5242_v35 = vld [vmem:[%s7384_s2 + $0x148] sm:$0xff] }
 0x30a   :  { %v3922_v18 = vpop.eup %3921 }
 0x30b   :  { %v947_v54 = vmul.f32 %v3922_v18, %v3918_v4  ;;  %v5212_v4 = vld [vmem:[%s7384_s2 + $0x190] sm:$0xff]  ;;  %v5224_v18 = vld [vmem:[%s7384_s2 + $0x178] sm:$0xff] }
 0x30c   :  { %v3924_v34 = vpop.eup %3923 }
 0x30d   :  { %v946_v37 = vmul.f32 %v3924_v34, %v5036_v45  ;;  %v5140_v45 = vld [vmem:[%s7384_s2 + $0x1f0] sm:$0xff] }
 0x30e   :  { %v3926_v39 = vpop.eup %3925  ;;  %v5236_v34 = vld [vmem:[%s7384_s2 + $0x170] sm:$0xff] }
 0x30f   :  { %v5124_v38 = vadd.f32 %v947_v54, %v946_v37  ;;  %v5230_v54 = vld [vmem:[%s7384_s2 + $0x160] sm:$0xff]  ;;  %v5248_v37 = vld [vmem:[%s7384_s2 + $0x158] sm:$0xff] }
 0x311   :  { %3927 = vtanh.f32 %v5124_v38 }
 0x31e   :  { %v3928_v40 = vpop.eup %3927 }
 0x31f   :  { %v5127_v11 = vmul.f32 %v3928_v40, %v3926_v39  ;;  %v5254_v39 = vld [vmem:[%s7384_s2 + $0x140] sm:$0xff]  ;;  %v5260_v40 = vld [vmem:[%s7384_s2 + $0x150] sm:$0xff] }
 0x320   :  { %7705 = vst [vmem:[#allocation4_spill] sm:$0xff] %v5254_v39  ;;  %7706 = vst [vmem:[#allocation5_spill] sm:$0xff] %v5260_v40 }
 0x321   :  { %7704 = vst [vmem:[#allocation9_spill] sm:$0xff] %v5127_v11  ;;  %1025 = vmatmul.mubr.f32.vlgmr.msra.gmra.mxu0 %v5127_v11  ;;  %1096 = vmatmul.mubr.f32.vlgmr.msra.gmra.mxu1 %v5127_v11  ;;  %v5266_v11 = vld [vmem:[%s7384_s2 + $0x128] sm:$0xff] }
 0x322   :  { %1140 = vmatpush1.msra.mxu0 %v5134_v9  ;;  %1211 = vmatpush1.msra.mxu1 %v5140_v45 }
 0x323   :  { %1141 = vmatprep.subr.mxu0 %v5146_v7  ;;  %1212 = vmatprep.subr.mxu1 %v5152_v58 }
 0x324   :  { %1142 = vmatpush1.msra.mxu0 %v5158_v1  ;;  %1213 = vmatpush1.msra.mxu1 %v5164_v36 }
 0x325   :  { %1143 = vmatprep.subr.mxu0 %v5170_v3  ;;  %1214 = vmatprep.subr.mxu1 %v5176_v2 }
 0x326   :  { %1144 = vmatpush1.msra.mxu0 %v5182_v0  ;;  %1215 = vmatpush1.msra.mxu1 %v5188_v63 }
 0x327   :  { %1145 = vmatprep.subr.mxu0 %v5194_v62  ;;  %1216 = vmatprep.subr.mxu1 %v5200_v10 }
 0x328   :  { %1146 = vmatpush1.msra.mxu0 %v5206_v27  ;;  %1217 = vmatpush1.msra.mxu1 %v5212_v4 }
 0x329   :  { %1147 = vmatprep.subr.mxu0 %v5218_v8  ;;  %1218 = vmatprep.subr.mxu1 %v5224_v18 }
 0x32a   :  { %1148 = vmatpush1.msra.mxu0 %v5230_v54  ;;  %1219 = vmatpush1.msra.mxu1 %v5236_v34 }
 0x32b   :  { %1149 = vmatprep.subr.mxu0 %v5242_v35  ;;  %1220 = vmatprep.subr.mxu1 %v5248_v37 }
 0x32c   :  { %1150 = vmatpush1.msra.mxu0 %v5254_v39  ;;  %1221 = vmatpush1.msra.mxu1 %v5260_v40  ;;  %v5278_v39 = vld [vmem:[%s7384_s2 + $0x120] sm:$0xff]  ;;  %v5284_v40 = vld [vmem:[%s7384_s2 + $0x130] sm:$0xff] }
 0x32d   :  { %1151 = vmatprep.subr.mxu0 %v5266_v11  ;;  %1222 = vmatprep.subr.mxu1 %v5272_v5 }
 0x32e   :  { %1152 = vmatpush1.msra.mxu0 %v5278_v39  ;;  %1223 = vmatpush1.msra.mxu1 %v5284_v40 }
 0x32f   :  { %1153 = vmatprep.subr.mxu0 %v4536_v41  ;;  %1224 = vmatprep.subr.mxu1 %v4541_v42  ;;  %v7707_v42 = vld [vmem:[#allocation35_spill] sm:$0xff] }
 0x330   :  { %1154 = vmatpush1.msra.mxu0 %v4550_v43  ;;  %1225 = vmatpush1.msra.mxu1 %v4555_v44 }
 0x331   :  { %1155 = vmatprep.subr.mxu0 %v4567_v46  ;;  %1226 = vmatprep.subr.mxu1 %v4572_v47  ;;  %v7708_v47 = vld [vmem:[#allocation37_spill] sm:$0xff] }
 0x332   :  { %1156 = vmatpush1.msra.mxu0 %v4579_v48  ;;  %1227 = vmatpush1.msra.mxu1 %v4584_v49 }
 0x333   :  { %1157 = vmatprep.subr.mxu0 %v4591_v50  ;;  %1228 = vmatprep.subr.mxu1 %v4596_v51 }
 0x334   :  { %1158 = vmatpush1.msra.mxu0 %v4605_v52  ;;  %1229 = vmatpush1.msra.mxu1 %v4610_v53  ;;  %v7709_v52 = vld [vmem:[#allocation38_spill] sm:$0xff] }
 0x335   :  { %1159 = vmatprep.subr.mxu0 %v4622_v55  ;;  %1230 = vmatprep.subr.mxu1 %v4627_v56  ;;  %v7710_v55 = vld [vmem:[#allocation36_spill] sm:$0xff] }
 0x336   :  { %1160 = vmatpush1.msra.mxu0 %v4634_v57  ;;  %1231 = vmatpush1.msra.mxu1 %v7652_v61 }
 0x337   :  { %1161 = vmatprep.subr.mxu0 %v7653_v6  ;;  %1232 = vmatprep.subr.mxu1 %v7654_v60 }
 0x338   :  { %1162 = vmatpush1.msra.mxu0 %v7655_v59  ;;  %1233 = vmatpush1.msra.mxu1 %v7680_v12 }
 0x339   :  { %1163 = vmatprep.subr.mxu0 %v7681_v13  ;;  %1234 = vmatprep.subr.mxu1 %v7682_v14 }
 0x33a   :  { %1164 = vmatpush1.msra.mxu0 %v7683_v15  ;;  %1235 = vmatpush1.msra.mxu1 %v7684_v16 }
 0x33b   :  { %1165 = vmatprep.subr.mxu0 %v7685_v17  ;;  %1236 = vmatprep.subr.mxu1 %v7686_v19 }
 0x33c   :  { %1166 = vmatpush1.msra.mxu0 %v7687_v20  ;;  %1237 = vmatpush1.msra.mxu1 %v7688_v21 }
 0x33d   :  { %1167 = vmatprep.subr.mxu0 %v7689_v22  ;;  %1238 = vmatprep.subr.mxu1 %v7690_v23 }
 0x33e   :  { %1168 = vmatpush1.msra.mxu0 %v7691_v24  ;;  %1239 = vmatpush1.msra.mxu1 %v7692_v25  ;;  %v7712_v24 = vld [vmem:[#allocation4_spill] sm:$0xff]  ;;  %v7713_v25 = vld [vmem:[#allocation5_spill] sm:$0xff] }
 0x33f   :  { %1169 = vmatprep.subr.mxu0 %v7693_v26  ;;  %1240 = vmatprep.subr.mxu1 %v7694_v28  ;;  %v5368_v26 = vld [vmem:[%s7384_s2 + $0x108] sm:$0xff]  ;;  %v5374_v28 = vld [vmem:[%s7384_s2 + $0x118] sm:$0xff] }
 0x340   :  { %1170 = vmatpush1.msra.mxu0 %v7695_v29  ;;  %1203 = vmatprep.mubr.f32.mxu0 %v7696_v30  ;;  %v5380_v29 = vld [vmem:[%s7384_s2 + $0x100] sm:$0xff] }
 0x341   :  { %1241 = vmatpush1.msra.mxu1 %v7697_v31  ;;  %1274 = vmatprep.mubr.f32.mxu1 %v7696_v30  ;;  %v5386_v31 = vld [vmem:[%s7384_s2 + $0x110] sm:$0xff] }
 0x342   :  { %1318 = vmatprep.subr.mxu0 %v5110_v32  ;;  %1389 = vmatprep.subr.mxu1 %v5116_v33 }
 0x3e1   :  { %v1026_v41 = vpop.f32.mrf.mxu0  ;;  %v1097_v49 = vpop.f32.mrf.mxu1 }
 0x3e2   :  { %v1102_v43 = vadd.f32 %v1026_v41, %v7707_v42  ;;  %v1104_v56 = vadd.f32 %v1097_v49, %v7710_v55  ;;  %v5398_v41 = vld [vmem:[%s7384_s2 + $0xf8] sm:$0xff]  ;;  %v5404_v42 = vld [vmem:[%s7384_s2 + $0xe0] sm:$0xff]  ;;  %v5440_v49 = vld [vmem:[%s7384_s2 + $0xa8] sm:$0xff] }
 0x3e3   :  { %v1028_v44 = vpop.f32.mrf.mxu0  ;;  %v1099_v51 = vpop.f32.mrf.mxu1  ;;  %v5470_v55 = vld [vmem:[%s7384_s2 + $0x98] sm:$0xff] }
 0x3e4   :  { %v3787_v46 = vmul.f32 -1.442695, %v1102_v43  ;;  %v1103_v48 = vadd.f32 %v1028_v44, %v7708_v47  ;;  %v1105_v53 = vadd.f32 %v1099_v51, %v7709_v52  ;;  %v5410_v43 = vld [vmem:[%s7384_s2 + $0xf0] sm:$0xff]  ;;  %v5416_v44 = vld [vmem:[%s7384_s2 + $0xc8] sm:$0xff]  ;;  %v5428_v47 = vld [vmem:[%s7384_s2 + $0xc0] sm:$0xff] }
 0x3e5   :  { %v5452_v51 = vld [vmem:[%s7384_s2 + $0xa0] sm:$0xff]  ;;  %v5458_v52 = vld [vmem:[%s7384_s2 + $0xb0] sm:$0xff] }
 0x3e6   :  { %3929 = vpow2.f32 %v3787_v46  ;;  %v3788_v50 = vmul.f32 -1.442695, %v1103_v48  ;;  %v3789_v57 = vmul.f32 -1.442695, %v1105_v53  ;;  %v5422_v46 = vld [vmem:[%s7384_s2 + $0xd8] sm:$0xff]  ;;  %v5434_v48 = vld [vmem:[%s7384_s2 + $0xd0] sm:$0xff] }
 0x3e7   :  { %v5464_v53 = vld [vmem:[%s7384_s2 + $0x88] sm:$0xff] }
 0x3e8   :  { %3931 = vpow2.f32 %v3788_v50  ;;  %v5446_v50 = vld [vmem:[%s7384_s2 + $0xb8] sm:$0xff] }
 0x3e9   :  { %3933 = vtanh.f32 %v1104_v56  ;;  %v5476_v56 = vld [vmem:[%s7384_s2 + $0x80] sm:$0xff] }
 0x3ea   :  { %3935 = vpow2.f32 %v3789_v57  ;;  %v5482_v57 = vld [vmem:[%s7384_s2 + $0x90] sm:$0xff] }
 0x3eb   :  { %7714 = vst [vmem:[#allocation30_spill] sm:$0xff] %v5482_v57 }
 0x3f3   :  { %v3930_v61 = vpop.eup %3929 }
 0x3f4   :  { %v1109_v6 = vadd.f32 1.0, %v3930_v61  ;;  %v5488_v61 = vld [vmem:[%s7384_s2 + $0x68] sm:$0xff] }
 0x3f5   :  { %v3932_v60 = vpop.eup %3931  ;;  %7715 = vst [vmem:[#allocation28_spill] sm:$0xff] %v5488_v61 }
 0x3f6   :  { %3937 = vrcp.f32 %v1109_v6  ;;  %v1115_v59 = vadd.f32 1.0, %v3932_v60  ;;  %v3934_v12 = vpop.eup %3933  ;;  %v5494_v6 = vld [vmem:[%s7384_s2 + $0x78] sm:$0xff]  ;;  %v5500_v60 = vld [vmem:[%s7384_s2 + $0x60] sm:$0xff] }
 0x3f7   :  { %v3936_v13 = vpop.eup %3935  ;;  %7716 = vst [vmem:[#allocation10_spill] sm:$0xff] %v5494_v6  ;;  %7717 = vst [vmem:[#allocation11_spill] sm:$0xff] %v5500_v60 }
 0x3f8   :  { %3939 = vrcp.f32 %v1115_v59  ;;  %v1122_v17 = vadd.f32 1.0, %v3936_v13  ;;  %v5506_v59 = vld [vmem:[%s7384_s2 + $0x70] sm:$0xff]  ;;  %v5518_v13 = vld [vmem:[%s7384_s2 + $0x58] sm:$0xff] }
 0x3f9   :  { %7718 = vst [vmem:[#allocation12_spill] sm:$0xff] %v5506_v59  ;;  %7720 = vst [vmem:[#allocation14_spill] sm:$0xff] %v5518_v13 }
 0x3fa   :  { %3941 = vrcp.f32 %v1122_v17  ;;  %v5542_v17 = vld [vmem:[%s7384_s2 + $0x38] sm:$0xff] }
 0x3fb   :  { %7724 = vst [vmem:[#allocation18_spill] sm:$0xff] %v5542_v17 }
 0x403   :  { %v3938_v14 = vpop.eup %3937 }
 0x404   :  { %v1126_v15 = vmul.f32 %v3938_v14, %v3934_v12  ;;  %v5512_v12 = vld [vmem:[%s7384_s2 + $0x48] sm:$0xff]  ;;  %v5524_v14 = vld [vmem:[%s7384_s2 + $0x40] sm:$0xff] }
 0x405   :  { %v3940_v16 = vpop.eup %3939  ;;  %7719 = vst [vmem:[#allocation13_spill] sm:$0xff] %v5512_v12  ;;  %7721 = vst [vmem:[#allocation15_spill] sm:$0xff] %v5524_v14 }
 0x406   :  { %v1125_v19 = vmul.f32 %v3940_v16, %v5124_v38  ;;  %v5392_v38 = vld [vmem:[%s7384_s2 + $0xe8] sm:$0xff] }
 0x407   :  { %v3942_v21 = vpop.eup %3941  ;;  %v5536_v16 = vld [vmem:[%s7384_s2 + $0x28] sm:$0xff] }
 0x408   :  { %v5332_v20 = vadd.f32 %v1126_v15, %v1125_v19  ;;  %v5530_v15 = vld [vmem:[%s7384_s2 + $0x50] sm:$0xff]  ;;  %7723 = vst [vmem:[#allocation17_spill] sm:$0xff] %v5536_v16  ;;  %v5548_v19 = vld [vmem:[%s7384_s2 + $0x20] sm:$0xff] }
 0x409   :  { %7722 = vst [vmem:[#allocation16_spill] sm:$0xff] %v5530_v15  ;;  %7725 = vst [vmem:[#allocation19_spill] sm:$0xff] %v5548_v19 }
 0x40a   :  { %3943 = vtanh.f32 %v5332_v20 }
 0x417   :  { %v3944_v22 = vpop.eup %3943 }
 0x418   :  { %v5335_v23 = vmul.f32 %v3944_v22, %v3942_v21  ;;  %v5554_v21 = vld [vmem:[%s7384_s2 + $0x30] sm:$0xff]  ;;  %v5560_v22 = vld [vmem:[%s7384_s2 + $0x8] sm:$0xff] }
 0x419   :  { %7726 = vst [vmem:[#allocation20_spill] sm:$0xff] %v5554_v21  ;;  %7727 = vst [vmem:[#allocation21_spill] sm:$0xff] %v5560_v22 }
 0x41a   :  { %7711 = vst [vmem:[#allocation29_spill] sm:$0xff] %v5335_v23  ;;  %1204 = vmatmul.mubr.f32.vlgmr.msra.gmra.mxu0 %v5335_v23  ;;  %1275 = vmatmul.mubr.f32.vlgmr.msra.gmra.mxu1 %v5335_v23  ;;  %v5566_v23 = vld [vmem:[%s7384_s2 + $0x18] sm:$0xff] }
 0x41b   :  { %1319 = vmatpush1.msra.mxu0 %v5134_v9  ;;  %1390 = vmatpush1.msra.mxu1 %v5140_v45  ;;  %7728 = vst [vmem:[#allocation22_spill] sm:$0xff] %v5566_v23 }
 0x41c   :  { %1320 = vmatprep.subr.mxu0 %v5146_v7  ;;  %1391 = vmatprep.subr.mxu1 %v5152_v58 }
 0x41d   :  { %1321 = vmatpush1.msra.mxu0 %v5158_v1  ;;  %1392 = vmatpush1.msra.mxu1 %v5164_v36 }
 0x41e   :  { %1322 = vmatprep.subr.mxu0 %v5170_v3  ;;  %1393 = vmatprep.subr.mxu1 %v5176_v2 }
 0x41f   :  { %1323 = vmatpush1.msra.mxu0 %v5182_v0  ;;  %1394 = vmatpush1.msra.mxu1 %v5188_v63 }
 0x420   :  { %1324 = vmatprep.subr.mxu0 %v5194_v62  ;;  %1395 = vmatprep.subr.mxu1 %v5200_v10 }
 0x421   :  { %1325 = vmatpush1.msra.mxu0 %v5206_v27  ;;  %1396 = vmatpush1.msra.mxu1 %v5212_v4 }
 0x422   :  { %1326 = vmatprep.subr.mxu0 %v5218_v8  ;;  %1397 = vmatprep.subr.mxu1 %v5224_v18 }
 0x423   :  { %1327 = vmatpush1.msra.mxu0 %v5230_v54  ;;  %1398 = vmatpush1.msra.mxu1 %v5236_v34 }
 0x424   :  { %1328 = vmatprep.subr.mxu0 %v5242_v35  ;;  %1399 = vmatprep.subr.mxu1 %v5248_v37 }
 0x425   :  { %1329 = vmatpush1.msra.mxu0 %v7712_v24  ;;  %1400 = vmatpush1.msra.mxu1 %v7713_v25 }
 0x426   :  { %1330 = vmatprep.subr.mxu0 %v5266_v11  ;;  %1401 = vmatprep.subr.mxu1 %v5272_v5 }
 0x427   :  { %1331 = vmatpush1.msra.mxu0 %v5278_v39  ;;  %1402 = vmatpush1.msra.mxu1 %v5284_v40 }
 0x428   :  { %1332 = vmatprep.subr.mxu0 %v5368_v26  ;;  %1403 = vmatprep.subr.mxu1 %v5374_v28 }
 0x429   :  { %1333 = vmatpush1.msra.mxu0 %v5380_v29  ;;  %1404 = vmatpush1.msra.mxu1 %v5386_v31 }
 0x42a   :  { %1334 = vmatprep.subr.mxu0 %v5392_v38  ;;  %1405 = vmatprep.subr.mxu1 %v5398_v41 }
 0x42b   :  { %1335 = vmatpush1.msra.mxu0 %v5404_v42  ;;  %1406 = vmatpush1.msra.mxu1 %v5410_v43 }
 0x42c   :  { %1336 = vmatprep.subr.mxu0 %v5416_v44  ;;  %1407 = vmatprep.subr.mxu1 %v5422_v46 }
 0x42d   :  { %1337 = vmatpush1.msra.mxu0 %v5428_v47  ;;  %1408 = vmatpush1.msra.mxu1 %v5434_v48 }
 0x42e   :  { %1338 = vmatprep.subr.mxu0 %v5440_v49  ;;  %1409 = vmatprep.subr.mxu1 %v5446_v50 }
 0x42f   :  { %1339 = vmatpush1.msra.mxu0 %v5452_v51  ;;  %1410 = vmatpush1.msra.mxu1 %v5458_v52 }
 0x430   :  { %1340 = vmatprep.subr.mxu0 %v5464_v53  ;;  %1411 = vmatprep.subr.mxu1 %v5470_v55 }
 0x431   :  { %1341 = vmatpush1.msra.mxu0 %v5476_v56  ;;  %1412 = vmatpush1.msra.mxu1 %v5482_v57 }
 0x432   :  { %1342 = vmatprep.subr.mxu0 %v5488_v61  ;;  %1413 = vmatprep.subr.mxu1 %v5494_v6  ;;  %v7734_v6 = vld [vmem:[#allocation40_spill] sm:$0xff] }
 0x433   :  { %1343 = vmatpush1.msra.mxu0 %v5500_v60  ;;  %1414 = vmatpush1.msra.mxu1 %v5506_v59  ;;  %v7733_v60 = vld [vmem:[#allocation42_spill] sm:$0xff] }
 0x434   :  { %1344 = vmatprep.subr.mxu0 %v5512_v12  ;;  %1415 = vmatprep.subr.mxu1 %v5518_v13 }
 0x435   :  { %1345 = vmatpush1.msra.mxu0 %v5524_v14  ;;  %1416 = vmatpush1.msra.mxu1 %v5530_v15  ;;  %v7732_v15 = vld [vmem:[#allocation41_spill] sm:$0xff] }
 0x436   :  { %1346 = vmatprep.subr.mxu0 %v5536_v16  ;;  %1417 = vmatprep.subr.mxu1 %v5542_v17 }
 0x437   :  { %1347 = vmatpush1.msra.mxu0 %v5548_v19  ;;  %1418 = vmatpush1.msra.mxu1 %v5554_v21  ;;  %v5572_v19 = vld [vmem:[%s7384_s2] sm:$0xff]  ;;  %v7731_v21 = vld [vmem:[#allocation39_spill] sm:$0xff] }
 0x438   :  { %1348 = vmatprep.subr.mxu0 %v5560_v22  ;;  %1419 = vmatprep.subr.mxu1 %v5566_v23  ;;  %7729 = vst [vmem:[#allocation23_spill] sm:$0xff] %v5572_v19  ;;  %v5579_v22 = vld [vmem:[%s7384_s2 + $0x10] sm:$0xff] }
 0x439   :  { %1349 = vmatpush1.msra.mxu0 %v5572_v19  ;;  %1382 = vmatprep.mubr.f32.mxu0 %v7696_v30  ;;  %7730 = vst [vmem:[#allocation24_spill] sm:$0xff] %v5579_v22 }
 0x43a   :  { %1420 = vmatpush1.msra.mxu1 %v5579_v22  ;;  %1453 = vmatprep.mubr.f32.mxu1 %v7696_v30 }
 0x43b   :  { %1497 = vmatprep.subr.mxu0 %v5110_v32  ;;  %1568 = vmatprep.subr.mxu1 %v5116_v33 }
 0x4da   :  { %v1205_v23 = vpop.f32.mrf.mxu0  ;;  %v1276_v13 = vpop.f32.mrf.mxu1 }
 0x4db   :  { %v1281_v17 = vadd.f32 %v1205_v23, %v7731_v21  ;;  %v1283_v30 = vadd.f32 %v1276_v13, %v7734_v6  ;;  %v7741_v13 = vld [vmem:[#allocation13_spill] sm:$0xff] }
 0x4dc   :  { %v1207_v16 = vpop.f32.mrf.mxu0  ;;  %v1278_v59 = vpop.f32.mrf.mxu1 }
 0x4dd   :  { %v3790_v19 = vmul.f32 -1.442695, %v1281_v17  ;;  %v1282_v14 = vadd.f32 %v1207_v16, %v7732_v15  ;;  %v1284_v22 = vadd.f32 %v1278_v59, %v7733_v60  ;;  %v7740_v59 = vld [vmem:[#allocation12_spill] sm:$0xff] }
 0x4df   :  { %3945 = vpow2.f32 %v3790_v19  ;;  %v3791_v12 = vmul.f32 -1.442695, %v1282_v14  ;;  %v3792_v61 = vmul.f32 -1.442695, %v1284_v22  ;;  %v7742_v22 = vld [vmem:[#allocation14_spill] sm:$0xff] }
 0x4e1   :  { %3947 = vpow2.f32 %v3791_v12 }
 0x4e2   :  { %3949 = vtanh.f32 %v1283_v30 }
 0x4e3   :  { %3951 = vpow2.f32 %v3792_v61  ;;  %v7739_v61 = vld [vmem:[#allocation11_spill] sm:$0xff] }
 0x4ec   :  { %v3946_v32 = vpop.eup %3945 }
 0x4ed   :  { %v1288_v57 = vadd.f32 1.0, %v3946_v32 }
 0x4ee   :  { %v3948_v33 = vpop.eup %3947 }
 0x4ef   :  { %3953 = vrcp.f32 %v1288_v57  ;;  %v1294_v23 = vadd.f32 1.0, %v3948_v33  ;;  %v3950_v17 = vpop.eup %3949  ;;  %v7736_v33 = vld [vmem:[#allocation30_spill] sm:$0xff] }
 0x4f0   :  { %v3952_v15 = vpop.eup %3951  ;;  %v7738_v57 = vld [vmem:[#allocation10_spill] sm:$0xff] }
 0x4f1   :  { %3955 = vrcp.f32 %v1294_v23  ;;  %v1301_v12 = vadd.f32 1.0, %v3952_v15  ;;  %v7743_v23 = vld [vmem:[#allocation15_spill] sm:$0xff]  ;;  %v7745_v15 = vld [vmem:[#allocation17_spill] sm:$0xff] }
 0x4f3   :  { %3957 = vrcp.f32 %v1301_v12  ;;  %v7749_v12 = vld [vmem:[#allocation21_spill] sm:$0xff] }
 0x4fc   :  { %v3954_v16 = vpop.eup %3953 }
 0x4fd   :  { %v1305_v19 = vmul.f32 %v3954_v16, %v3950_v17  ;;  %v7744_v17 = vld [vmem:[#allocation16_spill] sm:$0xff]  ;;  %v7746_v16 = vld [vmem:[#allocation18_spill] sm:$0xff] }
 0x4fe   :  { %v3956_v14 = vpop.eup %3955 }
 0x4ff   :  { %v1304_v21 = vmul.f32 %v3956_v14, %v5332_v20  ;;  %v7737_v20 = vld [vmem:[#allocation28_spill] sm:$0xff] }
 0x500   :  { %v3958_v32 = vpop.eup %3957  ;;  %v7748_v14 = vld [vmem:[#allocation20_spill] sm:$0xff] }
 0x501   :  { %v5590_v60 = vadd.f32 %v1305_v19, %v1304_v21  ;;  %v7747_v19 = vld [vmem:[#allocation19_spill] sm:$0xff]  ;;  %v7750_v21 = vld [vmem:[#allocation22_spill] sm:$0xff] }
 0x503   :  { %3959 = vtanh.f32 %v5590_v60 }
 0x510   :  { %v3960_v30 = vpop.eup %3959 }
 0x511   :  { %v5593_v6 = vmul.f32 %v3960_v30, %v3958_v32  ;;  %v7751_v32 = vld [vmem:[#allocation23_spill] sm:$0xff]  ;;  %v7752_v30 = vmov 0.0  }
 0x513   :  { %7735 = vst [vmem:[#allocation25_spill] sm:$0xff] %v5593_v6  ;;  %1383 = vmatmul.mubr.f32.vlgmr.msra.gmra.mxu0 %v5593_v6  ;;  %1454 = vmatmul.mubr.f32.vlgmr.msra.gmra.mxu1 %v5593_v6  ;;  %v7753_v6 = vld [vmem:[#allocation24_spill] sm:$0xff] }
 0x514   :  { %1498 = vmatpush1.msra.mxu0 %v5134_v9  ;;  %1569 = vmatpush1.msra.mxu1 %v5140_v45 }
 0x515   :  { %1499 = vmatprep.subr.mxu0 %v5146_v7  ;;  %1570 = vmatprep.subr.mxu1 %v5152_v58 }
 0x516   :  { %1500 = vmatpush1.msra.mxu0 %v5158_v1  ;;  %1571 = vmatpush1.msra.mxu1 %v5164_v36 }
 0x517   :  { %1501 = vmatprep.subr.mxu0 %v5170_v3  ;;  %1572 = vmatprep.subr.mxu1 %v5176_v2 }
 0x518   :  { %1502 = vmatpush1.msra.mxu0 %v5182_v0  ;;  %1573 = vmatpush1.msra.mxu1 %v5188_v63 }
 0x519   :  { %1503 = vmatprep.subr.mxu0 %v5194_v62  ;;  %1574 = vmatprep.subr.mxu1 %v5200_v10 }
 0x51a   :  { %1504 = vmatpush1.msra.mxu0 %v5206_v27  ;;  %1575 = vmatpush1.msra.mxu1 %v5212_v4 }
 0x51b   :  { %1505 = vmatprep.subr.mxu0 %v5218_v8  ;;  %1576 = vmatprep.subr.mxu1 %v5224_v18 }
 0x51c   :  { %1506 = vmatpush1.msra.mxu0 %v5230_v54  ;;  %1577 = vmatpush1.msra.mxu1 %v5236_v34 }
 0x51d   :  { %1507 = vmatprep.subr.mxu0 %v5242_v35  ;;  %1578 = vmatprep.subr.mxu1 %v5248_v37 }
 0x51e   :  { %1508 = vmatpush1.msra.mxu0 %v7712_v24  ;;  %1579 = vmatpush1.msra.mxu1 %v7713_v25 }
 0x51f   :  { %1509 = vmatprep.subr.mxu0 %v5266_v11  ;;  %1580 = vmatprep.subr.mxu1 %v5272_v5 }
 0x520   :  { %1510 = vmatpush1.msra.mxu0 %v5278_v39  ;;  %1581 = vmatpush1.msra.mxu1 %v5284_v40 }
 0x521   :  { %1511 = vmatprep.subr.mxu0 %v5368_v26  ;;  %1582 = vmatprep.subr.mxu1 %v5374_v28 }
 0x522   :  { %1512 = vmatpush1.msra.mxu0 %v5380_v29  ;;  %1583 = vmatpush1.msra.mxu1 %v5386_v31 }
 0x523   :  { %1513 = vmatprep.subr.mxu0 %v5392_v38  ;;  %1584 = vmatprep.subr.mxu1 %v5398_v41 }
 0x524   :  { %1514 = vmatpush1.msra.mxu0 %v5404_v42  ;;  %1585 = vmatpush1.msra.mxu1 %v5410_v43 }
 0x525   :  { %1515 = vmatprep.subr.mxu0 %v5416_v44  ;;  %1586 = vmatprep.subr.mxu1 %v5422_v46 }
 0x526   :  { %1516 = vmatpush1.msra.mxu0 %v5428_v47  ;;  %1587 = vmatpush1.msra.mxu1 %v5434_v48 }
 0x527   :  { %1517 = vmatprep.subr.mxu0 %v5440_v49  ;;  %1588 = vmatprep.subr.mxu1 %v5446_v50 }
 0x528   :  { %1518 = vmatpush1.msra.mxu0 %v5452_v51  ;;  %1589 = vmatpush1.msra.mxu1 %v5458_v52 }
 0x529   :  { %1519 = vmatprep.subr.mxu0 %v5464_v53  ;;  %1590 = vmatprep.subr.mxu1 %v5470_v55 }
 0x52a   :  { %1520 = vmatpush1.msra.mxu0 %v5476_v56  ;;  %1591 = vmatpush1.msra.mxu1 %v7736_v33 }
 0x52b   :  { %1521 = vmatprep.subr.mxu0 %v7737_v20  ;;  %1592 = vmatprep.subr.mxu1 %v7738_v57  ;;  %v7759_v57 = vld [vmem:[#allocation44_spill] sm:$0xff] }
 0x52c   :  { %1522 = vmatpush1.msra.mxu0 %v7739_v61  ;;  %1593 = vmatpush1.msra.mxu1 %v7740_v59  ;;  %v7758_v61 = vld [vmem:[#allocation46_spill] sm:$0xff] }
 0x52d   :  { %1523 = vmatprep.subr.mxu0 %v7741_v13  ;;  %1594 = vmatprep.subr.mxu1 %v7742_v22 }
 0x52e   :  { %1524 = vmatpush1.msra.mxu0 %v7743_v23  ;;  %1595 = vmatpush1.msra.mxu1 %v7744_v17  ;;  %v7754_v17 = vld [vmem:[#allocation7_spill] sm:$0xff] }
 0x52f   :  { %1525 = vmatprep.subr.mxu0 %v7745_v15  ;;  %1596 = vmatprep.subr.mxu1 %v7746_v16  ;;  %v7755_v15 = vld [vmem:[#allocation8_spill] sm:$0xff] }
 0x530   :  { %1526 = vmatpush1.msra.mxu0 %v7747_v19  ;;  %1597 = vmatpush1.msra.mxu1 %v7748_v14  ;;  %v7756_v19 = vld [vmem:[#allocation43_spill] sm:$0xff] }
 0x531   :  { %1527 = vmatprep.subr.mxu0 %v7749_v12  ;;  %1598 = vmatprep.subr.mxu1 %v7750_v21  ;;  %v7757_v12 = vld [vmem:[#allocation45_spill] sm:$0xff] }
 0x532   :  { %1528 = vmatpush1.msra.mxu0 %v7751_v32  ;;  %1561 = vmatprep.mubr.f32.mxu0 %v7752_v30 }
 0x533   :  { %1599 = vmatpush1.msra.mxu1 %v7753_v6  ;;  %1632 = vmatprep.mubr.f32.mxu1 %v7752_v30 }
 0x534   :  { %1676 = vmatprep.subr.mxu0 %v7754_v17  ;;  %1747 = vmatprep.subr.mxu1 %v7755_v15 }
 0x5d3   :  { %v1384_v16 = vpop.f32.mrf.mxu0  ;;  %v1455_v21 = vpop.f32.mrf.mxu1 }
 0x5d4   :  { %v1460_v23 = vadd.f32 %v1384_v16, %v7756_v19  ;;  %v1462_v30 = vadd.f32 %v1455_v21, %v7759_v57 }
 0x5d5   :  { %v1386_v14 = vpop.f32.mrf.mxu0  ;;  %v1457_v59 = vpop.f32.mrf.mxu1 }
 0x5d6   :  { %v3793_v22 = vmul.f32 -1.442695, %v1460_v23  ;;  %v1461_v13 = vadd.f32 %v1386_v14, %v7757_v12  ;;  %v1463_v6 = vadd.f32 %v1457_v59, %v7758_v61 }
 0x5d8   :  { %3961 = vpow2.f32 %v3793_v22  ;;  %v3794_v32 = vmul.f32 -1.442695, %v1461_v13  ;;  %v3795_v20 = vmul.f32 -1.442695, %v1463_v6 }
 0x5da   :  { %3963 = vpow2.f32 %v3794_v32 }
 0x5db   :  { %3965 = vtanh.f32 %v1462_v30 }
 0x5dc   :  { %3967 = vpow2.f32 %v3795_v20 }
 0x5e5   :  { %v3962_v17 = vpop.eup %3961 }
 0x5e6   :  { %v1467_v33 = vadd.f32 1.0, %v3962_v17  ;;  %v1908_v17 = vld [vmem:[%s7386_s4 + $0x1e0] sm:$0xff] }
 0x5e7   :  { %v3964_v15 = vpop.eup %3963 }
 0x5e8   :  { %3969 = vrcp.f32 %v1467_v33  ;;  %v1473_v16 = vadd.f32 1.0, %v3964_v15  ;;  %v3966_v23 = vpop.eup %3965  ;;  %v1910_v15 = vld [vmem:[%s7386_s4 + $0x1f0] sm:$0xff] }
 0x5e9   :  { %v3968_v19 = vpop.eup %3967 }
 0x5ea   :  { %3971 = vrcp.f32 %v1473_v16  ;;  %v1480_v12 = vadd.f32 1.0, %v3968_v19  ;;  %v1905_v16 = vld [vmem:[%s7386_s4 + $0x1c8] sm:$0xff]  ;;  %v1904_v19 = vld [vmem:[%s7386_s4 + $0x1c0] sm:$0xff] }
 0x5ec   :  { %3973 = vrcp.f32 %v1480_v12  ;;  %v1900_v12 = vld [vmem:[%s7386_s4 + $0x1a0] sm:$0xff] }
 0x5f5   :  { %v3970_v22 = vpop.eup %3969 }
 0x5f6   :  { %v1484_v14 = vmul.f32 %v3970_v22, %v3966_v23  ;;  %v1907_v23 = vld [vmem:[%s7386_s4 + $0x1d8] sm:$0xff]  ;;  %v1906_v22 = vld [vmem:[%s7386_s4 + $0x1d0] sm:$0xff] }
 0x5f7   :  { %v3972_v13 = vpop.eup %3971 }
 0x5f8   :  { %v1483_v32 = vmul.f32 %v3972_v13, %v5590_v60  ;;  %v1903_v13 = vld [vmem:[%s7386_s4 + $0x1b8] sm:$0xff] }
 0x5f9   :  { %v3974_v6 = vpop.eup %3973 }
 0x5fa   :  { %v5668_v61 = vadd.f32 %v1484_v14, %v1483_v32  ;;  %v1901_v14 = vld [vmem:[%s7386_s4 + $0x1a8] sm:$0xff]  ;;  %v1902_v32 = vld [vmem:[%s7386_s4 + $0x1b0] sm:$0xff] }
 0x5fc   :  { %3975 = vtanh.f32 %v5668_v61 }
 0x609   :  { %v3976_v57 = vpop.eup %3975 }
 0x60a   :  { %v5671_v59 = vmul.f32 %v3976_v57, %v3974_v6  ;;  %v1899_v6 = vld [vmem:[%s7386_s4 + $0x198] sm:$0xff]  ;;  %v1896_v57 = vld [vmem:[%s7386_s4 + $0x180] sm:$0xff] }
 0x60c   :  { %1562 = vmatmul.mubr.f32.vlgmr.msra.gmra.mxu0 %v5671_v59  ;;  %1633 = vmatmul.mubr.f32.vlgmr.msra.gmra.mxu1 %v5671_v59 }
 0x60d   :  { %1677 = vmatpush1.msra.mxu0 %v5134_v9  ;;  %1748 = vmatpush1.msra.mxu1 %v5140_v45  ;;  %v7762_v9 = vld [vmem:[#allocation10_spill] sm:$0xff]  ;;  %v7763_v45 = vld [vmem:[#allocation11_spill] sm:$0xff] }
 0x60e   :  { %1678 = vmatprep.subr.mxu0 %v5146_v7  ;;  %1749 = vmatprep.subr.mxu1 %v5152_v58  ;;  %v7764_v7 = vld [vmem:[#allocation12_spill] sm:$0xff]  ;;  %v7765_v58 = vld [vmem:[#allocation13_spill] sm:$0xff] }
 0x60f   :  { %1679 = vmatpush1.msra.mxu0 %v5158_v1  ;;  %1750 = vmatpush1.msra.mxu1 %v5164_v36  ;;  %v7766_v1 = vld [vmem:[#allocation14_spill] sm:$0xff]  ;;  %v7767_v36 = vld [vmem:[#allocation15_spill] sm:$0xff] }
 0x610   :  { %1680 = vmatprep.subr.mxu0 %v5170_v3  ;;  %1751 = vmatprep.subr.mxu1 %v5176_v2  ;;  %v7768_v3 = vld [vmem:[#allocation16_spill] sm:$0xff]  ;;  %v7769_v2 = vld [vmem:[#allocation17_spill] sm:$0xff] }
 0x611   :  { %1681 = vmatpush1.msra.mxu0 %v5182_v0  ;;  %1752 = vmatpush1.msra.mxu1 %v5188_v63  ;;  %v7770_v0 = vld [vmem:[#allocation18_spill] sm:$0xff]  ;;  %v7771_v63 = vld [vmem:[#allocation19_spill] sm:$0xff] }
 0x612   :  { %1682 = vmatprep.subr.mxu0 %v5194_v62  ;;  %1753 = vmatprep.subr.mxu1 %v5200_v10  ;;  %v7772_v62 = vld [vmem:[#allocation20_spill] sm:$0xff]  ;;  %v7773_v10 = vld [vmem:[#allocation21_spill] sm:$0xff] }
 0x613   :  { %1683 = vmatpush1.msra.mxu0 %v5206_v27  ;;  %1754 = vmatpush1.msra.mxu1 %v5212_v4  ;;  %v7774_v27 = vld [vmem:[#allocation22_spill] sm:$0xff]  ;;  %v7775_v4 = vld [vmem:[#allocation23_spill] sm:$0xff] }
 0x614   :  { %1684 = vmatprep.subr.mxu0 %v5218_v8  ;;  %1755 = vmatprep.subr.mxu1 %v5224_v18  ;;  %v7776_v8 = vld [vmem:[#allocation24_spill] sm:$0xff]  ;;  %v7777_v18 = vmov 0.0  }
 0x615   :  { %1685 = vmatpush1.msra.mxu0 %v5230_v54  ;;  %1756 = vmatpush1.msra.mxu1 %v5236_v34  ;;  %v1909_v54 = vld [vmem:[%s7386_s4 + $0x1e8] sm:$0xff]  ;;  %v1911_v34 = vld [vmem:[%s7386_s4 + $0x1f8] sm:$0xff] }
 0x616   :  { %1686 = vmatprep.subr.mxu0 %v5242_v35  ;;  %1757 = vmatprep.subr.mxu1 %v5248_v37  ;;  %v7778_v37 = vld [vmem:[#allocation47_spill] sm:$0xff] }
 0x617   :  { %1687 = vmatpush1.msra.mxu0 %v7712_v24  ;;  %1758 = vmatpush1.msra.mxu1 %v7713_v25  ;;  %v7779_v25 = vld [vmem:[#allocation49_spill] sm:$0xff] }
 0x618   :  { %1688 = vmatprep.subr.mxu0 %v5266_v11  ;;  %1759 = vmatprep.subr.mxu1 %v5272_v5  ;;  %v7760_v5 = vld [vmem:[#allocation30_spill] sm:$0xff]  ;;  %v7761_v11 = vld [vmem:[#allocation28_spill] sm:$0xff] }
 0x619   :  { %1689 = vmatpush1.msra.mxu0 %v5278_v39  ;;  %1760 = vmatpush1.msra.mxu1 %v5284_v40 }
 0x61a   :  { %1690 = vmatprep.subr.mxu0 %v5368_v26  ;;  %1761 = vmatprep.subr.mxu1 %v5374_v28 }
 0x61b   :  { %1691 = vmatpush1.msra.mxu0 %v5380_v29  ;;  %1762 = vmatpush1.msra.mxu1 %v5386_v31 }
 0x61c   :  { %1692 = vmatprep.subr.mxu0 %v5392_v38  ;;  %1763 = vmatprep.subr.mxu1 %v5398_v41  ;;  %v7780_v38 = vld [vmem:[#allocation50_spill] sm:$0xff] }
 0x61d   :  { %1693 = vmatpush1.msra.mxu0 %v5404_v42  ;;  %1764 = vmatpush1.msra.mxu1 %v5410_v43  ;;  %v7781_v42 = vld [vmem:[#allocation48_spill] sm:$0xff] }
 0x61e   :  { %1694 = vmatprep.subr.mxu0 %v5416_v44  ;;  %1765 = vmatprep.subr.mxu1 %v5422_v46 }
 0x61f   :  { %1695 = vmatpush1.msra.mxu0 %v5428_v47  ;;  %1766 = vmatpush1.msra.mxu1 %v5434_v48 }
 0x620   :  { %1696 = vmatprep.subr.mxu0 %v5440_v49  ;;  %1767 = vmatprep.subr.mxu1 %v5446_v50 }
 0x621   :  { %1697 = vmatpush1.msra.mxu0 %v5452_v51  ;;  %1768 = vmatpush1.msra.mxu1 %v5458_v52 }
 0x622   :  { %1698 = vmatprep.subr.mxu0 %v5464_v53  ;;  %1769 = vmatprep.subr.mxu1 %v5470_v55 }
 0x623   :  { %1699 = vmatpush1.msra.mxu0 %v5476_v56  ;;  %1770 = vmatpush1.msra.mxu1 %v7760_v5  ;;  %v1898_v5 = vld [vmem:[%s7386_s4 + $0x190] sm:$0xff] }
 0x624   :  { %1700 = vmatprep.subr.mxu0 %v7761_v11  ;;  %1771 = vmatprep.subr.mxu1 %v7762_v9  ;;  %v1893_v11 = vld [vmem:[%s7386_s4 + $0x168] sm:$0xff]  ;;  %v1895_v9 = vld [vmem:[%s7386_s4 + $0x178] sm:$0xff] }
 0x625   :  { %1701 = vmatpush1.msra.mxu0 %v7763_v45  ;;  %1772 = vmatpush1.msra.mxu1 %v7764_v7  ;;  %v1892_v45 = vld [vmem:[%s7386_s4 + $0x160] sm:$0xff]  ;;  %v1894_v7 = vld [vmem:[%s7386_s4 + $0x170] sm:$0xff] }
 0x626   :  { %1702 = vmatprep.subr.mxu0 %v7765_v58  ;;  %1773 = vmatprep.subr.mxu1 %v7766_v1  ;;  %v1889_v58 = vld [vmem:[%s7386_s4 + $0x148] sm:$0xff]  ;;  %v1891_v1 = vld [vmem:[%s7386_s4 + $0x158] sm:$0xff] }
 0x627   :  { %1703 = vmatpush1.msra.mxu0 %v7767_v36  ;;  %1774 = vmatpush1.msra.mxu1 %v7768_v3  ;;  %v1888_v36 = vld [vmem:[%s7386_s4 + $0x140] sm:$0xff]  ;;  %v1890_v3 = vld [vmem:[%s7386_s4 + $0x150] sm:$0xff] }
 0x628   :  { %1704 = vmatprep.subr.mxu0 %v7769_v2  ;;  %1775 = vmatprep.subr.mxu1 %v7770_v0  ;;  %v1885_v2 = vld [vmem:[%s7386_s4 + $0x128] sm:$0xff]  ;;  %v1887_v0 = vld [vmem:[%s7386_s4 + $0x138] sm:$0xff] }
 0x629   :  { %1705 = vmatpush1.msra.mxu0 %v7771_v63  ;;  %1776 = vmatpush1.msra.mxu1 %v7772_v62  ;;  %v1884_v63 = vld [vmem:[%s7386_s4 + $0x120] sm:$0xff]  ;;  %v1886_v62 = vld [vmem:[%s7386_s4 + $0x130] sm:$0xff] }
 0x62a   :  { %1706 = vmatprep.subr.mxu0 %v7773_v10  ;;  %1777 = vmatprep.subr.mxu1 %v7774_v27  ;;  %v1881_v10 = vld [vmem:[%s7386_s4 + $0x108] sm:$0xff]  ;;  %v1883_v27 = vld [vmem:[%s7386_s4 + $0x118] sm:$0xff] }
 0x62b   :  { %1707 = vmatpush1.msra.mxu0 %v7775_v4  ;;  %1778 = vmatpush1.msra.mxu1 %v7776_v8  ;;  %v1880_v4 = vld [vmem:[%s7386_s4 + $0x100] sm:$0xff]  ;;  %v1882_v8 = vld [vmem:[%s7386_s4 + $0x110] sm:$0xff] }
 0x62c   :  { %1740 = vmatprep.mubr.f32.mxu0 %v7777_v18  ;;  %1811 = vmatprep.mubr.f32.mxu1 %v7777_v18 }
 0x62d   :  { %2006 = vmatprep.subr.mxu0 %v1909_v54  ;;  %2119 = vmatprep.subr.mxu1 %v1911_v34  ;;  %v1877_v54 = vld [vmem:[%s7386_s4 + $0xe8] sm:$0xff]  ;;  %v1879_v34 = vld [vmem:[%s7386_s4 + $0xf8] sm:$0xff] }
 0x6cc   :  { %v1563_v35 = vpop.f32.mrf.mxu0  ;;  %v1634_v28 = vpop.f32.mrf.mxu1 }
 0x6cd   :  { %v1639_v39 = vadd.f32 %v1563_v35, %v7778_v37  ;;  %v1641_v43 = vadd.f32 %v1634_v28, %v7781_v42  ;;  %v1876_v35 = vld [vmem:[%s7386_s4 + $0xe0] sm:$0xff]  ;;  %v1878_v37 = vld [vmem:[%s7386_s4 + $0xf0] sm:$0xff]  ;;  %v1871_v28 = vld [vmem:[%s7386_s4 + $0xb8] sm:$0xff] }
 0x6ce   :  { %v1565_v40 = vpop.f32.mrf.mxu0  ;;  %v1636_v31 = vpop.f32.mrf.mxu1  ;;  %v1864_v42 = vld [vmem:[%s7386_s4 + $0x80] sm:$0xff] }
 0x6cf   :  { %v3796_v24 = vmul.f32 -1.442695, %v1639_v39  ;;  %v1640_v26 = vadd.f32 %v1565_v40, %v7779_v25  ;;  %v1642_v41 = vadd.f32 %v1636_v31, %v7780_v38  ;;  %v1873_v39 = vld [vmem:[%s7386_s4 + $0xc8] sm:$0xff]  ;;  %v1875_v40 = vld [vmem:[%s7386_s4 + $0xd8] sm:$0xff]  ;;  %v1874_v25 = vld [vmem:[%s7386_s4 + $0xd0] sm:$0xff] }
 0x6d0   :  { %v1870_v31 = vld [vmem:[%s7386_s4 + $0xb0] sm:$0xff]  ;;  %v1865_v38 = vld [vmem:[%s7386_s4 + $0x88] sm:$0xff] }
 0x6d1   :  { %3977 = vpow2.f32 %v3796_v24  ;;  %v3797_v29 = vmul.f32 -1.442695, %v1640_v26  ;;  %v3798_v44 = vmul.f32 -1.442695, %v1642_v41  ;;  %v1872_v24 = vld [vmem:[%s7386_s4 + $0xc0] sm:$0xff]  ;;  %v1869_v26 = vld [vmem:[%s7386_s4 + $0xa8] sm:$0xff] }
 0x6d2   :  { %v1867_v41 = vld [vmem:[%s7386_s4 + $0x98] sm:$0xff] }
 0x6d3   :  { %3979 = vpow2.f32 %v3797_v29  ;;  %v1868_v29 = vld [vmem:[%s7386_s4 + $0xa0] sm:$0xff] }
 0x6d4   :  { %3981 = vtanh.f32 %v1641_v43  ;;  %v1866_v43 = vld [vmem:[%s7386_s4 + $0x90] sm:$0xff] }
 0x6d5   :  { %3983 = vpow2.f32 %v3798_v44  ;;  %v1861_v44 = vld [vmem:[%s7386_s4 + $0x68] sm:$0xff] }
 0x6de   :  { %v3978_v46 = vpop.eup %3977 }
 0x6df   :  { %v1646_v47 = vadd.f32 1.0, %v3978_v46  ;;  %v1863_v46 = vld [vmem:[%s7386_s4 + $0x78] sm:$0xff] }
 0x6e0   :  { %v3980_v48 = vpop.eup %3979 }
 0x6e1   :  { %3985 = vrcp.f32 %v1646_v47  ;;  %v1652_v49 = vadd.f32 1.0, %v3980_v48  ;;  %v3982_v50 = vpop.eup %3981  ;;  %v1860_v47 = vld [vmem:[%s7386_s4 + $0x60] sm:$0xff]  ;;  %v1862_v48 = vld [vmem:[%s7386_s4 + $0x70] sm:$0xff] }
 0x6e2   :  { %v3984_v51 = vpop.eup %3983 }
 0x6e3   :  { %3987 = vrcp.f32 %v1652_v49  ;;  %v1659_v56 = vadd.f32 1.0, %v3984_v51  ;;  %v1857_v49 = vld [vmem:[%s7386_s4 + $0x48] sm:$0xff]  ;;  %v1856_v51 = vld [vmem:[%s7386_s4 + $0x40] sm:$0xff] }
 0x6e5   :  { %3989 = vrcp.f32 %v1659_v56  ;;  %v1852_v56 = vld [vmem:[%s7386_s4 + $0x20] sm:$0xff] }
 0x6ee   :  { %v3986_v52 = vpop.eup %3985 }
 0x6ef   :  { %v1663_v53 = vmul.f32 %v3986_v52, %v3982_v50  ;;  %v1859_v50 = vld [vmem:[%s7386_s4 + $0x58] sm:$0xff]  ;;  %v1858_v52 = vld [vmem:[%s7386_s4 + $0x50] sm:$0xff] }
 0x6f0   :  { %v3988_v55 = vpop.eup %3987 }
 0x6f1   :  { %v1662_v60 = vmul.f32 %v3988_v55, %v5668_v61  ;;  %v1897_v61 = vld [vmem:[%s7386_s4 + $0x188] sm:$0xff]  ;;  %v1855_v55 = vld [vmem:[%s7386_s4 + $0x38] sm:$0xff] }
 0x6f2   :  { %v3990_v20 = vpop.eup %3989 }
 0x6f3   :  { %v5750_v33 = vadd.f32 %v1663_v53, %v1662_v60  ;;  %v1853_v53 = vld [vmem:[%s7386_s4 + $0x28] sm:$0xff]  ;;  %v1854_v60 = vld [vmem:[%s7386_s4 + $0x30] sm:$0xff] }
 0x6f5   :  { %3991 = vtanh.f32 %v5750_v33 }
 0x702   :  { %v3992_v21 = vpop.eup %3991 }
 0x703   :  { %v5753_v30 = vmul.f32 %v3992_v21, %v3990_v20  ;;  %v1849_v20 = vld [vmem:[%s7386_s4 + $0x8] sm:$0xff]  ;;  %v1851_v21 = vld [vmem:[%s7386_s4 + $0x18] sm:$0xff] }
 0x705   :  { %1741 = vmatmul.mubr.f32.vlgmr.msra.gmra.mxu0 %v5753_v30  ;;  %1812 = vmatmul.mubr.f32.vlgmr.msra.gmra.mxu1 %v5753_v30 }
 0x706   :  { %2007 = vmatpush1.msra.mxu0 %v1908_v17  ;;  %2120 = vmatpush1.msra.mxu1 %v1910_v15  ;;  %v1848_v17 = vld [vmem:[%s7386_s4] sm:$0xff]  ;;  %v1850_v15 = vld [vmem:[%s7386_s4 + $0x10] sm:$0xff] }
 0x707   :  { %2008 = vmatprep.subr.mxu0 %v1905_v16  ;;  %2121 = vmatprep.subr.mxu1 %v1907_v23  ;;  %v7782_v16 = vld [vmem:[#allocation55_spill] sm:$0xff]  ;;  %v7783_v23 = vld [vmem:[#allocation6_spill] sm:$0xff] }
 0x708   :  { %2009 = vmatpush1.msra.mxu0 %v1904_v19  ;;  %2122 = vmatpush1.msra.mxu1 %v1906_v22  ;;  %v7784_v19 = vld [vmem:[#allocation9_spill] sm:$0xff] }
 0x709   :  { %2010 = vmatprep.subr.mxu0 %v1901_v14  ;;  %2123 = vmatprep.subr.mxu1 %v1903_v13  ;;  %v7785_v22 = vld [vmem:[#allocation29_spill] sm:$0xff] }
 0x70a   :  { %2011 = vmatpush1.msra.mxu0 %v1900_v12  ;;  %2124 = vmatpush1.msra.mxu1 %v1902_v32  ;;  %v7786_v14 = vld [vmem:[#allocation25_spill] sm:$0xff]  ;;  %v5993_v12 = vld [vmem:[%s7387_s5 + $0x1f0] sm:$0xff] }
 0x70b   :  { %2012 = vmatprep.subr.mxu0 %v1897_v61  ;;  %2125 = vmatprep.subr.mxu1 %v1899_v6  ;;  %v5976_v13 = vld [vmem:[%s7387_s5 + $0x1e8] sm:$0xff]  ;;  %v6005_v61 = vld [vmem:[%s7387_s5 + $0x1d8] sm:$0xff]  ;;  %v6012_v6 = vld [vmem:[%s7387_s5 + $0x1c0] sm:$0xff] }
 0x70c   :  { %2013 = vmatpush1.msra.mxu0 %v1896_v57  ;;  %2126 = vmatpush1.msra.mxu1 %v1898_v5  ;;  %7787 = vst [vmem:[#allocation26_spill] sm:$0xff] %v5976_v13  ;;  %v6000_v32 = vld [vmem:[%s7387_s5 + $0x1c8] sm:$0xff]  ;;  %v6017_v57 = vld [vmem:[%s7387_s5 + $0x1d0] sm:$0xff] }
 0x70d   :  { %2014 = vmatprep.subr.mxu0 %v1893_v11  ;;  %2127 = vmatprep.subr.mxu1 %v1895_v9  ;;  %v6024_v5 = vld [vmem:[%s7387_s5 + $0x1a8] sm:$0xff]  ;;  %v6029_v11 = vld [vmem:[%s7387_s5 + $0x1b8] sm:$0xff]  ;;  %v6036_v9 = vld [vmem:[%s7387_s5 + $0x1a0] sm:$0xff] }
 0x70e   :  { %2015 = vmatpush1.msra.mxu0 %v1892_v45  ;;  %2128 = vmatpush1.msra.mxu1 %v1894_v7  ;;  %v6041_v45 = vld [vmem:[%s7387_s5 + $0x1b0] sm:$0xff]  ;;  %v6048_v7 = vld [vmem:[%s7387_s5 + $0x188] sm:$0xff] }
 0x70f   :  { %2016 = vmatprep.subr.mxu0 %v1889_v58  ;;  %2129 = vmatprep.subr.mxu1 %v1891_v1  ;;  %v6053_v58 = vld [vmem:[%s7387_s5 + $0x198] sm:$0xff]  ;;  %v6060_v1 = vld [vmem:[%s7387_s5 + $0x180] sm:$0xff] }
 0x710   :  { %2017 = vmatpush1.msra.mxu0 %v1888_v36  ;;  %2130 = vmatpush1.msra.mxu1 %v1890_v3  ;;  %v6065_v36 = vld [vmem:[%s7387_s5 + $0x190] sm:$0xff]  ;;  %v6072_v3 = vld [vmem:[%s7387_s5 + $0x168] sm:$0xff] }
 0x711   :  { %2018 = vmatprep.subr.mxu0 %v1885_v2  ;;  %2131 = vmatprep.subr.mxu1 %v1887_v0  ;;  %v6077_v2 = vld [vmem:[%s7387_s5 + $0x178] sm:$0xff]  ;;  %v6084_v0 = vld [vmem:[%s7387_s5 + $0x160] sm:$0xff] }
 0x712   :  { %2019 = vmatpush1.msra.mxu0 %v1884_v63  ;;  %2132 = vmatpush1.msra.mxu1 %v1886_v62  ;;  %v6089_v63 = vld [vmem:[%s7387_s5 + $0x170] sm:$0xff]  ;;  %v6096_v62 = vld [vmem:[%s7387_s5 + $0x148] sm:$0xff] }
 0x713   :  { %2020 = vmatprep.subr.mxu0 %v1881_v10  ;;  %2133 = vmatprep.subr.mxu1 %v1883_v27  ;;  %v6101_v10 = vld [vmem:[%s7387_s5 + $0x158] sm:$0xff]  ;;  %v6108_v27 = vld [vmem:[%s7387_s5 + $0x140] sm:$0xff] }
 0x714   :  { %2021 = vmatpush1.msra.mxu0 %v1880_v4  ;;  %2134 = vmatpush1.msra.mxu1 %v1882_v8  ;;  %v6113_v4 = vld [vmem:[%s7387_s5 + $0x150] sm:$0xff]  ;;  %v6120_v8 = vld [vmem:[%s7387_s5 + $0x128] sm:$0xff] }
 0x715   :  { %2022 = vmatprep.subr.mxu0 %v1877_v54  ;;  %2135 = vmatprep.subr.mxu1 %v1879_v34  ;;  %v6125_v54 = vld [vmem:[%s7387_s5 + $0x138] sm:$0xff]  ;;  %v6132_v34 = vld [vmem:[%s7387_s5 + $0x120] sm:$0xff] }
 0x716   :  { %2023 = vmatpush1.msra.mxu0 %v1876_v35  ;;  %2136 = vmatpush1.msra.mxu1 %v1878_v37  ;;  %v6137_v35 = vld [vmem:[%s7387_s5 + $0x130] sm:$0xff]  ;;  %v6144_v37 = vld [vmem:[%s7387_s5 + $0x108] sm:$0xff] }
 0x717   :  { %2024 = vmatprep.subr.mxu0 %v1873_v39  ;;  %2137 = vmatprep.subr.mxu1 %v1875_v40  ;;  %v6149_v39 = vld [vmem:[%s7387_s5 + $0x118] sm:$0xff]  ;;  %v6156_v40 = vld [vmem:[%s7387_s5 + $0x100] sm:$0xff] }
 0x718   :  { %2025 = vmatpush1.msra.mxu0 %v1872_v24  ;;  %2138 = vmatpush1.msra.mxu1 %v1874_v25  ;;  %v6161_v24 = vld [vmem:[%s7387_s5 + $0x110] sm:$0xff]  ;;  %v6168_v25 = vld [vmem:[%s7387_s5 + $0xe8] sm:$0xff] }
 0x719   :  { %2026 = vmatprep.subr.mxu0 %v1869_v26  ;;  %2139 = vmatprep.subr.mxu1 %v1871_v28  ;;  %v6173_v26 = vld [vmem:[%s7387_s5 + $0xf8] sm:$0xff]  ;;  %v6180_v28 = vld [vmem:[%s7387_s5 + $0xe0] sm:$0xff] }
 0x71a   :  { %2027 = vmatpush1.msra.mxu0 %v1868_v29  ;;  %2140 = vmatpush1.msra.mxu1 %v1870_v31  ;;  %v6185_v29 = vld [vmem:[%s7387_s5 + $0xf0] sm:$0xff]  ;;  %v6192_v31 = vld [vmem:[%s7387_s5 + $0xc8] sm:$0xff] }
 0x71b   :  { %2028 = vmatprep.subr.mxu0 %v1865_v38  ;;  %2141 = vmatprep.subr.mxu1 %v1867_v41  ;;  %v6197_v38 = vld [vmem:[%s7387_s5 + $0xd8] sm:$0xff]  ;;  %v6204_v41 = vld [vmem:[%s7387_s5 + $0xc0] sm:$0xff] }
 0x71c   :  { %2029 = vmatpush1.msra.mxu0 %v1864_v42  ;;  %2142 = vmatpush1.msra.mxu1 %v1866_v43  ;;  %v6209_v42 = vld [vmem:[%s7387_s5 + $0xd0] sm:$0xff]  ;;  %v6216_v43 = vld [vmem:[%s7387_s5 + $0xa8] sm:$0xff] }
 0x71d   :  { %2030 = vmatprep.subr.mxu0 %v1861_v44  ;;  %2143 = vmatprep.subr.mxu1 %v1863_v46  ;;  %v6221_v44 = vld [vmem:[%s7387_s5 + $0xb8] sm:$0xff]  ;;  %v6228_v46 = vld [vmem:[%s7387_s5 + $0xa0] sm:$0xff] }
 0x71e   :  { %2031 = vmatpush1.msra.mxu0 %v1860_v47  ;;  %2144 = vmatpush1.msra.mxu1 %v1862_v48  ;;  %v6233_v47 = vld [vmem:[%s7387_s5 + $0xb0] sm:$0xff]  ;;  %v6240_v48 = vld [vmem:[%s7387_s5 + $0x88] sm:$0xff] }
 0x71f   :  { %2032 = vmatprep.subr.mxu0 %v1857_v49  ;;  %2145 = vmatprep.subr.mxu1 %v1859_v50  ;;  %7789 = vst [vmem:[#allocation33_spill] sm:$0xff] %v6233_v47  ;;  %7790 = vst [vmem:[#allocation34_spill] sm:$0xff] %v6240_v48  ;;  %v6245_v49 = vld [vmem:[%s7387_s5 + $0x98] sm:$0xff]  ;;  %v6252_v50 = vld [vmem:[%s7387_s5 + $0x80] sm:$0xff] }
 0x720   :  { %2033 = vmatpush1.msra.mxu0 %v1856_v51  ;;  %2146 = vmatpush1.msra.mxu1 %v1858_v52  ;;  %7791 = vst [vmem:[#allocation32_spill] sm:$0xff] %v6245_v49  ;;  %7792 = vst [vmem:[#allocation35_spill] sm:$0xff] %v6252_v50  ;;  %v6257_v51 = vld [vmem:[%s7387_s5 + $0x90] sm:$0xff]  ;;  %v6264_v52 = vld [vmem:[%s7387_s5 + $0x68] sm:$0xff] }
 0x721   :  { %2034 = vmatprep.subr.mxu0 %v1853_v53  ;;  %2147 = vmatprep.subr.mxu1 %v1855_v55  ;;  %7793 = vst [vmem:[#allocation37_spill] sm:$0xff] %v6257_v51  ;;  %7794 = vst [vmem:[#allocation38_spill] sm:$0xff] %v6264_v52  ;;  %v6269_v53 = vld [vmem:[%s7387_s5 + $0x78] sm:$0xff]  ;;  %v6276_v55 = vld [vmem:[%s7387_s5 + $0x60] sm:$0xff] }
 0x722   :  { %2035 = vmatpush1.msra.mxu0 %v1852_v56  ;;  %2148 = vmatpush1.msra.mxu1 %v1854_v60  ;;  %7795 = vst [vmem:[#allocation36_spill] sm:$0xff] %v6269_v53  ;;  %7796 = vst [vmem:[#allocation4_spill] sm:$0xff] %v6276_v55  ;;  %v6281_v56 = vld [vmem:[%s7387_s5 + $0x70] sm:$0xff]  ;;  %v6288_v60 = vld [vmem:[%s7387_s5 + $0x48] sm:$0xff] }
 0x723   :  { %2036 = vmatprep.subr.mxu0 %v1849_v20  ;;  %2149 = vmatprep.subr.mxu1 %v1851_v21  ;;  %7797 = vst [vmem:[#allocation5_spill] sm:$0xff] %v6281_v56  ;;  %7798 = vst [vmem:[#allocation39_spill] sm:$0xff] %v6288_v60  ;;  %v6293_v20 = vld [vmem:[%s7387_s5 + $0x58] sm:$0xff]  ;;  %v6300_v21 = vld [vmem:[%s7387_s5 + $0x40] sm:$0xff] }
 0x724   :  { %2037 = vmatpush1.msra.mxu0 %v1848_v17  ;;  %2070 = vmatprep.mubr.f32.mxu0 %v7777_v18  ;;  %7799 = vst [vmem:[#allocation41_spill] sm:$0xff] %v6293_v20  ;;  %7800 = vst [vmem:[#allocation42_spill] sm:$0xff] %v6300_v21  ;;  %v6305_v17 = vld [vmem:[%s7387_s5 + $0x50] sm:$0xff] }
 0x725   :  { %2150 = vmatpush1.msra.mxu1 %v1850_v15  ;;  %2183 = vmatprep.mubr.f32.mxu1 %v7777_v18  ;;  %7801 = vst [vmem:[#allocation40_spill] sm:$0xff] %v6305_v17  ;;  %v6312_v15 = vld [vmem:[%s7387_s5 + $0x28] sm:$0xff] }
 0x726   :  { %2071 = vmatmul.mubr.f32.vlgmr.msra.gmra.mxu0 %v7782_v16  ;;  %2184 = vmatmul.mubr.f32.vlgmr.msra.gmra.mxu1 %v7782_v16  ;;  %7802 = vst [vmem:[#allocation7_spill] sm:$0xff] %v6312_v15  ;;  %v6317_v16 = vld [vmem:[%s7387_s5 + $0x38] sm:$0xff] }
 0x727   :  { %2076 = vmatprep.mubr.f32.mxu0 %v7777_v18  ;;  %2189 = vmatprep.mubr.f32.mxu1 %v7777_v18  ;;  %7803 = vst [vmem:[#allocation8_spill] sm:$0xff] %v6317_v16 }
 0x728   :  { %2268 = vmatprep.subr.mxu0 %v5976_v13 }
 0x72a   :  { %2077 = vmatmul.mubr.f32.gmra.mxu0 %v7783_v23  ;;  %2190 = vmatmul.mubr.f32.gmra.mxu1 %v7783_v23  ;;  %v6324_v23 = vld [vmem:[%s7387_s5 + $0x20] sm:$0xff] }
 0x72b   :  { %2082 = vmatprep.mubr.f32.mxu0 %v7777_v18  ;;  %2195 = vmatprep.mubr.f32.mxu1 %v7777_v18  ;;  %7804 = vst [vmem:[#allocation43_spill] sm:$0xff] %v6324_v23 }
 0x72e   :  { %2083 = vmatmul.mubr.f32.gmra.mxu0 %v7784_v19  ;;  %2196 = vmatmul.mubr.f32.gmra.mxu1 %v7784_v19  ;;  %v6329_v19 = vld [vmem:[%s7387_s5 + $0x30] sm:$0xff] }
 0x72f   :  { %2088 = vmatprep.mubr.f32.mxu0 %v7777_v18  ;;  %2201 = vmatprep.mubr.f32.mxu1 %v7777_v18  ;;  %7805 = vst [vmem:[#allocation45_spill] sm:$0xff] %v6329_v19 }
 0x732   :  { %2089 = vmatmul.mubr.f32.gmra.mxu0 %v7785_v22  ;;  %2202 = vmatmul.mubr.f32.gmra.mxu1 %v7785_v22  ;;  %v6336_v22 = vld [vmem:[%s7387_s5 + $0x8] sm:$0xff] }
 0x733   :  { %2094 = vmatprep.mubr.f32.mxu0 %v7777_v18  ;;  %2207 = vmatprep.mubr.f32.mxu1 %v7777_v18  ;;  %7806 = vst [vmem:[#allocation46_spill] sm:$0xff] %v6336_v22 }
 0x736   :  { %2095 = vmatmul.mubr.f32.gmra.mxu0 %v7786_v14  ;;  %2208 = vmatmul.mubr.f32.gmra.mxu1 %v7786_v14  ;;  %v6341_v14 = vld [vmem:[%s7387_s5 + $0x18] sm:$0xff] }
 0x737   :  { %2100 = vmatprep.mubr.f32.mxu0 %v7777_v18  ;;  %2213 = vmatprep.mubr.f32.mxu1 %v7777_v18  ;;  %7807 = vst [vmem:[#allocation44_spill] sm:$0xff] %v6341_v14 }
 0x73a   :  { %2101 = vmatmul.mubr.f32.gmra.mxu0 %v5671_v59  ;;  %2214 = vmatmul.mubr.f32.gmra.mxu1 %v5671_v59  ;;  %v5981_v59 = vld [vmem:[%s7387_s5 + $0x1f8] sm:$0xff] }
 0x73b   :  { %2106 = vmatprep.mubr.f32.mxu0 %v7777_v18  ;;  %2219 = vmatprep.mubr.f32.mxu1 %v7777_v18  ;;  %7788 = vst [vmem:[#allocation31_spill] sm:$0xff] %v5981_v59 }
 0x73c   :  { %2339 = vmatprep.subr.mxu1 %v5981_v59 }
 0x73d   :  { %2340 = vmatpush1.msra.mxu1 %v5993_v12 }
 0x73e   :  { %2107 = vmatmul.mubr.f32.gmra.mxu0 %v5753_v30  ;;  %2220 = vmatmul.mubr.f32.gmra.mxu1 %v5753_v30  ;;  %v5988_v30 = vld [vmem:[%s7387_s5 + $0x1e0] sm:$0xff] }
 0x73f   :  { %2112 = vmatprep.mubr.f32.mxu0 %v7777_v18  ;;  %2225 = vmatprep.mubr.f32.mxu1 %v7777_v18 }
 0x740   :  { %2269 = vmatpush1.msra.mxu0 %v5988_v30  ;;  %2341 = vmatprep.subr.mxu1 %v6005_v61 }
 0x741   :  { %2270 = vmatprep.subr.mxu0 %v6000_v32  ;;  %2342 = vmatpush1.msra.mxu1 %v6017_v57 }
 0x742   :  { %2271 = vmatpush1.msra.mxu0 %v6012_v6  ;;  %2343 = vmatprep.subr.mxu1 %v6029_v11 }
 0x743   :  { %2272 = vmatprep.subr.mxu0 %v6024_v5  ;;  %2344 = vmatpush1.msra.mxu1 %v6041_v45 }
 0x744   :  { %2273 = vmatpush1.msra.mxu0 %v6036_v9  ;;  %2345 = vmatprep.subr.mxu1 %v6053_v58 }
 0x745   :  { %2274 = vmatprep.subr.mxu0 %v6048_v7  ;;  %2346 = vmatpush1.msra.mxu1 %v6065_v36 }
 0x746   :  { %2275 = vmatpush1.msra.mxu0 %v6060_v1  ;;  %2347 = vmatprep.subr.mxu1 %v6077_v2 }
 0x747   :  { %2276 = vmatprep.subr.mxu0 %v6072_v3  ;;  %2348 = vmatpush1.msra.mxu1 %v6089_v63 }
 0x748   :  { %2277 = vmatpush1.msra.mxu0 %v6084_v0  ;;  %2349 = vmatprep.subr.mxu1 %v6101_v10 }
 0x749   :  { %2278 = vmatprep.subr.mxu0 %v6096_v62  ;;  %2350 = vmatpush1.msra.mxu1 %v6113_v4 }
 0x74a   :  { %2279 = vmatpush1.msra.mxu0 %v6108_v27  ;;  %2351 = vmatprep.subr.mxu1 %v6125_v54 }
 0x74b   :  { %2280 = vmatprep.subr.mxu0 %v6120_v8  ;;  %2352 = vmatpush1.msra.mxu1 %v6137_v35 }
 0x74c   :  { %2281 = vmatpush1.msra.mxu0 %v6132_v34  ;;  %2353 = vmatprep.subr.mxu1 %v6149_v39 }
 0x74d   :  { %2282 = vmatprep.subr.mxu0 %v6144_v37  ;;  %2354 = vmatpush1.msra.mxu1 %v6161_v24 }
 0x74e   :  { %2283 = vmatpush1.msra.mxu0 %v6156_v40  ;;  %2355 = vmatprep.subr.mxu1 %v6173_v26 }
 0x74f   :  { %2284 = vmatprep.subr.mxu0 %v6168_v25  ;;  %2356 = vmatpush1.msra.mxu1 %v6185_v29 }
 0x750   :  { %2285 = vmatpush1.msra.mxu0 %v6180_v28  ;;  %2357 = vmatprep.subr.mxu1 %v6197_v38 }
 0x751   :  { %2286 = vmatprep.subr.mxu0 %v6192_v31  ;;  %2358 = vmatpush1.msra.mxu1 %v6209_v42 }
 0x752   :  { %2287 = vmatpush1.msra.mxu0 %v6204_v41  ;;  %2359 = vmatprep.subr.mxu1 %v6221_v44 }
 0x753   :  { %2288 = vmatprep.subr.mxu0 %v6216_v43  ;;  %2360 = vmatpush1.msra.mxu1 %v6233_v47 }
 0x754   :  { %2289 = vmatpush1.msra.mxu0 %v6228_v46  ;;  %2361 = vmatprep.subr.mxu1 %v6245_v49 }
 0x755   :  { %2290 = vmatprep.subr.mxu0 %v6240_v48  ;;  %2362 = vmatpush1.msra.mxu1 %v6257_v51 }
 0x756   :  { %2291 = vmatpush1.msra.mxu0 %v6252_v50  ;;  %2363 = vmatprep.subr.mxu1 %v6269_v53  ;;  %v7812_v53 = vld [vmem:[#allocation54_spill] sm:$0xff] }
 0x757   :  { %2292 = vmatprep.subr.mxu0 %v6264_v52  ;;  %2364 = vmatpush1.msra.mxu1 %v6281_v56  ;;  %v7813_v52 = vld [vmem:[#allocation52_spill] sm:$0xff] }
 0x758   :  { %2293 = vmatpush1.msra.mxu0 %v6276_v55  ;;  %2365 = vmatprep.subr.mxu1 %v6293_v20  ;;  %v7811_v20 = vld [vmem:[#allocation53_spill] sm:$0xff] }
 0x759   :  { %2294 = vmatprep.subr.mxu0 %v6288_v60  ;;  %2366 = vmatpush1.msra.mxu1 %v6305_v17 }
 0x75a   :  { %2295 = vmatpush1.msra.mxu0 %v6300_v21  ;;  %2367 = vmatprep.subr.mxu1 %v6317_v16  ;;  %v6346_v16 = vld [vmem:[%s7387_s5] sm:$0xff] }
 0x75b   :  { %2296 = vmatprep.subr.mxu0 %v6312_v15  ;;  %2368 = vmatpush1.msra.mxu1 %v6329_v19  ;;  %7808 = vst [vmem:[#allocation30_spill] sm:$0xff] %v6346_v16  ;;  %v6353_v19 = vld [vmem:[%s7387_s5 + $0x10] sm:$0xff]  ;;  %v7810_v15 = vld [vmem:[#allocation51_spill] sm:$0xff] }
 0x75c   :  { %2297 = vmatpush1.msra.mxu0 %v6324_v23  ;;  %2369 = vmatprep.subr.mxu1 %v6341_v14  ;;  %7809 = vst [vmem:[#allocation28_spill] sm:$0xff] %v6353_v19 }
 0x75d   :  { %2298 = vmatprep.subr.mxu0 %v6336_v22  ;;  %2370 = vmatpush1.msra.mxu1 %v6353_v19 }
 0x75e   :  { %2299 = vmatpush1.msra.mxu0 %v6346_v16  ;;  %2513 = vmatprep.subr.mxu1 %v5981_v59 }
 0x75f   :  { %2442 = vmatprep.subr.mxu0 %v5976_v13 }
 0x7c5   :  { %v1742_v23 = vpop.f32.mrf.mxu0  ;;  %v1813_v60 = vpop.f32.mrf.mxu1 }
 0x7c6   :  { %v1818_v17 = vadd.f32 %v1742_v23, %v7810_v15  ;;  %v1820_v19 = vadd.f32 %v1813_v60, %v7813_v52  ;;  %v7818_v60 = vld [vmem:[#allocation4_spill] sm:$0xff] }
 0x7c7   :  { %v1744_v21 = vpop.f32.mrf.mxu0  ;;  %v1815_v55 = vpop.f32.mrf.mxu1 }
 0x7c8   :  { %v3799_v22 = vmul.f32 -1.442695, %v1818_v17  ;;  %v1819_v14 = vadd.f32 %v1744_v21, %v7811_v20  ;;  %v1821_v16 = vadd.f32 %v1815_v55, %v7812_v53 }
 0x7ca   :  { %3993 = vpow2.f32 %v3799_v22  ;;  %v3800_v56 = vmul.f32 -1.442695, %v1819_v14  ;;  %v3801_v51 = vmul.f32 -1.442695, %v1821_v16  ;;  %v7819_v16 = vld [vmem:[#allocation5_spill] sm:$0xff] }
 0x7cc   :  { %3995 = vpow2.f32 %v3800_v56 }
 0x7cd   :  { %3997 = vtanh.f32 %v1820_v19  ;;  %v7820_v19 = vld [vmem:[#allocation39_spill] sm:$0xff] }
 0x7ce   :  { %3999 = vpow2.f32 %v3801_v51  ;;  %v7817_v51 = vld [vmem:[#allocation36_spill] sm:$0xff] }
 0x7d7   :  { %v3994_v13 = vpop.eup %3993 }
 0x7d8   :  { %v1825_v50 = vadd.f32 1.0, %v3994_v13 }
 0x7d9   :  { %v3996_v59 = vpop.eup %3995 }
 0x7da   :  { %4001 = vrcp.f32 %v1825_v50  ;;  %v1831_v15 = vadd.f32 1.0, %v3996_v59  ;;  %v3998_v17 = vpop.eup %3997  ;;  %v7815_v59 = vld [vmem:[#allocation37_spill] sm:$0xff]  ;;  %v7816_v50 = vld [vmem:[#allocation38_spill] sm:$0xff] }
 0x7db   :  { %v4000_v20 = vpop.eup %3999 }
 0x7dc   :  { %4003 = vrcp.f32 %v1831_v15  ;;  %v1838_v56 = vadd.f32 1.0, %v4000_v20  ;;  %v7821_v15 = vld [vmem:[#allocation41_spill] sm:$0xff]  ;;  %v7823_v20 = vld [vmem:[#allocation40_spill] sm:$0xff] }
 0x7de   :  { %4005 = vrcp.f32 %v1838_v56  ;;  %v7827_v56 = vld [vmem:[#allocation45_spill] sm:$0xff] }
 0x7e7   :  { %v4002_v21 = vpop.eup %4001 }
 0x7e8   :  { %v1842_v23 = vmul.f32 %v4002_v21, %v3998_v17  ;;  %v7822_v17 = vld [vmem:[#allocation42_spill] sm:$0xff]  ;;  %v7824_v21 = vld [vmem:[#allocation7_spill] sm:$0xff] }
 0x7e9   :  { %v4004_v22 = vpop.eup %4003 }
 0x7ea   :  { %v1841_v14 = vmul.f32 %v4004_v22, %v5750_v33  ;;  %v7814_v33 = vld [vmem:[#allocation35_spill] sm:$0xff] }
 0x7eb   :  { %v4006_v52 = vpop.eup %4005  ;;  %v7826_v22 = vld [vmem:[#allocation43_spill] sm:$0xff] }
 0x7ec   :  { %v1843_v53 = vadd.f32 %v1842_v23, %v1841_v14  ;;  %v7825_v23 = vld [vmem:[#allocation8_spill] sm:$0xff]  ;;  %v7828_v14 = vld [vmem:[#allocation46_spill] sm:$0xff] }
 0x7ee   :  { %4007 = vtanh.f32 %v1843_v53  ;;  %v7829_v53 = vld [vmem:[#allocation44_spill] sm:$0xff] }
 0x7fb   :  { %v4008_v55 = vpop.eup %4007 }
 0x7fc   :  { %v1845_v13 = vmul.f32 %v4008_v55, %v4006_v52  ;;  %v7830_v52 = vld [vmem:[#allocation30_spill] sm:$0xff]  ;;  %v7831_v55 = vld [vmem:[#allocation28_spill] sm:$0xff] }
 0x7fe   :  { %2113 = vmatmul.mubr.f32.gmra.mxu0 %v1845_v13  ;;  %2226 = vmatmul.mubr.f32.gmra.mxu1 %v1845_v13  ;;  %v7832_v13 = vld [vmem:[#allocation26_spill] sm:$0xff] }
 0x7ff   :  { %2332 = vmatprep.mubr.f32.mxu0 %v7777_v18  ;;  %2403 = vmatprep.mubr.f32.mxu1 %v7777_v18 }
 0x802   :  { %2333 = vmatmul.mubr.f32.vlgmr.msra.gmra.mxu0 %v7777_v18  ;;  %2404 = vmatmul.mubr.f32.vlgmr.msra.gmra.mxu1 %v7777_v18 }
 0x803   :  { %2443 = vmatpush1.msra.mxu0 %v5988_v30  ;;  %2514 = vmatpush1.msra.mxu1 %v5993_v12 }
 0x804   :  { %2444 = vmatprep.subr.mxu0 %v6000_v32  ;;  %2515 = vmatprep.subr.mxu1 %v6005_v61 }
 0x805   :  { %2445 = vmatpush1.msra.mxu0 %v6012_v6  ;;  %2516 = vmatpush1.msra.mxu1 %v6017_v57 }
 0x806   :  { %2446 = vmatprep.subr.mxu0 %v6024_v5  ;;  %2517 = vmatprep.subr.mxu1 %v6029_v11 }
 0x807   :  { %2447 = vmatpush1.msra.mxu0 %v6036_v9  ;;  %2518 = vmatpush1.msra.mxu1 %v6041_v45 }
 0x808   :  { %2448 = vmatprep.subr.mxu0 %v6048_v7  ;;  %2519 = vmatprep.subr.mxu1 %v6053_v58 }
 0x809   :  { %2449 = vmatpush1.msra.mxu0 %v6060_v1  ;;  %2520 = vmatpush1.msra.mxu1 %v6065_v36 }
 0x80a   :  { %2450 = vmatprep.subr.mxu0 %v6072_v3  ;;  %2521 = vmatprep.subr.mxu1 %v6077_v2 }
 0x80b   :  { %2451 = vmatpush1.msra.mxu0 %v6084_v0  ;;  %2522 = vmatpush1.msra.mxu1 %v6089_v63 }
 0x80c   :  { %2452 = vmatprep.subr.mxu0 %v6096_v62  ;;  %2523 = vmatprep.subr.mxu1 %v6101_v10 }
 0x80d   :  { %2453 = vmatpush1.msra.mxu0 %v6108_v27  ;;  %2524 = vmatpush1.msra.mxu1 %v6113_v4 }
 0x80e   :  { %2454 = vmatprep.subr.mxu0 %v6120_v8  ;;  %2525 = vmatprep.subr.mxu1 %v6125_v54 }
 0x80f   :  { %2455 = vmatpush1.msra.mxu0 %v6132_v34  ;;  %2526 = vmatpush1.msra.mxu1 %v6137_v35 }
 0x810   :  { %2456 = vmatprep.subr.mxu0 %v6144_v37  ;;  %2527 = vmatprep.subr.mxu1 %v6149_v39 }
 0x811   :  { %2457 = vmatpush1.msra.mxu0 %v6156_v40  ;;  %2528 = vmatpush1.msra.mxu1 %v6161_v24 }
 0x812   :  { %2458 = vmatprep.subr.mxu0 %v6168_v25  ;;  %2529 = vmatprep.subr.mxu1 %v6173_v26 }
 0x813   :  { %2459 = vmatpush1.msra.mxu0 %v6180_v28  ;;  %2530 = vmatpush1.msra.mxu1 %v6185_v29 }
 0x814   :  { %2460 = vmatprep.subr.mxu0 %v6192_v31  ;;  %2531 = vmatprep.subr.mxu1 %v6197_v38 }
 0x815   :  { %2461 = vmatpush1.msra.mxu0 %v6204_v41  ;;  %2532 = vmatpush1.msra.mxu1 %v6209_v42 }
 0x816   :  { %2462 = vmatprep.subr.mxu0 %v6216_v43  ;;  %2533 = vmatprep.subr.mxu1 %v6221_v44 }
 0x817   :  { %2463 = vmatpush1.msra.mxu0 %v6228_v46  ;;  %2534 = vmatpush1.msra.mxu1 %v6233_v47 }
 0x818   :  { %2464 = vmatprep.subr.mxu0 %v6240_v48  ;;  %2535 = vmatprep.subr.mxu1 %v6245_v49 }
 0x819   :  { %2465 = vmatpush1.msra.mxu0 %v7814_v33  ;;  %2536 = vmatpush1.msra.mxu1 %v7815_v59 }
 0x81a   :  { %2466 = vmatprep.subr.mxu0 %v7816_v50  ;;  %2537 = vmatprep.subr.mxu1 %v7817_v51 }
 0x81b   :  { %2467 = vmatpush1.msra.mxu0 %v7818_v60  ;;  %2538 = vmatpush1.msra.mxu1 %v7819_v16 }
 0x81c   :  { %2468 = vmatprep.subr.mxu0 %v7820_v19  ;;  %2539 = vmatprep.subr.mxu1 %v7821_v15 }
 0x81d   :  { %2469 = vmatpush1.msra.mxu0 %v7822_v17  ;;  %2540 = vmatpush1.msra.mxu1 %v7823_v20 }
 0x81e   :  { %2470 = vmatprep.subr.mxu0 %v7824_v21  ;;  %2541 = vmatprep.subr.mxu1 %v7825_v23  ;;  %v7833_v21 = vld [vmem:[#allocation31_spill] sm:$0xff]  ;;  %v2072_v23 = vpop.f32.mrf.mxu0 }
 0x81f   :  { %2471 = vmatpush1.msra.mxu0 %v7826_v22  ;;  %2542 = vmatpush1.msra.mxu1 %v7827_v56  ;;  %v2185_v22 = vpop.f32.mrf.mxu1 }
 0x820   :  { %2472 = vmatprep.subr.mxu0 %v7828_v14  ;;  %2543 = vmatprep.subr.mxu1 %v7829_v53  ;;  %v2074_v20 = vpop.f32.mrf.mxu0 }
 0x821   :  { %2473 = vmatpush1.msra.mxu0 %v7830_v52  ;;  %2506 = vmatprep.mubr.f32.mxu0 %v7777_v18  ;;  %v2187_v56 = vpop.f32.mrf.mxu1 }
 0x822   :  { %2544 = vmatpush1.msra.mxu1 %v7831_v55  ;;  %2577 = vmatprep.mubr.f32.mxu1 %v7777_v18  ;;  %v6434_v17 = vpop.f32.mrf.mxu0 }
 0x823   :  { %2616 = vmatprep.subr.mxu0 %v7832_v13  ;;  %2687 = vmatprep.subr.mxu1 %v7833_v21  ;;  %7834 = vst [vmem:[#allocation10_spill] sm:$0xff] %v6434_v17  ;;  %v6436_v14 = vpop.f32.mrf.mxu1 }
 0x824   :  { %7835 = vst [vmem:[#allocation11_spill] sm:$0xff] %v6436_v14  ;;  %v6438_v53 = vpop.f32.mrf.mxu0 }
 0x825   :  { %7836 = vst [vmem:[#allocation12_spill] sm:$0xff] %v6438_v53  ;;  %v6440_v52 = vpop.f32.mrf.mxu1 }
 0x826   :  { %7837 = vst [vmem:[#allocation13_spill] sm:$0xff] %v6440_v52  ;;  %v6442_v15 = vpop.f32.mrf.mxu0 }
 0x827   :  { %7838 = vst [vmem:[#allocation14_spill] sm:$0xff] %v6442_v15  ;;  %v6444_v55 = vpop.f32.mrf.mxu1 }
 0x828   :  { %7839 = vst [vmem:[#allocation15_spill] sm:$0xff] %v6444_v55  ;;  %v6446_v18 = vpop.f32.mrf.mxu0 }
 0x829   :  { %7840 = vst [vmem:[#allocation16_spill] sm:$0xff] %v6446_v18  ;;  %v6448_v13 = vpop.f32.mrf.mxu1 }
 0x82a   :  { %7841 = vst [vmem:[#allocation17_spill] sm:$0xff] %v6448_v13  ;;  %v6450_v21 = vpop.f32.mrf.mxu0 }
 0x82b   :  { %7842 = vst [vmem:[#allocation18_spill] sm:$0xff] %v6450_v21  ;;  %v6452_v19 = vpop.f32.mrf.mxu1 }
 0x82c   :  { %7843 = vst [vmem:[#allocation19_spill] sm:$0xff] %v6452_v19  ;;  %v6454_v16 = vpop.f32.mrf.mxu0 }
 0x82d   :  { %7844 = vst [vmem:[#allocation20_spill] sm:$0xff] %v6454_v16  ;;  %v6456_v17 = vpop.f32.mrf.mxu1 }
 0x82e   :  { %7845 = vst [vmem:[#allocation21_spill] sm:$0xff] %v6456_v17  ;;  %v6458_v14 = vpop.f32.mrf.mxu0 }
 0x82f   :  { %7846 = vst [vmem:[#allocation22_spill] sm:$0xff] %v6458_v14  ;;  %v6460_v53 = vpop.f32.mrf.mxu1 }
 0x830   :  { %7847 = vst [vmem:[#allocation23_spill] sm:$0xff] %v6460_v53  ;;  %v6462_v52 = vpop.f32.mrf.mxu0  ;;  %v1976_v53 = vld [vmem:[%s7388_s6] sm:$0xf] }
 0x831   :  { %7848 = vst [vmem:[#allocation24_spill] sm:$0xff] %v6462_v52  ;;  %v6464_v15 = vpop.f32.mrf.mxu1  ;;  %v7857_v52 = vld [vmem:[#allocation27_spill] sm:$0xff] }
 0x832   :  { %7849 = vst [vmem:[#allocation47_spill] sm:$0xff] %v6464_v15  ;;  %v6466_v55 = vpop.f32.mrf.mxu0  ;;  %v7858_v15 = vsub.s32 0, %v7857_v52 }
 0x833   :  { %7850 = vst [vmem:[#allocation49_spill] sm:$0xff] %v6466_v55  ;;  %v6468_v18 = vpop.f32.mrf.mxu1 }
 0x834   :  { %7851 = vst [vmem:[#allocation50_spill] sm:$0xff] %v6468_v18  ;;  %v6470_v13 = vpop.f32.mrf.mxu0  ;;  %v6485_v17 = vrot.slane %v1976_v53, %v7858_v15 }
 0x835   :  { %7852 = vst [vmem:[#allocation48_spill] sm:$0xff] %v6470_v13  ;;  %v6472_v21 = vpop.f32.mrf.mxu1 }
 0x836   :  { %7853 = vst [vmem:[#allocation55_spill] sm:$0xff] %v6472_v21  ;;  %v6474_v19 = vpop.f32.mrf.mxu0  ;;  %7859 = vst [vmem:[#allocation25_spill] sm:$0xff] %v6485_v17  ;;  %v7862_v21 = vsub.s32 1, %v7857_v52  ;;  %v2073_v60 = vadd.f32 %v2072_v23, %v6485_v17 }
 0x837   :  { %7854 = vst [vmem:[#allocation6_spill] sm:$0xff] %v6474_v19  ;;  %v6476_v16 = vpop.f32.mrf.mxu1 }
 0x838   :  { %7855 = vst [vmem:[#allocation9_spill] sm:$0xff] %v6476_v16  ;;  %v6481_v14 = vpop.f32.mrf.mxu0  ;;  %v6493_v13 = vrot.slane %v1976_v53, %v7862_v21  ;;  %v7866_v21 = vsub.s32 3, %v7857_v52 }
 0x839   :  { %7856 = vst [vmem:[#allocation29_spill] sm:$0xff] %v6481_v14  ;;  %v6487_v55 = vpop.f32.mrf.mxu1 }
 0x83a   :  { %7860 = vst [vmem:[#allocation51_spill] sm:$0xff] %v6487_v55  ;;  %v2075_v14 = vadd.f32 %v2074_v20, %v6493_v13  ;;  %v6505_v48 = vrot.slane %v1976_v53, %v7866_v21 }
 0x83c   :  { %7867 = vst [vmem:[#allocation56_spill] sm:$0xff] %v6505_v48  ;;  %v2188_v23 = vadd.f32 %v2187_v56, %v6505_v48 }
 0x8be   :  { %v6489_v18 = vpop.f32.mrf.mxu0  ;;  %v6495_v19 = vpop.f32.mrf.mxu1 }
 0x8bf   :  { %7861 = vst [vmem:[#allocation53_spill] sm:$0xff] %v6489_v18  ;;  %7863 = vst [vmem:[#allocation54_spill] sm:$0xff] %v6495_v19 }
 0x8c0   :  { %v6497_v16 = vpop.f32.mrf.mxu0  ;;  %v6501_v50 = vpop.f32.mrf.mxu1 }
 0x8c1   :  { %7864 = vst [vmem:[#allocation52_spill] sm:$0xff] %v6497_v16  ;;  %7865 = vst [vmem:[#allocation27_spill] sm:$0xff] %v6501_v50  ;;  %v7868_v16 = vsub.s32 2, %v7857_v52 }
 0x8c2   :  { %v2334_v51 = vpop.f32.mrf.mxu0  ;;  %v2405_v18 = vpop.f32.mrf.mxu1 }
 0x8c3   :  { %v2410_v15 = vadd.f32 %v2334_v51, %v2073_v60  ;;  %v6510_v20 = vrot.slane %v1976_v53, %v7868_v16 }
 0x8c4   :  { %v2336_v59 = vpop.f32.mrf.mxu0  ;;  %v2407_v19 = vpop.f32.mrf.mxu1 }
 0x8c5   :  { %v3802_v55 = vmul.f32 -1.442695, %v2410_v15  ;;  %v2411_v33 = vadd.f32 %v2336_v59, %v2075_v14  ;;  %v2413_v50 = vadd.f32 %v2407_v19, %v2188_v23  ;;  %v2186_v51 = vadd.f32 %v2185_v22, %v6510_v20  ;;  %v7870_v23 = vld [vmem:[#allocation32_spill] sm:$0xff] }
 0x8c7   :  { %4009 = vpow2.f32 %v3802_v55  ;;  %v3803_v49 = vmul.f32 -1.442695, %v2411_v33  ;;  %v3804_v60 = vmul.f32 -1.442695, %v2413_v50  ;;  %v2412_v14 = vadd.f32 %v2405_v18, %v2186_v51  ;;  %v7871_v51 = vld [vmem:[#allocation35_spill] sm:$0xff] }
 0x8c9   :  { %4011 = vpow2.f32 %v3803_v49 }
 0x8ca   :  { %4013 = vpow2.f32 %v3804_v60  ;;  %v7872_v60 = vld [vmem:[#allocation37_spill] sm:$0xff] }
 0x8d4   :  { %v4010_v59 = vpop.eup %4009 }
 0x8d5   :  { %v2417_v55 = vadd.f32 1.0, %v4010_v59  ;;  %v7873_v59 = vld [vmem:[#allocation38_spill] sm:$0xff] }
 0x8d6   :  { %v4012_v33 = vpop.eup %4011 }
 0x8d7   :  { %4015 = vrcp.f32 %v2417_v55  ;;  %v2423_v15 = vadd.f32 1.0, %v4012_v33  ;;  %v4014_v49 = vpop.eup %4013  ;;  %v7875_v55 = vld [vmem:[#allocation4_spill] sm:$0xff]  ;;  %v7876_v33 = vld [vmem:[#allocation5_spill] sm:$0xff] }
 0x8d8   :  { %4017 = vtanh.f32 %v2412_v14  ;;  %v2430_v52 = vadd.f32 1.0, %v4014_v49  ;;  %v7874_v14 = vld [vmem:[#allocation36_spill] sm:$0xff]  ;;  %v7878_v49 = vld [vmem:[#allocation41_spill] sm:$0xff] }
 0x8d9   :  { %4019 = vrcp.f32 %v2423_v15  ;;  %v7877_v15 = vld [vmem:[#allocation39_spill] sm:$0xff] }
 0x8da   :  { %4021 = vrcp.f32 %v2430_v52  ;;  %v7881_v52 = vld [vmem:[#allocation7_spill] sm:$0xff] }
 0x8e4   :  { %v4016_v21 = vpop.eup %4015 }
 0x8e5   :  { %v4018_v56 = vpop.eup %4017 }
 0x8e6   :  { %v4020_v48 = vpop.eup %4019  ;;  %v2434_v53 = vmul.f32 %v4018_v56, %v4016_v21  ;;  %v7879_v21 = vld [vmem:[#allocation42_spill] sm:$0xff]  ;;  %v7880_v56 = vld [vmem:[#allocation40_spill] sm:$0xff] }
 0x8e7   :  { %v2433_v16 = vmul.f32 0.0, %v4020_v48  ;;  %v4022_v18 = vpop.eup %4021  ;;  %v7869_v48 = vld [vmem:[#allocation34_spill] sm:$0xff] }
 0x8e9   :  { %v6513_v19 = vadd.f32 %v2434_v53, %v2433_v16  ;;  %v7882_v16 = vld [vmem:[#allocation8_spill] sm:$0xff]  ;;  %v7883_v53 = vld [vmem:[#allocation43_spill] sm:$0xff] }
 0x8eb   :  { %4023 = vtanh.f32 %v6513_v19 }
 0x8f8   :  { %v4024_v50 = vpop.eup %4023 }
 0x8f9   :  { %v2437_v22 = vmul.f32 %v4024_v50, %v4022_v18  ;;  %v7884_v18 = vld [vmem:[#allocation45_spill] sm:$0xff]  ;;  %v7885_v50 = vld [vmem:[#allocation46_spill] sm:$0xff] }
 0x8fb   :  { %2507 = vmatmul.mubr.f32.vlgmr.msra.gmra.mxu0 %v2437_v22  ;;  %2578 = vmatmul.mubr.f32.vlgmr.msra.gmra.mxu1 %v2437_v22  ;;  %v7886_v22 = vld [vmem:[#allocation44_spill] sm:$0xff] }
 0x8fc   :  { %2617 = vmatpush1.msra.mxu0 %v5988_v30  ;;  %2688 = vmatpush1.msra.mxu1 %v5993_v12 }
 0x8fd   :  { %2618 = vmatprep.subr.mxu0 %v6000_v32  ;;  %2689 = vmatprep.subr.mxu1 %v6005_v61 }
 0x8fe   :  { %2619 = vmatpush1.msra.mxu0 %v6012_v6  ;;  %2690 = vmatpush1.msra.mxu1 %v6017_v57 }
 0x8ff   :  { %2620 = vmatprep.subr.mxu0 %v6024_v5  ;;  %2691 = vmatprep.subr.mxu1 %v6029_v11 }
 0x900   :  { %2621 = vmatpush1.msra.mxu0 %v6036_v9  ;;  %2692 = vmatpush1.msra.mxu1 %v6041_v45 }
 0x901   :  { %2622 = vmatprep.subr.mxu0 %v6048_v7  ;;  %2693 = vmatprep.subr.mxu1 %v6053_v58 }
 0x902   :  { %2623 = vmatpush1.msra.mxu0 %v6060_v1  ;;  %2694 = vmatpush1.msra.mxu1 %v6065_v36 }
 0x903   :  { %2624 = vmatprep.subr.mxu0 %v6072_v3  ;;  %2695 = vmatprep.subr.mxu1 %v6077_v2 }
 0x904   :  { %2625 = vmatpush1.msra.mxu0 %v6084_v0  ;;  %2696 = vmatpush1.msra.mxu1 %v6089_v63 }
 0x905   :  { %2626 = vmatprep.subr.mxu0 %v6096_v62  ;;  %2697 = vmatprep.subr.mxu1 %v6101_v10 }
 0x906   :  { %2627 = vmatpush1.msra.mxu0 %v6108_v27  ;;  %2698 = vmatpush1.msra.mxu1 %v6113_v4 }
 0x907   :  { %2628 = vmatprep.subr.mxu0 %v6120_v8  ;;  %2699 = vmatprep.subr.mxu1 %v6125_v54 }
 0x908   :  { %2629 = vmatpush1.msra.mxu0 %v6132_v34  ;;  %2700 = vmatpush1.msra.mxu1 %v6137_v35 }
 0x909   :  { %2630 = vmatprep.subr.mxu0 %v6144_v37  ;;  %2701 = vmatprep.subr.mxu1 %v6149_v39 }
 0x90a   :  { %2631 = vmatpush1.msra.mxu0 %v6156_v40  ;;  %2702 = vmatpush1.msra.mxu1 %v6161_v24 }
 0x90b   :  { %2632 = vmatprep.subr.mxu0 %v6168_v25  ;;  %2703 = vmatprep.subr.mxu1 %v6173_v26 }
 0x90c   :  { %2633 = vmatpush1.msra.mxu0 %v6180_v28  ;;  %2704 = vmatpush1.msra.mxu1 %v6185_v29 }
 0x90d   :  { %2634 = vmatprep.subr.mxu0 %v6192_v31  ;;  %2705 = vmatprep.subr.mxu1 %v6197_v38 }
 0x90e   :  { %2635 = vmatpush1.msra.mxu0 %v6204_v41  ;;  %2706 = vmatpush1.msra.mxu1 %v6209_v42 }
 0x90f   :  { %2636 = vmatprep.subr.mxu0 %v6216_v43  ;;  %2707 = vmatprep.subr.mxu1 %v6221_v44 }
 0x910   :  { %2637 = vmatpush1.msra.mxu0 %v6228_v46  ;;  %2708 = vmatpush1.msra.mxu1 %v6233_v47 }
 0x911   :  { %2638 = vmatprep.subr.mxu0 %v7869_v48  ;;  %2709 = vmatprep.subr.mxu1 %v7870_v23  ;;  %v7896_v23 = vld [vmem:[#allocation11_spill] sm:$0xff] }
 0x912   :  { %2639 = vmatpush1.msra.mxu0 %v7871_v51  ;;  %2710 = vmatpush1.msra.mxu1 %v7872_v60  ;;  %v7894_v60 = vld [vmem:[#allocation56_spill] sm:$0xff] }
 0x913   :  { %2640 = vmatprep.subr.mxu0 %v7873_v59  ;;  %2711 = vmatprep.subr.mxu1 %v7874_v14 }
 0x914   :  { %2641 = vmatpush1.msra.mxu0 %v7875_v55  ;;  %2712 = vmatpush1.msra.mxu1 %v7876_v33  ;;  %v7887_v33 = vld [vmem:[#allocation30_spill] sm:$0xff] }
 0x915   :  { %2642 = vmatprep.subr.mxu0 %v7877_v15  ;;  %2713 = vmatprep.subr.mxu1 %v7878_v49  ;;  %v7888_v15 = vmov 0.0   ;;  %v7889_v49 = vld [vmem:[#allocation28_spill] sm:$0xff] }
 0x916   :  { %2643 = vmatpush1.msra.mxu0 %v7879_v21  ;;  %2714 = vmatpush1.msra.mxu1 %v7880_v56  ;;  %v7890_v56 = vld [vmem:[#allocation26_spill] sm:$0xff] }
 0x917   :  { %2644 = vmatprep.subr.mxu0 %v7881_v52  ;;  %2715 = vmatprep.subr.mxu1 %v7882_v16  ;;  %v7891_v52 = vld [vmem:[#allocation31_spill] sm:$0xff] }
 0x918   :  { %2645 = vmatpush1.msra.mxu0 %v7883_v53  ;;  %2716 = vmatpush1.msra.mxu1 %v7884_v18  ;;  %v7892_v53 = vld [vmem:[#allocation10_spill] sm:$0xff] }
 0x919   :  { %2646 = vmatprep.subr.mxu0 %v7885_v50  ;;  %2717 = vmatprep.subr.mxu1 %v7886_v22  ;;  %v2079_v16 = vadd.f32 %v7892_v53, %v6485_v17  ;;  %v7893_v50 = vld [vmem:[#allocation12_spill] sm:$0xff]  ;;  %v2192_v53 = vadd.f32 %v7896_v23, %v6510_v20 }
 0x91a   :  { %2647 = vmatpush1.msra.mxu0 %v7887_v33  ;;  %2680 = vmatprep.mubr.f32.mxu0 %v7888_v15  ;;  %v2081_v21 = vadd.f32 %v7893_v50, %v6493_v13 }
 0x91b   :  { %2718 = vmatpush1.msra.mxu1 %v7889_v49  ;;  %2751 = vmatprep.mubr.f32.mxu1 %v7888_v15 }
 0x91c   :  { %2790 = vmatprep.subr.mxu0 %v7890_v56  ;;  %2861 = vmatprep.subr.mxu1 %v7891_v52  ;;  %v7895_v56 = vld [vmem:[#allocation13_spill] sm:$0xff] }
 0x91d   :  { %v2194_v51 = vadd.f32 %v7895_v56, %v7894_v60 }
 0x9bb   :  { %v2508_v18 = vpop.f32.mrf.mxu0  ;;  %v2579_v59 = vpop.f32.mrf.mxu1 }
 0x9bc   :  { %v2584_v22 = vadd.f32 %v2508_v18, %v2079_v16  ;;  %v2586_v17 = vadd.f32 %v2579_v59, %v2192_v53  ;;  %v7911_v59 = vld [vmem:[#allocation8_spill] sm:$0xff]  ;;  %v7914_v53 = vld [vmem:[#allocation46_spill] sm:$0xff] }
 0x9bd   :  { %v2510_v55 = vpop.f32.mrf.mxu0  ;;  %v2581_v15 = vpop.f32.mrf.mxu1 }
 0x9be   :  { %v3805_v33 = vmul.f32 -1.442695, %v2584_v22  ;;  %v2585_v14 = vadd.f32 %v2510_v55, %v2081_v21  ;;  %v2587_v52 = vadd.f32 %v2581_v15, %v2194_v51  ;;  %v7913_v22 = vld [vmem:[#allocation45_spill] sm:$0xff] }
 0x9c0   :  { %4025 = vpow2.f32 %v3805_v33  ;;  %v3806_v49 = vmul.f32 -1.442695, %v2585_v14  ;;  %v3807_v48 = vmul.f32 -1.442695, %v2587_v52  ;;  %v7912_v52 = vld [vmem:[#allocation43_spill] sm:$0xff] }
 0x9c2   :  { %4027 = vpow2.f32 %v3806_v49 }
 0x9c3   :  { %4029 = vtanh.f32 %v2586_v17 }
 0x9c4   :  { %4031 = vpow2.f32 %v3807_v48  ;;  %v7910_v48 = vld [vmem:[#allocation7_spill] sm:$0xff] }
 0x9cd   :  { %v4026_v47 = vpop.eup %4025 }
 0x9ce   :  { %v2591_v50 = vadd.f32 1.0, %v4026_v47 }
 0x9cf   :  { %v4028_v16 = vpop.eup %4027 }
 0x9d0   :  { %4033 = vrcp.f32 %v2591_v50  ;;  %v2597_v55 = vadd.f32 1.0, %v4028_v16  ;;  %v4030_v14 = vpop.eup %4029  ;;  %v7915_v50 = vld [vmem:[#allocation44_spill] sm:$0xff]  ;;  %v7916_v16 = vld [vmem:[#allocation30_spill] sm:$0xff] }
 0x9d1   :  { %v4032_v33 = vpop.eup %4031 }
 0x9d2   :  { %4035 = vrcp.f32 %v2597_v55  ;;  %v2604_v56 = vadd.f32 1.0, %v4032_v33  ;;  %v7917_v55 = vmov 0.0   ;;  %v7919_v33 = vld [vmem:[#allocation26_spill] sm:$0xff] }
 0x9d4   :  { %4037 = vrcp.f32 %v2604_v56 }
 0x9dd   :  { %v4034_v49 = vpop.eup %4033 }
 0x9de   :  { %v2608_v21 = vmul.f32 %v4034_v49, %v4030_v14  ;;  %v7918_v14 = vld [vmem:[#allocation28_spill] sm:$0xff]  ;;  %v7920_v49 = vld [vmem:[#allocation31_spill] sm:$0xff] }
 0x9df   :  { %v4036_v18 = vpop.eup %4035 }
 0x9e0   :  { %v2607_v51 = vmul.f32 %v4036_v18, %v6513_v19  ;;  %v7909_v19 = vld [vmem:[#allocation40_spill] sm:$0xff]  ;;  %v7922_v18 = vld [vmem:[#allocation14_spill] sm:$0xff] }
 0x9e1   :  { %v4038_v47 = vpop.eup %4037 }
 0x9e2   :  { %v6591_v15 = vadd.f32 %v2608_v21, %v2607_v51  ;;  %v7921_v21 = vld [vmem:[#allocation25_spill] sm:$0xff] }
 0x9e3   :  { %v2085_v56 = vadd.f32 %v7922_v18, %v7921_v21 }
 0x9e4   :  { %4039 = vtanh.f32 %v6591_v15 }
 0x9f1   :  { %v4040_v17 = vpop.eup %4039 }
 0x9f2   :  { %v2611_v23 = vmul.f32 %v4040_v17, %v4038_v47  ;;  %v7923_v47 = vld [vmem:[#allocation16_spill] sm:$0xff] }
 0x9f3   :  { %v2087_v17 = vadd.f32 %v7923_v47, %v6493_v13 }
 0x9f4   :  { %2681 = vmatmul.mubr.f32.vlgmr.msra.gmra.mxu0 %v2611_v23  ;;  %2752 = vmatmul.mubr.f32.vlgmr.msra.gmra.mxu1 %v2611_v23 }
 0x9f5   :  { %2791 = vmatpush1.msra.mxu0 %v5988_v30  ;;  %2862 = vmatpush1.msra.mxu1 %v5993_v12  ;;  %v7897_v30 = vld [vmem:[#allocation33_spill] sm:$0xff]  ;;  %v7898_v12 = vld [vmem:[#allocation34_spill] sm:$0xff] }
 0x9f6   :  { %2792 = vmatprep.subr.mxu0 %v6000_v32  ;;  %2863 = vmatprep.subr.mxu1 %v6005_v61  ;;  %v7899_v32 = vld [vmem:[#allocation32_spill] sm:$0xff]  ;;  %v7900_v61 = vld [vmem:[#allocation35_spill] sm:$0xff] }
 0x9f7   :  { %2793 = vmatpush1.msra.mxu0 %v6012_v6  ;;  %2864 = vmatpush1.msra.mxu1 %v6017_v57  ;;  %v7901_v6 = vld [vmem:[#allocation37_spill] sm:$0xff]  ;;  %v7902_v57 = vld [vmem:[#allocation38_spill] sm:$0xff] }
 0x9f8   :  { %2794 = vmatprep.subr.mxu0 %v6024_v5  ;;  %2865 = vmatprep.subr.mxu1 %v6029_v11  ;;  %v7903_v5 = vld [vmem:[#allocation36_spill] sm:$0xff] }
 0x9f9   :  { %2795 = vmatpush1.msra.mxu0 %v6036_v9  ;;  %2866 = vmatpush1.msra.mxu1 %v6041_v45  ;;  %v7904_v11 = vld [vmem:[#allocation4_spill] sm:$0xff]  ;;  %v7905_v9 = vld [vmem:[#allocation5_spill] sm:$0xff]  ;;  %v7906_v45 = vld [vmem:[#allocation39_spill] sm:$0xff] }
 0x9fa   :  { %2796 = vmatprep.subr.mxu0 %v6048_v7  ;;  %2867 = vmatprep.subr.mxu1 %v6053_v58  ;;  %v7907_v7 = vld [vmem:[#allocation41_spill] sm:$0xff]  ;;  %v7908_v58 = vld [vmem:[#allocation42_spill] sm:$0xff] }
 0x9fb   :  { %2797 = vmatpush1.msra.mxu0 %v6060_v1  ;;  %2868 = vmatpush1.msra.mxu1 %v6065_v36 }
 0x9fc   :  { %2798 = vmatprep.subr.mxu0 %v6072_v3  ;;  %2869 = vmatprep.subr.mxu1 %v6077_v2 }
 0x9fd   :  { %2799 = vmatpush1.msra.mxu0 %v6084_v0  ;;  %2870 = vmatpush1.msra.mxu1 %v6089_v63 }
 0x9fe   :  { %2800 = vmatprep.subr.mxu0 %v6096_v62  ;;  %2871 = vmatprep.subr.mxu1 %v6101_v10 }
 0x9ff   :  { %2801 = vmatpush1.msra.mxu0 %v6108_v27  ;;  %2872 = vmatpush1.msra.mxu1 %v6113_v4 }
 0xa00   :  { %2802 = vmatprep.subr.mxu0 %v6120_v8  ;;  %2873 = vmatprep.subr.mxu1 %v6125_v54 }
 0xa01   :  { %2803 = vmatpush1.msra.mxu0 %v6132_v34  ;;  %2874 = vmatpush1.msra.mxu1 %v6137_v35 }
 0xa02   :  { %2804 = vmatprep.subr.mxu0 %v6144_v37  ;;  %2875 = vmatprep.subr.mxu1 %v6149_v39 }
 0xa03   :  { %2805 = vmatpush1.msra.mxu0 %v6156_v40  ;;  %2876 = vmatpush1.msra.mxu1 %v6161_v24 }
 0xa04   :  { %2806 = vmatprep.subr.mxu0 %v6168_v25  ;;  %2877 = vmatprep.subr.mxu1 %v6173_v26 }
 0xa05   :  { %2807 = vmatpush1.msra.mxu0 %v6180_v28  ;;  %2878 = vmatpush1.msra.mxu1 %v6185_v29 }
 0xa06   :  { %2808 = vmatprep.subr.mxu0 %v6192_v31  ;;  %2879 = vmatprep.subr.mxu1 %v6197_v38 }
 0xa07   :  { %2809 = vmatpush1.msra.mxu0 %v6204_v41  ;;  %2880 = vmatpush1.msra.mxu1 %v6209_v42 }
 0xa08   :  { %2810 = vmatprep.subr.mxu0 %v6216_v43  ;;  %2881 = vmatprep.subr.mxu1 %v6221_v44 }
 0xa09   :  { %2811 = vmatpush1.msra.mxu0 %v6228_v46  ;;  %2882 = vmatpush1.msra.mxu1 %v7897_v30 }
 0xa0a   :  { %2812 = vmatprep.subr.mxu0 %v7898_v12  ;;  %2883 = vmatprep.subr.mxu1 %v7899_v32 }
 0xa0b   :  { %2813 = vmatpush1.msra.mxu0 %v7900_v61  ;;  %2884 = vmatpush1.msra.mxu1 %v7901_v6 }
 0xa0c   :  { %2814 = vmatprep.subr.mxu0 %v7902_v57  ;;  %2885 = vmatprep.subr.mxu1 %v7903_v5 }
 0xa0d   :  { %2815 = vmatpush1.msra.mxu0 %v7904_v11  ;;  %2886 = vmatpush1.msra.mxu1 %v7905_v9 }
 0xa0e   :  { %2816 = vmatprep.subr.mxu0 %v7906_v45  ;;  %2887 = vmatprep.subr.mxu1 %v7907_v7 }
 0xa0f   :  { %2817 = vmatpush1.msra.mxu0 %v7908_v58  ;;  %2888 = vmatpush1.msra.mxu1 %v7909_v19 }
 0xa10   :  { %2818 = vmatprep.subr.mxu0 %v7910_v48  ;;  %2889 = vmatprep.subr.mxu1 %v7911_v59  ;;  %v7925_v59 = vld [vmem:[#allocation15_spill] sm:$0xff] }
 0xa11   :  { %2819 = vmatpush1.msra.mxu0 %v7912_v52  ;;  %2890 = vmatpush1.msra.mxu1 %v7913_v22  ;;  %v2198_v18 = vadd.f32 %v7925_v59, %v6510_v20 }
 0xa12   :  { %2820 = vmatprep.subr.mxu0 %v7914_v53  ;;  %2891 = vmatprep.subr.mxu1 %v7915_v50 }
 0xa13   :  { %2821 = vmatpush1.msra.mxu0 %v7916_v16  ;;  %2854 = vmatprep.mubr.f32.mxu0 %v7917_v55 }
 0xa14   :  { %2892 = vmatpush1.msra.mxu1 %v7918_v14  ;;  %2925 = vmatprep.mubr.f32.mxu1 %v7917_v55 }
 0xa15   :  { %2964 = vmatprep.subr.mxu0 %v7919_v33  ;;  %3035 = vmatprep.subr.mxu1 %v7920_v49  ;;  %v7924_v33 = vld [vmem:[#allocation17_spill] sm:$0xff] }
 0xa16   :  { %v2200_v52 = vadd.f32 %v7924_v33, %v7894_v60  ;;  %v6693_v33 = vld [vmem:[%s7387_s5 + $0x1d8] sm:$0xff] }
 0xab4   :  { %v2682_v51 = vpop.f32.mrf.mxu0  ;;  %v2753_v22 = vpop.f32.mrf.mxu1 }
 0xab5   :  { %v2758_v23 = vadd.f32 %v2682_v51, %v2085_v56  ;;  %v2760_v21 = vadd.f32 %v2753_v22, %v2198_v18  ;;  %v6705_v18 = vld [vmem:[%s7387_s5 + $0x1d0] sm:$0xff] }
 0xab6   :  { %v2684_v50 = vpop.f32.mrf.mxu0  ;;  %v2755_v55 = vpop.f32.mrf.mxu1 }
 0xab7   :  { %v3808_v16 = vmul.f32 -1.442695, %v2758_v23  ;;  %v2759_v53 = vadd.f32 %v2684_v50, %v2087_v17  ;;  %v2761_v49 = vadd.f32 %v2755_v55, %v2200_v52 }
 0xab9   :  { %4041 = vpow2.f32 %v3808_v16  ;;  %v3809_v14 = vmul.f32 -1.442695, %v2759_v53  ;;  %v3810_v48 = vmul.f32 -1.442695, %v2761_v49  ;;  %v6699_v49 = vld [vmem:[%s7387_s5 + $0x1c0] sm:$0xff] }
 0xabb   :  { %4043 = vpow2.f32 %v3809_v14 }
 0xabc   :  { %4045 = vtanh.f32 %v2760_v21  ;;  %v6687_v21 = vld [vmem:[%s7387_s5 + $0x1c8] sm:$0xff] }
 0xabd   :  { %4047 = vpow2.f32 %v3810_v48  ;;  %v6675_v48 = vld [vmem:[%s7387_s5 + $0x1e0] sm:$0xff] }
 0xac6   :  { %v4042_v19 = vpop.eup %4041 }
 0xac7   :  { %v2765_v47 = vadd.f32 1.0, %v4042_v19 }
 0xac8   :  { %v4044_v56 = vpop.eup %4043 }
 0xac9   :  { %4049 = vrcp.f32 %v2765_v47  ;;  %v2771_v50 = vadd.f32 1.0, %v4044_v56  ;;  %v4046_v53 = vpop.eup %4045  ;;  %v6711_v47 = vld [vmem:[%s7387_s5 + $0x1a8] sm:$0xff]  ;;  %v6717_v56 = vld [vmem:[%s7387_s5 + $0x1b8] sm:$0xff] }
 0xaca   :  { %v4048_v16 = vpop.eup %4047 }
 0xacb   :  { %4051 = vrcp.f32 %v2771_v50  ;;  %v2778_v23 = vadd.f32 1.0, %v4048_v16  ;;  %v6723_v50 = vld [vmem:[%s7387_s5 + $0x1a0] sm:$0xff]  ;;  %v6735_v16 = vld [vmem:[%s7387_s5 + $0x188] sm:$0xff] }
 0xacd   :  { %4053 = vrcp.f32 %v2778_v23 }
 0xad6   :  { %v4050_v14 = vpop.eup %4049 }
 0xad7   :  { %v2782_v51 = vmul.f32 %v4050_v14, %v4046_v53  ;;  %v6729_v53 = vld [vmem:[%s7387_s5 + $0x1b0] sm:$0xff]  ;;  %v6741_v14 = vld [vmem:[%s7387_s5 + $0x198] sm:$0xff] }
 0xad8   :  { %v4052_v17 = vpop.eup %4051 }
 0xad9   :  { %v2781_v52 = vmul.f32 %v4052_v17, %v6591_v15  ;;  %v6681_v15 = vld [vmem:[%s7387_s5 + $0x1f0] sm:$0xff] }
 0xada   :  { %v4054_v19 = vpop.eup %4053 }
 0xadb   :  { %v6669_v55 = vadd.f32 %v2782_v51, %v2781_v52 }
 0xadd   :  { %4055 = vtanh.f32 %v6669_v55 }
 0xaea   :  { %v4056_v59 = vpop.eup %4055 }
 0xaeb   :  { %v2785_v22 = vmul.f32 %v4056_v59, %v4054_v19 }
 0xaed   :  { %2855 = vmatmul.mubr.f32.vlgmr.msra.gmra.mxu0 %v2785_v22  ;;  %2926 = vmatmul.mubr.f32.vlgmr.msra.gmra.mxu1 %v2785_v22  ;;  %v6841_v22 = vld [vmem:[%s7387_s5 + $0x190] sm:$0xff] }
 0xaee   :  { %2965 = vmatpush1.msra.mxu0 %v6675_v48  ;;  %3036 = vmatpush1.msra.mxu1 %v6681_v15 }
 0xaef   :  { %2966 = vmatprep.subr.mxu0 %v6687_v21  ;;  %3037 = vmatprep.subr.mxu1 %v6693_v33 }
 0xaf0   :  { %2967 = vmatpush1.msra.mxu0 %v6699_v49  ;;  %3038 = vmatpush1.msra.mxu1 %v6705_v18 }
 0xaf1   :  { %2968 = vmatprep.subr.mxu0 %v6711_v47  ;;  %3039 = vmatprep.subr.mxu1 %v6717_v56 }
 0xaf2   :  { %2969 = vmatpush1.msra.mxu0 %v6723_v50  ;;  %3040 = vmatpush1.msra.mxu1 %v6729_v53 }
 0xaf3   :  { %2970 = vmatprep.subr.mxu0 %v6735_v16  ;;  %3041 = vmatprep.subr.mxu1 %v6741_v14 }
 0xaf4   :  { %2971 = vmatpush1.msra.mxu0 %v6060_v1  ;;  %3042 = vmatpush1.msra.mxu1 %v6065_v36  ;;  %v7926_v1 = vld [vmem:[#allocation40_spill] sm:$0xff]  ;;  %v7927_v36 = vld [vmem:[#allocation7_spill] sm:$0xff] }
 0xaf5   :  { %2972 = vmatprep.subr.mxu0 %v6072_v3  ;;  %3043 = vmatprep.subr.mxu1 %v6077_v2  ;;  %v7928_v3 = vld [vmem:[#allocation8_spill] sm:$0xff]  ;;  %v7929_v2 = vld [vmem:[#allocation43_spill] sm:$0xff] }
 0xaf6   :  { %2973 = vmatpush1.msra.mxu0 %v6084_v0  ;;  %3044 = vmatpush1.msra.mxu1 %v6089_v63  ;;  %v7930_v0 = vld [vmem:[#allocation45_spill] sm:$0xff]  ;;  %v7931_v63 = vld [vmem:[#allocation46_spill] sm:$0xff] }
 0xaf7   :  { %2974 = vmatprep.subr.mxu0 %v6096_v62  ;;  %3045 = vmatprep.subr.mxu1 %v6101_v10  ;;  %v7932_v62 = vld [vmem:[#allocation44_spill] sm:$0xff]  ;;  %v7933_v10 = vld [vmem:[#allocation30_spill] sm:$0xff] }
 0xaf8   :  { %2975 = vmatpush1.msra.mxu0 %v6108_v27  ;;  %3046 = vmatpush1.msra.mxu1 %v6113_v4  ;;  %v7934_v27 = vmov 0.0   ;;  %v7935_v4 = vld [vmem:[#allocation28_spill] sm:$0xff] }
 0xaf9   :  { %2976 = vmatprep.subr.mxu0 %v6120_v8  ;;  %3047 = vmatprep.subr.mxu1 %v6125_v54  ;;  %v6799_v8 = vld [vmem:[%s7387_s5 + $0x1e8] sm:$0xff]  ;;  %v6805_v54 = vld [vmem:[%s7387_s5 + $0x1f8] sm:$0xff] }
 0xafa   :  { %2977 = vmatpush1.msra.mxu0 %v6132_v34  ;;  %3048 = vmatpush1.msra.mxu1 %v6137_v35  ;;  %7936 = vst [vmem:[#allocation10_spill] sm:$0xff] %v6799_v8  ;;  %7937 = vst [vmem:[#allocation12_spill] sm:$0xff] %v6805_v54  ;;  %v7938_v34 = vld [vmem:[#allocation25_spill] sm:$0xff]  ;;  %v7939_v35 = vld [vmem:[#allocation18_spill] sm:$0xff] }
 0xafb   :  { %2978 = vmatprep.subr.mxu0 %v6144_v37  ;;  %3049 = vmatprep.subr.mxu1 %v6149_v39  ;;  %v2091_v37 = vadd.f32 %v7939_v35, %v7938_v34  ;;  %v6901_v35 = vld [vmem:[%s7387_s5 + $0x138] sm:$0xff] }
 0xafc   :  { %2979 = vmatpush1.msra.mxu0 %v6156_v40  ;;  %3050 = vmatpush1.msra.mxu1 %v6161_v24  ;;  %v7940_v40 = vld [vmem:[#allocation20_spill] sm:$0xff] }
 0xafd   :  { %2980 = vmatprep.subr.mxu0 %v6168_v25  ;;  %3051 = vmatprep.subr.mxu1 %v6173_v26  ;;  %v2093_v24 = vadd.f32 %v7940_v40, %v6493_v13  ;;  %v6919_v40 = vld [vmem:[%s7387_s5 + $0x108] sm:$0xff] }
 0xafe   :  { %2981 = vmatpush1.msra.mxu0 %v6180_v28  ;;  %3052 = vmatpush1.msra.mxu1 %v6185_v29 }
 0xaff   :  { %2982 = vmatprep.subr.mxu0 %v6192_v31  ;;  %3053 = vmatprep.subr.mxu1 %v6197_v38 }
 0xb00   :  { %2983 = vmatpush1.msra.mxu0 %v6204_v41  ;;  %3054 = vmatpush1.msra.mxu1 %v6209_v42  ;;  %v7941_v42 = vld [vmem:[#allocation21_spill] sm:$0xff] }
 0xb01   :  { %2984 = vmatprep.subr.mxu0 %v6216_v43  ;;  %3055 = vmatprep.subr.mxu1 %v6221_v44  ;;  %v2206_v43 = vadd.f32 %v7941_v42, %v7894_v60  ;;  %v6973_v42 = vld [vmem:[%s7387_s5 + $0xd8] sm:$0xff] }
 0xb02   :  { %2985 = vmatpush1.msra.mxu0 %v6228_v46  ;;  %3056 = vmatpush1.msra.mxu1 %v7897_v30  ;;  %v7942_v46 = vld [vmem:[#allocation19_spill] sm:$0xff] }
 0xb03   :  { %2986 = vmatprep.subr.mxu0 %v7898_v12  ;;  %3057 = vmatprep.subr.mxu1 %v7899_v32  ;;  %v2204_v30 = vadd.f32 %v7942_v46, %v6510_v20  ;;  %v6991_v46 = vld [vmem:[%s7387_s5 + $0xa8] sm:$0xff] }
 0xb04   :  { %2987 = vmatpush1.msra.mxu0 %v7900_v61  ;;  %3058 = vmatpush1.msra.mxu1 %v7901_v6 }
 0xb05   :  { %2988 = vmatprep.subr.mxu0 %v7902_v57  ;;  %3059 = vmatprep.subr.mxu1 %v7903_v5 }
 0xb06   :  { %2989 = vmatpush1.msra.mxu0 %v7904_v11  ;;  %3060 = vmatpush1.msra.mxu1 %v7905_v9 }
 0xb07   :  { %2990 = vmatprep.subr.mxu0 %v7906_v45  ;;  %3061 = vmatprep.subr.mxu1 %v7907_v7 }
 0xb08   :  { %2991 = vmatpush1.msra.mxu0 %v7908_v58  ;;  %3062 = vmatpush1.msra.mxu1 %v7926_v1  ;;  %v6847_v1 = vld [vmem:[%s7387_s5 + $0x168] sm:$0xff] }
 0xb09   :  { %2992 = vmatprep.subr.mxu0 %v7927_v36  ;;  %3063 = vmatprep.subr.mxu1 %v7928_v3  ;;  %v6853_v36 = vld [vmem:[%s7387_s5 + $0x178] sm:$0xff]  ;;  %v6859_v3 = vld [vmem:[%s7387_s5 + $0x160] sm:$0xff] }
 0xb0a   :  { %2993 = vmatpush1.msra.mxu0 %v7929_v2  ;;  %3064 = vmatpush1.msra.mxu1 %v7930_v0  ;;  %v6865_v2 = vld [vmem:[%s7387_s5 + $0x170] sm:$0xff]  ;;  %v6871_v0 = vld [vmem:[%s7387_s5 + $0x148] sm:$0xff] }
 0xb0b   :  { %2994 = vmatprep.subr.mxu0 %v7931_v63  ;;  %3065 = vmatprep.subr.mxu1 %v7932_v62  ;;  %v6877_v63 = vld [vmem:[%s7387_s5 + $0x158] sm:$0xff]  ;;  %v6883_v62 = vld [vmem:[%s7387_s5 + $0x140] sm:$0xff] }
 0xb0c   :  { %2995 = vmatpush1.msra.mxu0 %v7933_v10  ;;  %3028 = vmatprep.mubr.f32.mxu0 %v7934_v27  ;;  %v6889_v10 = vld [vmem:[%s7387_s5 + $0x150] sm:$0xff] }
 0xb0d   :  { %3066 = vmatpush1.msra.mxu1 %v7935_v4  ;;  %3099 = vmatprep.mubr.f32.mxu1 %v7934_v27  ;;  %v6895_v4 = vld [vmem:[%s7387_s5 + $0x128] sm:$0xff] }
 0xb0e   :  { %3138 = vmatprep.subr.mxu0 %v6799_v8  ;;  %3209 = vmatprep.subr.mxu1 %v6805_v54 }
 0xbad   :  { %v2856_v39 = vpop.f32.mrf.mxu0  ;;  %v2927_v31 = vpop.f32.mrf.mxu1 }
 0xbae   :  { %v2932_v25 = vadd.f32 %v2856_v39, %v2091_v37  ;;  %v2934_v12 = vadd.f32 %v2927_v31, %v2204_v30  ;;  %v6907_v37 = vld [vmem:[%s7387_s5 + $0x120] sm:$0xff]  ;;  %v6913_v39 = vld [vmem:[%s7387_s5 + $0x130] sm:$0xff]  ;;  %v6997_v30 = vld [vmem:[%s7387_s5 + $0xb8] sm:$0xff] }
 0xbaf   :  { %v2858_v26 = vpop.f32.mrf.mxu0  ;;  %v2929_v41 = vpop.f32.mrf.mxu1  ;;  %v6955_v31 = vld [vmem:[%s7387_s5 + $0xe0] sm:$0xff] }
 0xbb0   :  { %v3811_v28 = vmul.f32 -1.442695, %v2932_v25  ;;  %v2933_v29 = vadd.f32 %v2858_v26, %v2093_v24  ;;  %v2935_v44 = vadd.f32 %v2929_v41, %v2206_v43  ;;  %v6925_v24 = vld [vmem:[%s7387_s5 + $0x118] sm:$0xff]  ;;  %v6931_v25 = vld [vmem:[%s7387_s5 + $0x100] sm:$0xff]  ;;  %v6937_v26 = vld [vmem:[%s7387_s5 + $0x110] sm:$0xff] }
 0xbb1   :  { %v6967_v41 = vld [vmem:[%s7387_s5 + $0xc8] sm:$0xff]  ;;  %v6979_v43 = vld [vmem:[%s7387_s5 + $0xc0] sm:$0xff] }
 0xbb2   :  { %4057 = vpow2.f32 %v3811_v28  ;;  %v3812_v38 = vmul.f32 -1.442695, %v2933_v29  ;;  %v3813_v32 = vmul.f32 -1.442695, %v2935_v44  ;;  %v6943_v28 = vld [vmem:[%s7387_s5 + $0xe8] sm:$0xff]  ;;  %v6949_v29 = vld [vmem:[%s7387_s5 + $0xf8] sm:$0xff] }
 0xbb3   :  { %v6985_v44 = vld [vmem:[%s7387_s5 + $0xd0] sm:$0xff] }
 0xbb4   :  { %4059 = vpow2.f32 %v3812_v38  ;;  %v6961_v38 = vld [vmem:[%s7387_s5 + $0xf0] sm:$0xff] }
 0xbb5   :  { %4061 = vtanh.f32 %v2934_v12  ;;  %v7003_v12 = vld [vmem:[%s7387_s5 + $0xa0] sm:$0xff] }
 0xbb6   :  { %4063 = vpow2.f32 %v3813_v32  ;;  %v7009_v32 = vld [vmem:[%s7387_s5 + $0xb0] sm:$0xff] }
 0xbb7   :  { %7943 = vst [vmem:[#allocation56_spill] sm:$0xff] %v7009_v32 }
 0xbbf   :  { %v4058_v61 = vpop.eup %4057 }
 0xbc0   :  { %v2939_v6 = vadd.f32 1.0, %v4058_v61  ;;  %v7015_v61 = vld [vmem:[%s7387_s5 + $0x88] sm:$0xff] }
 0xbc1   :  { %v4060_v57 = vpop.eup %4059  ;;  %7944 = vst [vmem:[#allocation13_spill] sm:$0xff] %v7015_v61 }
 0xbc2   :  { %4065 = vrcp.f32 %v2939_v6  ;;  %v2945_v5 = vadd.f32 1.0, %v4060_v57  ;;  %v4062_v11 = vpop.eup %4061  ;;  %v7021_v6 = vld [vmem:[%s7387_s5 + $0x98] sm:$0xff]  ;;  %v7027_v57 = vld [vmem:[%s7387_s5 + $0x80] sm:$0xff] }
 0xbc3   :  { %v4064_v9 = vpop.eup %4063  ;;  %7945 = vst [vmem:[#allocation11_spill] sm:$0xff] %v7021_v6  ;;  %7946 = vst [vmem:[#allocation33_spill] sm:$0xff] %v7027_v57 }
 0xbc4   :  { %4067 = vrcp.f32 %v2945_v5  ;;  %v2952_v51 = vadd.f32 1.0, %v4064_v9  ;;  %v7033_v5 = vld [vmem:[%s7387_s5 + $0x90] sm:$0xff]  ;;  %v7045_v9 = vld [vmem:[%s7387_s5 + $0x78] sm:$0xff] }
 0xbc5   :  { %7947 = vst [vmem:[#allocation34_spill] sm:$0xff] %v7033_v5  ;;  %7949 = vst [vmem:[#allocation35_spill] sm:$0xff] %v7045_v9 }
 0xbc6   :  { %4069 = vrcp.f32 %v2952_v51  ;;  %v7069_v51 = vld [vmem:[%s7387_s5 + $0x58] sm:$0xff] }
 0xbc7   :  { %7953 = vst [vmem:[#allocation4_spill] sm:$0xff] %v7069_v51 }
 0xbcf   :  { %v4066_v45 = vpop.eup %4065 }
 0xbd0   :  { %v2956_v7 = vmul.f32 %v4066_v45, %v4062_v11  ;;  %v7039_v11 = vld [vmem:[%s7387_s5 + $0x68] sm:$0xff]  ;;  %v7051_v45 = vld [vmem:[%s7387_s5 + $0x60] sm:$0xff] }
 0xbd1   :  { %v4068_v58 = vpop.eup %4067  ;;  %7948 = vst [vmem:[#allocation32_spill] sm:$0xff] %v7039_v11  ;;  %7950 = vst [vmem:[#allocation37_spill] sm:$0xff] %v7051_v45 }
 0xbd2   :  { %v2955_v17 = vmul.f32 %v4068_v58, %v6669_v55  ;;  %v6835_v55 = vld [vmem:[%s7387_s5 + $0x180] sm:$0xff]  ;;  %v7063_v58 = vld [vmem:[%s7387_s5 + $0x48] sm:$0xff] }
 0xbd3   :  { %v4070_v52 = vpop.eup %4069  ;;  %7952 = vst [vmem:[#allocation36_spill] sm:$0xff] %v7063_v58 }
 0xbd4   :  { %v6817_v23 = vadd.f32 %v2956_v7, %v2955_v17  ;;  %v7057_v7 = vld [vmem:[%s7387_s5 + $0x70] sm:$0xff]  ;;  %v7075_v17 = vld [vmem:[%s7387_s5 + $0x40] sm:$0xff] }
 0xbd5   :  { %7951 = vst [vmem:[#allocation38_spill] sm:$0xff] %v7057_v7  ;;  %7954 = vst [vmem:[#allocation5_spill] sm:$0xff] %v7075_v17 }
 0xbd6   :  { %4071 = vtanh.f32 %v6817_v23 }
 0xbe3   :  { %v4072_v19 = vpop.eup %4071 }
 0xbe4   :  { %v2959_v59 = vmul.f32 %v4072_v19, %v4070_v52  ;;  %v7081_v52 = vld [vmem:[%s7387_s5 + $0x50] sm:$0xff]  ;;  %v7087_v19 = vld [vmem:[%s7387_s5 + $0x28] sm:$0xff] }
 0xbe5   :  { %7955 = vst [vmem:[#allocation39_spill] sm:$0xff] %v7081_v52  ;;  %7956 = vst [vmem:[#allocation41_spill] sm:$0xff] %v7087_v19 }
 0xbe6   :  { %3029 = vmatmul.mubr.f32.vlgmr.msra.gmra.mxu0 %v2959_v59  ;;  %3100 = vmatmul.mubr.f32.vlgmr.msra.gmra.mxu1 %v2959_v59  ;;  %v7093_v59 = vld [vmem:[%s7387_s5 + $0x38] sm:$0xff] }
 0xbe7   :  { %3139 = vmatpush1.msra.mxu0 %v6675_v48  ;;  %3210 = vmatpush1.msra.mxu1 %v6681_v15  ;;  %7957 = vst [vmem:[#allocation42_spill] sm:$0xff] %v7093_v59 }
 0xbe8   :  { %3140 = vmatprep.subr.mxu0 %v6687_v21  ;;  %3211 = vmatprep.subr.mxu1 %v6693_v33 }
 0xbe9   :  { %3141 = vmatpush1.msra.mxu0 %v6699_v49  ;;  %3212 = vmatpush1.msra.mxu1 %v6705_v18 }
 0xbea   :  { %3142 = vmatprep.subr.mxu0 %v6711_v47  ;;  %3213 = vmatprep.subr.mxu1 %v6717_v56 }
 0xbeb   :  { %3143 = vmatpush1.msra.mxu0 %v6723_v50  ;;  %3214 = vmatpush1.msra.mxu1 %v6729_v53 }
 0xbec   :  { %3144 = vmatprep.subr.mxu0 %v6735_v16  ;;  %3215 = vmatprep.subr.mxu1 %v6741_v14 }
 0xbed   :  { %3145 = vmatpush1.msra.mxu0 %v6835_v55  ;;  %3216 = vmatpush1.msra.mxu1 %v6841_v22 }
 0xbee   :  { %3146 = vmatprep.subr.mxu0 %v6847_v1  ;;  %3217 = vmatprep.subr.mxu1 %v6853_v36 }
 0xbef   :  { %3147 = vmatpush1.msra.mxu0 %v6859_v3  ;;  %3218 = vmatpush1.msra.mxu1 %v6865_v2 }
 0xbf0   :  { %3148 = vmatprep.subr.mxu0 %v6871_v0  ;;  %3219 = vmatprep.subr.mxu1 %v6877_v63 }
 0xbf1   :  { %3149 = vmatpush1.msra.mxu0 %v6883_v62  ;;  %3220 = vmatpush1.msra.mxu1 %v6889_v10 }
 0xbf2   :  { %3150 = vmatprep.subr.mxu0 %v6895_v4  ;;  %3221 = vmatprep.subr.mxu1 %v6901_v35 }
 0xbf3   :  { %3151 = vmatpush1.msra.mxu0 %v6907_v37  ;;  %3222 = vmatpush1.msra.mxu1 %v6913_v39 }
 0xbf4   :  { %3152 = vmatprep.subr.mxu0 %v6919_v40  ;;  %3223 = vmatprep.subr.mxu1 %v6925_v24 }
 0xbf5   :  { %3153 = vmatpush1.msra.mxu0 %v6931_v25  ;;  %3224 = vmatpush1.msra.mxu1 %v6937_v26 }
 0xbf6   :  { %3154 = vmatprep.subr.mxu0 %v6943_v28  ;;  %3225 = vmatprep.subr.mxu1 %v6949_v29 }
 0xbf7   :  { %3155 = vmatpush1.msra.mxu0 %v6955_v31  ;;  %3226 = vmatpush1.msra.mxu1 %v6961_v38 }
 0xbf8   :  { %3156 = vmatprep.subr.mxu0 %v6967_v41  ;;  %3227 = vmatprep.subr.mxu1 %v6973_v42 }
 0xbf9   :  { %3157 = vmatpush1.msra.mxu0 %v6979_v43  ;;  %3228 = vmatpush1.msra.mxu1 %v6985_v44 }
 0xbfa   :  { %3158 = vmatprep.subr.mxu0 %v6991_v46  ;;  %3229 = vmatprep.subr.mxu1 %v6997_v30 }
 0xbfb   :  { %3159 = vmatpush1.msra.mxu0 %v7003_v12  ;;  %3230 = vmatpush1.msra.mxu1 %v7009_v32 }
 0xbfc   :  { %3160 = vmatprep.subr.mxu0 %v7015_v61  ;;  %3231 = vmatprep.subr.mxu1 %v7021_v6  ;;  %v7967_v6 = vld [vmem:[#allocation23_spill] sm:$0xff] }
 0xbfd   :  { %3161 = vmatpush1.msra.mxu0 %v7027_v57  ;;  %3232 = vmatpush1.msra.mxu1 %v7033_v5 }
 0xbfe   :  { %3162 = vmatprep.subr.mxu0 %v7039_v11  ;;  %3233 = vmatprep.subr.mxu1 %v7045_v9 }
 0xbff   :  { %3163 = vmatpush1.msra.mxu0 %v7051_v45  ;;  %3234 = vmatpush1.msra.mxu1 %v7057_v7 }
 0xc00   :  { %3164 = vmatprep.subr.mxu0 %v7063_v58  ;;  %3235 = vmatprep.subr.mxu1 %v7069_v51 }
 0xc01   :  { %3165 = vmatpush1.msra.mxu0 %v7075_v17  ;;  %3236 = vmatpush1.msra.mxu1 %v7081_v52  ;;  %v7099_v17 = vld [vmem:[%s7387_s5 + $0x20] sm:$0xff]  ;;  %v7105_v52 = vld [vmem:[%s7387_s5 + $0x30] sm:$0xff] }
 0xc02   :  { %3166 = vmatprep.subr.mxu0 %v7087_v19  ;;  %3237 = vmatprep.subr.mxu1 %v7093_v59  ;;  %7958 = vst [vmem:[#allocation26_spill] sm:$0xff] %v7099_v17  ;;  %7959 = vst [vmem:[#allocation31_spill] sm:$0xff] %v7105_v52  ;;  %v7111_v19 = vld [vmem:[%s7387_s5 + $0x8] sm:$0xff]  ;;  %v7117_v59 = vld [vmem:[%s7387_s5 + $0x18] sm:$0xff] }
 0xc03   :  { %3167 = vmatpush1.msra.mxu0 %v7099_v17  ;;  %3238 = vmatpush1.msra.mxu1 %v7105_v52  ;;  %7960 = vst [vmem:[#allocation14_spill] sm:$0xff] %v7111_v19  ;;  %7961 = vst [vmem:[#allocation16_spill] sm:$0xff] %v7117_v59  ;;  %v7123_v17 = vld [vmem:[%s7387_s5] sm:$0xff] }
 0xc04   :  { %3168 = vmatprep.subr.mxu0 %v7111_v19  ;;  %3239 = vmatprep.subr.mxu1 %v7117_v59  ;;  %7962 = vst [vmem:[#allocation17_spill] sm:$0xff] %v7123_v17  ;;  %v7130_v19 = vld [vmem:[%s7387_s5 + $0x10] sm:$0xff] }
 0xc05   :  { %3169 = vmatpush1.msra.mxu0 %v7123_v17  ;;  %3202 = vmatprep.mubr.f32.mxu0 %v7934_v27  ;;  %7963 = vst [vmem:[#allocation15_spill] sm:$0xff] %v7130_v19  ;;  %v7964_v59 = vld [vmem:[#allocation22_spill] sm:$0xff]  ;;  %v7965_v17 = vld [vmem:[#allocation24_spill] sm:$0xff] }
 0xc06   :  { %3240 = vmatpush1.msra.mxu1 %v7130_v19  ;;  %3273 = vmatprep.mubr.f32.mxu1 %v7934_v27  ;;  %v2097_v52 = vadd.f32 %v7964_v59, %v7938_v34  ;;  %v2099_v58 = vadd.f32 %v7965_v17, %v6493_v13  ;;  %v2210_v59 = vadd.f32 %v7967_v6, %v6510_v20  ;;  %v7970_v6 = vld [vmem:[#allocation11_spill] sm:$0xff] }
 0xc07   :  { %3312 = vmatprep.subr.mxu0 %v6799_v8  ;;  %3383 = vmatprep.subr.mxu1 %v6805_v54  ;;  %v7966_v8 = vld [vmem:[#allocation47_spill] sm:$0xff] }
 0xc08   :  { %v2212_v57 = vadd.f32 %v7966_v8, %v7894_v60 }
 0xca6   :  { %v3030_v51 = vpop.f32.mrf.mxu0  ;;  %v3101_v5 = vpop.f32.mrf.mxu1 }
 0xca7   :  { %v3106_v7 = vadd.f32 %v3030_v51, %v2097_v52  ;;  %v3108_v34 = vadd.f32 %v3101_v5, %v2210_v59  ;;  %v7971_v5 = vld [vmem:[#allocation33_spill] sm:$0xff]  ;;  %v7973_v59 = vld [vmem:[#allocation32_spill] sm:$0xff] }
 0xca8   :  { %v3032_v45 = vpop.f32.mrf.mxu0  ;;  %v3103_v27 = vpop.f32.mrf.mxu1 }
 0xca9   :  { %v3814_v9 = vmul.f32 -1.442695, %v3106_v7  ;;  %v3107_v11 = vadd.f32 %v3032_v45, %v2099_v58  ;;  %v3109_v54 = vadd.f32 %v3103_v27, %v2212_v57 }
 0xcab   :  { %4073 = vpow2.f32 %v3814_v9  ;;  %v3815_v19 = vmul.f32 -1.442695, %v3107_v11  ;;  %v3816_v61 = vmul.f32 -1.442695, %v3109_v54 }
 0xcad   :  { %4075 = vpow2.f32 %v3815_v19  ;;  %v7972_v19 = vld [vmem:[#allocation34_spill] sm:$0xff] }
 0xcae   :  { %4077 = vtanh.f32 %v3108_v34 }
 0xcaf   :  { %4079 = vpow2.f32 %v3816_v61  ;;  %v7969_v61 = vld [vmem:[#allocation13_spill] sm:$0xff] }
 0xcb8   :  { %v4074_v32 = vpop.eup %4073 }
 0xcb9   :  { %v3113_v17 = vadd.f32 1.0, %v4074_v32 }
 0xcba   :  { %v4076_v51 = vpop.eup %4075 }
 0xcbb   :  { %4081 = vrcp.f32 %v3113_v17  ;;  %v3119_v9 = vadd.f32 1.0, %v4076_v51  ;;  %v4078_v11 = vpop.eup %4077  ;;  %v7974_v17 = vld [vmem:[#allocation35_spill] sm:$0xff]  ;;  %v7975_v51 = vld [vmem:[#allocation37_spill] sm:$0xff] }
 0xcbc   :  { %v4080_v45 = vpop.eup %4079 }
 0xcbd   :  { %4083 = vrcp.f32 %v3119_v9  ;;  %v3126_v8 = vadd.f32 1.0, %v4080_v45  ;;  %v7976_v9 = vld [vmem:[#allocation38_spill] sm:$0xff]  ;;  %v7978_v45 = vld [vmem:[#allocation4_spill] sm:$0xff] }
 0xcbf   :  { %4085 = vrcp.f32 %v3126_v8  ;;  %v7982_v8 = vld [vmem:[#allocation42_spill] sm:$0xff] }
 0xcc8   :  { %v4082_v7 = vpop.eup %4081 }
 0xcc9   :  { %v3130_v58 = vmul.f32 %v4082_v7, %v4078_v11  ;;  %v7977_v11 = vld [vmem:[#allocation36_spill] sm:$0xff]  ;;  %v7979_v7 = vld [vmem:[#allocation5_spill] sm:$0xff] }
 0xcca   :  { %v4084_v52 = vpop.eup %4083 }
 0xccb   :  { %v3129_v27 = vmul.f32 %v4084_v52, %v6817_v23  ;;  %v7968_v23 = vld [vmem:[#allocation56_spill] sm:$0xff]  ;;  %v7981_v52 = vld [vmem:[#allocation41_spill] sm:$0xff] }
 0xccc   :  { %v4086_v54 = vpop.eup %4085 }
 0xccd   :  { %v7145_v57 = vadd.f32 %v3130_v58, %v3129_v27  ;;  %v7980_v58 = vld [vmem:[#allocation39_spill] sm:$0xff]  ;;  %v7983_v27 = vld [vmem:[#allocation26_spill] sm:$0xff] }
 0xccf   :  { %4087 = vtanh.f32 %v7145_v57 }
 0xcdc   :  { %v4088_v34 = vpop.eup %4087 }
 0xcdd   :  { %v3133_v32 = vmul.f32 %v4088_v34, %v4086_v54  ;;  %v7984_v54 = vld [vmem:[#allocation31_spill] sm:$0xff]  ;;  %v7985_v34 = vld [vmem:[#allocation14_spill] sm:$0xff] }
 0xcdf   :  { %3203 = vmatmul.mubr.f32.vlgmr.msra.gmra.mxu0 %v3133_v32  ;;  %3274 = vmatmul.mubr.f32.vlgmr.msra.gmra.mxu1 %v3133_v32  ;;  %v7986_v32 = vld [vmem:[#allocation16_spill] sm:$0xff] }
 0xce0   :  { %3313 = vmatpush1.msra.mxu0 %v6675_v48  ;;  %3384 = vmatpush1.msra.mxu1 %v6681_v15 }
 0xce1   :  { %3314 = vmatprep.subr.mxu0 %v6687_v21  ;;  %3385 = vmatprep.subr.mxu1 %v6693_v33 }
 0xce2   :  { %3315 = vmatpush1.msra.mxu0 %v6699_v49  ;;  %3386 = vmatpush1.msra.mxu1 %v6705_v18 }
 0xce3   :  { %3316 = vmatprep.subr.mxu0 %v6711_v47  ;;  %3387 = vmatprep.subr.mxu1 %v6717_v56 }
 0xce4   :  { %3317 = vmatpush1.msra.mxu0 %v6723_v50  ;;  %3388 = vmatpush1.msra.mxu1 %v6729_v53 }
 0xce5   :  { %3318 = vmatprep.subr.mxu0 %v6735_v16  ;;  %3389 = vmatprep.subr.mxu1 %v6741_v14 }
 0xce6   :  { %3319 = vmatpush1.msra.mxu0 %v6835_v55  ;;  %3390 = vmatpush1.msra.mxu1 %v6841_v22 }
 0xce7   :  { %3320 = vmatprep.subr.mxu0 %v6847_v1  ;;  %3391 = vmatprep.subr.mxu1 %v6853_v36 }
 0xce8   :  { %3321 = vmatpush1.msra.mxu0 %v6859_v3  ;;  %3392 = vmatpush1.msra.mxu1 %v6865_v2 }
 0xce9   :  { %3322 = vmatprep.subr.mxu0 %v6871_v0  ;;  %3393 = vmatprep.subr.mxu1 %v6877_v63 }
 0xcea   :  { %3323 = vmatpush1.msra.mxu0 %v6883_v62  ;;  %3394 = vmatpush1.msra.mxu1 %v6889_v10 }
 0xceb   :  { %3324 = vmatprep.subr.mxu0 %v6895_v4  ;;  %3395 = vmatprep.subr.mxu1 %v6901_v35 }
 0xcec   :  { %3325 = vmatpush1.msra.mxu0 %v6907_v37  ;;  %3396 = vmatpush1.msra.mxu1 %v6913_v39 }
 0xced   :  { %3326 = vmatprep.subr.mxu0 %v6919_v40  ;;  %3397 = vmatprep.subr.mxu1 %v6925_v24 }
 0xcee   :  { %3327 = vmatpush1.msra.mxu0 %v6931_v25  ;;  %3398 = vmatpush1.msra.mxu1 %v6937_v26 }
 0xcef   :  { %3328 = vmatprep.subr.mxu0 %v6943_v28  ;;  %3399 = vmatprep.subr.mxu1 %v6949_v29 }
 0xcf0   :  { %3329 = vmatpush1.msra.mxu0 %v6955_v31  ;;  %3400 = vmatpush1.msra.mxu1 %v6961_v38 }
 0xcf1   :  { %3330 = vmatprep.subr.mxu0 %v6967_v41  ;;  %3401 = vmatprep.subr.mxu1 %v6973_v42 }
 0xcf2   :  { %3331 = vmatpush1.msra.mxu0 %v6979_v43  ;;  %3402 = vmatpush1.msra.mxu1 %v6985_v44 }
 0xcf3   :  { %3332 = vmatprep.subr.mxu0 %v6991_v46  ;;  %3403 = vmatprep.subr.mxu1 %v6997_v30 }
 0xcf4   :  { %3333 = vmatpush1.msra.mxu0 %v7003_v12  ;;  %3404 = vmatpush1.msra.mxu1 %v7968_v23 }
 0xcf5   :  { %3334 = vmatprep.subr.mxu0 %v7969_v61  ;;  %3405 = vmatprep.subr.mxu1 %v7970_v6  ;;  %v7996_v6 = vld [vmem:[#allocation50_spill] sm:$0xff] }
 0xcf6   :  { %3335 = vmatpush1.msra.mxu0 %v7971_v5  ;;  %3406 = vmatpush1.msra.mxu1 %v7972_v19 }
 0xcf7   :  { %3336 = vmatprep.subr.mxu0 %v7973_v59  ;;  %3407 = vmatprep.subr.mxu1 %v7974_v17 }
 0xcf8   :  { %3337 = vmatpush1.msra.mxu0 %v7975_v51  ;;  %3408 = vmatpush1.msra.mxu1 %v7976_v9  ;;  %v7987_v9 = vld [vmem:[#allocation17_spill] sm:$0xff] }
 0xcf9   :  { %3338 = vmatprep.subr.mxu0 %v7977_v11  ;;  %3409 = vmatprep.subr.mxu1 %v7978_v45  ;;  %v7988_v11 = vmov 0.0   ;;  %v7989_v45 = vld [vmem:[#allocation15_spill] sm:$0xff] }
 0xcfa   :  { %3339 = vmatpush1.msra.mxu0 %v7979_v7  ;;  %3410 = vmatpush1.msra.mxu1 %v7980_v58  ;;  %v7990_v58 = vld [vmem:[#allocation10_spill] sm:$0xff] }
 0xcfb   :  { %3340 = vmatprep.subr.mxu0 %v7981_v52  ;;  %3411 = vmatprep.subr.mxu1 %v7982_v8  ;;  %v7991_v52 = vld [vmem:[#allocation12_spill] sm:$0xff]  ;;  %v7992_v8 = vld [vmem:[#allocation25_spill] sm:$0xff] }
 0xcfc   :  { %3341 = vmatpush1.msra.mxu0 %v7983_v27  ;;  %3412 = vmatpush1.msra.mxu1 %v7984_v54  ;;  %v7993_v27 = vld [vmem:[#allocation49_spill] sm:$0xff] }
 0xcfd   :  { %3342 = vmatprep.subr.mxu0 %v7985_v34  ;;  %3413 = vmatprep.subr.mxu1 %v7986_v32  ;;  %v2103_v7 = vadd.f32 %v7993_v27, %v7992_v8  ;;  %v7994_v34 = vld [vmem:[#allocation48_spill] sm:$0xff]  ;;  %v2216_v27 = vadd.f32 %v7996_v6, %v6510_v20 }
 0xcfe   :  { %3343 = vmatpush1.msra.mxu0 %v7987_v9  ;;  %3376 = vmatprep.mubr.f32.mxu0 %v7988_v11  ;;  %v2105_v51 = vadd.f32 %v7994_v34, %v6493_v13 }
 0xcff   :  { %3414 = vmatpush1.msra.mxu1 %v7989_v45  ;;  %3447 = vmatprep.mubr.f32.mxu1 %v7988_v11 }
 0xd00   :  { %3486 = vmatprep.subr.mxu0 %v7990_v58  ;;  %3557 = vmatprep.subr.mxu1 %v7991_v52  ;;  %v7995_v58 = vld [vmem:[#allocation55_spill] sm:$0xff] }
 0xd01   :  { %v2218_v5 = vadd.f32 %v7995_v58, %v7894_v60 }
 0xd9f   :  { %v3204_v54 = vpop.f32.mrf.mxu0  ;;  %v3275_v19 = vpop.f32.mrf.mxu1 }
 0xda0   :  { %v3280_v32 = vadd.f32 %v3204_v54, %v2103_v7  ;;  %v3282_v8 = vadd.f32 %v3275_v19, %v2216_v27 }
 0xda1   :  { %v3206_v17 = vpop.f32.mrf.mxu0  ;;  %v3277_v11 = vpop.f32.mrf.mxu1 }
 0xda2   :  { %v3817_v9 = vmul.f32 -1.442695, %v3280_v32  ;;  %v3281_v59 = vadd.f32 %v3206_v17, %v2105_v51  ;;  %v3283_v52 = vadd.f32 %v3277_v11, %v2218_v5 }
 0xda4   :  { %4089 = vpow2.f32 %v3817_v9  ;;  %v3818_v45 = vmul.f32 -1.442695, %v3281_v59  ;;  %v3819_v61 = vmul.f32 -1.442695, %v3283_v52 }
 0xda6   :  { %4091 = vpow2.f32 %v3818_v45 }
 0xda7   :  { %4093 = vtanh.f32 %v3282_v8 }
 0xda8   :  { %4095 = vpow2.f32 %v3819_v61 }
 0xdb1   :  { %v4090_v23 = vpop.eup %4089 }
 0xdb2   :  { %v3287_v34 = vadd.f32 1.0, %v4090_v23 }
 0xdb3   :  { %v4092_v7 = vpop.eup %4091 }
 0xdb4   :  { %4097 = vrcp.f32 %v3287_v34  ;;  %v3293_v17 = vadd.f32 1.0, %v4092_v7  ;;  %v4094_v59 = vpop.eup %4093 }
 0xdb5   :  { %v4096_v51 = vpop.eup %4095 }
 0xdb6   :  { %4099 = vrcp.f32 %v3293_v17  ;;  %v3300_v32 = vadd.f32 1.0, %v4096_v51 }
 0xdb8   :  { %4101 = vrcp.f32 %v3300_v32 }
 0xdc1   :  { %v4098_v9 = vpop.eup %4097 }
 0xdc2   :  { %v3304_v45 = vmul.f32 %v4098_v9, %v4094_v59 }
 0xdc3   :  { %v4100_v54 = vpop.eup %4099 }
 0xdc4   :  { %v3303_v5 = vmul.f32 %v4100_v54, %v7145_v57 }
 0xdc5   :  { %v4102_v23 = vpop.eup %4101 }
 0xdc6   :  { %v7223_v11 = vadd.f32 %v3304_v45, %v3303_v5 }
 0xdc8   :  { %4103 = vtanh.f32 %v7223_v11 }
 0xdd5   :  { %v4104_v6 = vpop.eup %4103 }
 0xdd6   :  { %v3307_v19 = vmul.f32 %v4104_v6, %v4102_v23  ;;  %v3671_v23 = vld [vmem:[%s7389_s7 + $0x78] sm:$0xff]  ;;  %v3669_v6 = vld [vmem:[%s7389_s7 + $0x68] sm:$0xff] }
 0xdd8   :  { %3377 = vmatmul.mubr.f32.vlgmr.msra.gmra.mxu0 %v3307_v19  ;;  %3448 = vmatmul.mubr.f32.vlgmr.msra.gmra.mxu1 %v3307_v19  ;;  %v3668_v19 = vld [vmem:[%s7389_s7 + $0x60] sm:$0xff] }
 0xdd9   :  { %3487 = vmatpush1.msra.mxu0 %v6675_v48  ;;  %3558 = vmatpush1.msra.mxu1 %v6681_v15  ;;  %v7997_v48 = vld [vmem:[#allocation56_spill] sm:$0xff]  ;;  %v7998_v15 = vld [vmem:[#allocation13_spill] sm:$0xff] }
 0xdda   :  { %3488 = vmatprep.subr.mxu0 %v6687_v21  ;;  %3559 = vmatprep.subr.mxu1 %v6693_v33  ;;  %v7999_v21 = vld [vmem:[#allocation11_spill] sm:$0xff]  ;;  %v8000_v33 = vld [vmem:[#allocation33_spill] sm:$0xff] }
 0xddb   :  { %3489 = vmatpush1.msra.mxu0 %v6699_v49  ;;  %3560 = vmatpush1.msra.mxu1 %v6705_v18  ;;  %v8001_v49 = vld [vmem:[#allocation34_spill] sm:$0xff]  ;;  %v8002_v18 = vld [vmem:[#allocation32_spill] sm:$0xff] }
 0xddc   :  { %3490 = vmatprep.subr.mxu0 %v6711_v47  ;;  %3561 = vmatprep.subr.mxu1 %v6717_v56  ;;  %v8003_v47 = vld [vmem:[#allocation35_spill] sm:$0xff]  ;;  %v8004_v56 = vld [vmem:[#allocation37_spill] sm:$0xff] }
 0xddd   :  { %3491 = vmatpush1.msra.mxu0 %v6723_v50  ;;  %3562 = vmatpush1.msra.mxu1 %v6729_v53  ;;  %v8005_v50 = vld [vmem:[#allocation38_spill] sm:$0xff]  ;;  %v8006_v53 = vld [vmem:[#allocation36_spill] sm:$0xff] }
 0xdde   :  { %3492 = vmatprep.subr.mxu0 %v6735_v16  ;;  %3563 = vmatprep.subr.mxu1 %v6741_v14  ;;  %v8007_v16 = vld [vmem:[#allocation4_spill] sm:$0xff]  ;;  %v8008_v14 = vld [vmem:[#allocation5_spill] sm:$0xff] }
 0xddf   :  { %3493 = vmatpush1.msra.mxu0 %v6835_v55  ;;  %3564 = vmatpush1.msra.mxu1 %v6841_v22  ;;  %v8009_v55 = vld [vmem:[#allocation39_spill] sm:$0xff]  ;;  %v8010_v22 = vld [vmem:[#allocation41_spill] sm:$0xff] }
 0xde0   :  { %3494 = vmatprep.subr.mxu0 %v6847_v1  ;;  %3565 = vmatprep.subr.mxu1 %v6853_v36  ;;  %v8011_v1 = vld [vmem:[#allocation42_spill] sm:$0xff] }
 0xde1   :  { %3495 = vmatpush1.msra.mxu0 %v6859_v3  ;;  %3566 = vmatpush1.msra.mxu1 %v6865_v2  ;;  %v8012_v36 = vld [vmem:[#allocation26_spill] sm:$0xff]  ;;  %v8013_v3 = vld [vmem:[#allocation31_spill] sm:$0xff] }
 0xde2   :  { %3496 = vmatprep.subr.mxu0 %v6871_v0  ;;  %3567 = vmatprep.subr.mxu1 %v6877_v63  ;;  %v8014_v2 = vld [vmem:[#allocation14_spill] sm:$0xff]  ;;  %v8015_v0 = vld [vmem:[#allocation16_spill] sm:$0xff]  ;;  %v8016_v63 = vld [vmem:[#allocation17_spill] sm:$0xff] }
 0xde3   :  { %3497 = vmatpush1.msra.mxu0 %v6883_v62  ;;  %3568 = vmatpush1.msra.mxu1 %v6889_v10  ;;  %v8017_v62 = vmov 0.0   ;;  %v8018_v10 = vld [vmem:[#allocation15_spill] sm:$0xff] }
 0xde4   :  { %3498 = vmatprep.subr.mxu0 %v6895_v4  ;;  %3569 = vmatprep.subr.mxu1 %v6901_v35  ;;  %v8019_v4 = vld [vmem:[#allocation25_spill] sm:$0xff]  ;;  %v8020_v35 = vld [vmem:[#allocation6_spill] sm:$0xff] }
 0xde5   :  { %3499 = vmatpush1.msra.mxu0 %v6907_v37  ;;  %3570 = vmatpush1.msra.mxu1 %v6913_v39  ;;  %v2109_v37 = vadd.f32 %v8020_v35, %v8019_v4 }
 0xde6   :  { %3500 = vmatprep.subr.mxu0 %v6919_v40  ;;  %3571 = vmatprep.subr.mxu1 %v6925_v24  ;;  %v8021_v40 = vld [vmem:[#allocation29_spill] sm:$0xff] }
 0xde7   :  { %3501 = vmatpush1.msra.mxu0 %v6931_v25  ;;  %3572 = vmatpush1.msra.mxu1 %v6937_v26  ;;  %v2111_v24 = vadd.f32 %v8021_v40, %v6493_v13  ;;  %v8026_v40 = vld [vmem:[#allocation27_spill] sm:$0xff] }
 0xde8   :  { %3502 = vmatprep.subr.mxu0 %v6943_v28  ;;  %3573 = vmatprep.subr.mxu1 %v6949_v29 }
 0xde9   :  { %3503 = vmatpush1.msra.mxu0 %v6955_v31  ;;  %3574 = vmatpush1.msra.mxu1 %v6961_v38 }
 0xdea   :  { %3504 = vmatprep.subr.mxu0 %v6967_v41  ;;  %3575 = vmatprep.subr.mxu1 %v6973_v42  ;;  %v8022_v42 = vld [vmem:[#allocation51_spill] sm:$0xff] }
 0xdeb   :  { %3505 = vmatpush1.msra.mxu0 %v6979_v43  ;;  %3576 = vmatpush1.msra.mxu1 %v6985_v44  ;;  %v2224_v43 = vadd.f32 %v8022_v42, %v7894_v60 }
 0xdec   :  { %3506 = vmatprep.subr.mxu0 %v6991_v46  ;;  %3577 = vmatprep.subr.mxu1 %v6997_v30  ;;  %v8023_v46 = vld [vmem:[#allocation9_spill] sm:$0xff] }
 0xded   :  { %3507 = vmatpush1.msra.mxu0 %v7003_v12  ;;  %3578 = vmatpush1.msra.mxu1 %v7997_v48  ;;  %v2222_v30 = vadd.f32 %v8023_v46, %v6510_v20  ;;  %v3667_v48 = vld [vmem:[%s7389_s7 + $0x58] sm:$0xff] }
 0xdee   :  { %3508 = vmatprep.subr.mxu0 %v7998_v15  ;;  %3579 = vmatprep.subr.mxu1 %v7999_v21  ;;  %v3666_v15 = vld [vmem:[%s7389_s7 + $0x50] sm:$0xff]  ;;  %v3665_v21 = vld [vmem:[%s7389_s7 + $0x48] sm:$0xff] }
 0xdef   :  { %3509 = vmatpush1.msra.mxu0 %v8000_v33  ;;  %3580 = vmatpush1.msra.mxu1 %v8001_v49  ;;  %v3664_v33 = vld [vmem:[%s7389_s7 + $0x40] sm:$0xff]  ;;  %v3663_v49 = vld [vmem:[%s7389_s7 + $0x38] sm:$0xff] }
 0xdf0   :  { %3510 = vmatprep.subr.mxu0 %v8002_v18  ;;  %3581 = vmatprep.subr.mxu1 %v8003_v47  ;;  %v3662_v18 = vld [vmem:[%s7389_s7 + $0x30] sm:$0xff]  ;;  %v3661_v47 = vld [vmem:[%s7389_s7 + $0x28] sm:$0xff] }
 0xdf1   :  { %3511 = vmatpush1.msra.mxu0 %v8004_v56  ;;  %3582 = vmatpush1.msra.mxu1 %v8005_v50  ;;  %v3660_v56 = vld [vmem:[%s7389_s7 + $0x20] sm:$0xff]  ;;  %v3659_v50 = vld [vmem:[%s7389_s7 + $0x18] sm:$0xff] }
 0xdf2   :  { %3512 = vmatprep.subr.mxu0 %v8006_v53  ;;  %3583 = vmatprep.subr.mxu1 %v8007_v16  ;;  %v3658_v53 = vld [vmem:[%s7389_s7 + $0x10] sm:$0xff]  ;;  %v3657_v16 = vld [vmem:[%s7389_s7 + $0x8] sm:$0xff] }
 0xdf3   :  { %3513 = vmatpush1.msra.mxu0 %v8008_v14  ;;  %3584 = vmatpush1.msra.mxu1 %v8009_v55  ;;  %v3656_v14 = vld [vmem:[%s7389_s7] sm:$0xff]  ;;  %v8024_v55 = vld [vmem:[#allocation53_spill] sm:$0xff] }
 0xdf4   :  { %3514 = vmatprep.subr.mxu0 %v8010_v22  ;;  %3585 = vmatprep.subr.mxu1 %v8011_v1  ;;  %v2115_v22 = vadd.f32 %v8024_v55, %v8019_v4 }
 0xdf5   :  { %3515 = vmatpush1.msra.mxu0 %v8012_v36  ;;  %3586 = vmatpush1.msra.mxu1 %v8013_v3  ;;  %v8025_v36 = vld [vmem:[#allocation52_spill] sm:$0xff] }
 0xdf6   :  { %3516 = vmatprep.subr.mxu0 %v8014_v2  ;;  %3587 = vmatprep.subr.mxu1 %v8015_v0  ;;  %v2117_v3 = vadd.f32 %v8025_v36, %v6493_v13 }
 0xdf7   :  { %3517 = vmatpush1.msra.mxu0 %v8016_v63  ;;  %3550 = vmatprep.mubr.f32.mxu0 %v8017_v62 }
 0xdf8   :  { %3588 = vmatpush1.msra.mxu1 %v8018_v10  ;;  %3621 = vmatprep.mubr.f32.mxu1 %v8017_v62 }
 0xdf9   :  { %3844 = vmatprep.subr.mxu0 %v8017_v62 }
 0xe98   :  { %v3378_v39 = vpop.f32.mrf.mxu0  ;;  %v3449_v31 = vpop.f32.mrf.mxu1 }
 0xe99   :  { %v3454_v25 = vadd.f32 %v3378_v39, %v2109_v37  ;;  %v3456_v12 = vadd.f32 %v3449_v31, %v2222_v30 }
 0xe9a   :  { %v3380_v26 = vpop.f32.mrf.mxu0  ;;  %v3451_v41 = vpop.f32.mrf.mxu1 }
 0xe9b   :  { %v3820_v28 = vmul.f32 -1.442695, %v3454_v25  ;;  %v3455_v29 = vadd.f32 %v3380_v26, %v2111_v24  ;;  %v3457_v44 = vadd.f32 %v3451_v41, %v2224_v43  ;;  %v8027_v25 = vld [vmem:[#allocation54_spill] sm:$0xff] }
 0xe9c   :  { %v2228_v4 = vadd.f32 %v8027_v25, %v6510_v20 }
 0xe9d   :  { %4105 = vpow2.f32 %v3820_v28  ;;  %v3821_v38 = vmul.f32 -1.442695, %v3455_v29  ;;  %v3822_v57 = vmul.f32 -1.442695, %v3457_v44 }
 0xe9f   :  { %4107 = vpow2.f32 %v3821_v38 }
 0xea0   :  { %4109 = vtanh.f32 %v3456_v12 }
 0xea1   :  { %4111 = vpow2.f32 %v3822_v57 }
 0xeaa   :  { %v4106_v61 = vpop.eup %4105 }
 0xeab   :  { %v3461_v8 = vadd.f32 1.0, %v4106_v61 }
 0xeac   :  { %v4108_v58 = vpop.eup %4107 }
 0xead   :  { %4113 = vrcp.f32 %v3461_v8  ;;  %v3467_v52 = vadd.f32 1.0, %v4108_v58  ;;  %v4110_v27 = vpop.eup %4109  ;;  %v3826_v8 = vld [vmem:[%s7390_s8] ss:$0 sm:$0xff] }
 0xeae   :  { %v4112_v34 = vpop.eup %4111 }
 0xeaf   :  { %4115 = vrcp.f32 %v3467_v52  ;;  %v3474_v51 = vadd.f32 1.0, %v4112_v34 }
 0xeb1   :  { %4117 = vrcp.f32 %v3474_v51 }
 0xeba   :  { %v4114_v7 = vpop.eup %4113 }
 0xebb   :  { %v3478_v17 = vmul.f32 %v4114_v7, %v4110_v27 }
 0xebc   :  { %v4116_v59 = vpop.eup %4115 }
 0xebd   :  { %v3477_v9 = vmul.f32 %v4116_v59, %v7223_v11  ;;  %v3670_v11 = vld [vmem:[%s7389_s7 + $0x70] sm:$0xff] }
 0xebe   :  { %v4118_v54 = vpop.eup %4117 }
 0xebf   :  { %v7300_v45 = vadd.f32 %v3478_v17, %v3477_v9 }
 0xec1   :  { %4119 = vtanh.f32 %v7300_v45 }
 0xece   :  { %v4120_v32 = vpop.eup %4119 }
 0xecf   :  { %v3481_v5 = vmul.f32 %v4120_v32, %v4118_v54 }
 0xed1   :  { %3551 = vmatmul.mubr.f32.vlgmr.msra.gmra.mxu0 %v3481_v5  ;;  %3622 = vmatmul.mubr.f32.vlgmr.msra.gmra.mxu1 %v3481_v5 }
 0xed2   :  { %3845 = vmatpush3.msra.mxu0 %v3671_v23  ;;  %3876 = vmatprep.mubr.msk.f32.mxu0 %vm4266_vm1, %v8017_v62 }
 0xed3   :  { %3846 = vmatprep.subr.mxu0 %v8017_v62 }
 0xed4   :  { %3847 = vmatpush3.msra.mxu0 %v3670_v11 }
 0xed5   :  { %3848 = vmatprep.subr.mxu0 %v8017_v62 }
 0xed6   :  { %3849 = vmatpush3.msra.mxu0 %v3669_v6 }
 0xed7   :  { %3850 = vmatprep.subr.mxu0 %v8017_v62 }
 0xed8   :  { %3851 = vmatpush3.msra.mxu0 %v3668_v19 }
 0xed9   :  { %3852 = vmatprep.subr.mxu0 %v8017_v62 }
 0xeda   :  { %3853 = vmatpush3.msra.mxu0 %v3667_v48 }
 0xedb   :  { %3854 = vmatprep.subr.mxu0 %v8017_v62 }
 0xedc   :  { %3855 = vmatpush3.msra.mxu0 %v3666_v15 }
 0xedd   :  { %3856 = vmatprep.subr.mxu0 %v8017_v62 }
 0xede   :  { %3857 = vmatpush3.msra.mxu0 %v3665_v21 }
 0xedf   :  { %3858 = vmatprep.subr.mxu0 %v8017_v62 }
 0xee0   :  { %3859 = vmatpush3.msra.mxu0 %v3664_v33 }
 0xee1   :  { %3860 = vmatprep.subr.mxu0 %v8017_v62 }
 0xee2   :  { %3861 = vmatpush3.msra.mxu0 %v3663_v49 }
 0xee3   :  { %3862 = vmatprep.subr.mxu0 %v8017_v62 }
 0xee4   :  { %3863 = vmatpush3.msra.mxu0 %v3662_v18 }
 0xee5   :  { %3864 = vmatprep.subr.mxu0 %v8017_v62 }
 0xee6   :  { %3865 = vmatpush3.msra.mxu0 %v3661_v47 }
 0xee7   :  { %3866 = vmatprep.subr.mxu0 %v8017_v62 }
 0xee8   :  { %3867 = vmatpush3.msra.mxu0 %v3660_v56 }
 0xee9   :  { %3868 = vmatprep.subr.mxu0 %v8017_v62 }
 0xeea   :  { %3869 = vmatpush3.msra.mxu0 %v3659_v50 }
 0xeeb   :  { %3870 = vmatprep.subr.mxu0 %v8017_v62 }
 0xeec   :  { %3871 = vmatpush3.msra.mxu0 %v3658_v53 }
 0xeed   :  { %3872 = vmatprep.subr.mxu0 %v8017_v62 }
 0xeee   :  { %3873 = vmatpush3.msra.mxu0 %v3657_v16 }
 0xeef   :  { %3874 = vmatprep.subr.mxu0 %v8017_v62  ;;  %v2230_v62 = vadd.f32 %v8026_v40, %v7894_v60 }
 0xef0   :  { %3875 = vmatpush3.msra.mxu0 %v3656_v14 }
 0xf91   :  { %v3552_v1 = vpop.f32.mrf.mxu0  ;;  %v3623_v35 = vpop.f32.mrf.mxu1 }
 0xf92   :  { %v3628_v2 = vadd.f32 %v3552_v1, %v2115_v22  ;;  %v3630_v26 = vadd.f32 %v3623_v35, %v2228_v4 }
 0xf93   :  { %v3554_v0 = vpop.f32.mrf.mxu0  ;;  %v3625_v39 = vpop.f32.mrf.mxu1 }
 0xf94   :  { %v3823_v63 = vmul.f32 -1.442695, %v3628_v2  ;;  %v3629_v10 = vadd.f32 %v3554_v0, %v2117_v3  ;;  %v3631_v24 = vadd.f32 %v3625_v39, %v2230_v62 }
 0xf96   :  { %4121 = vpow2.f32 %v3823_v63  ;;  %v3824_v37 = vmul.f32 -1.442695, %v3629_v10  ;;  %v3825_v28 = vmul.f32 -1.442695, %v3631_v24 }
 0xf98   :  { %4123 = vpow2.f32 %v3824_v37 }
 0xf99   :  { %4125 = vtanh.f32 %v3630_v26 }
 0xf9a   :  { %4127 = vpow2.f32 %v3825_v28 }
 0xfa3   :  { %v4122_v29 = vpop.eup %4121 }
 0xfa4   :  { %v3635_v13 = vadd.f32 1.0, %v4122_v29 }
 0xfa5   :  { %v4124_v31 = vpop.eup %4123 }
 0xfa6   :  { %4129 = vrcp.f32 %v3635_v13  ;;  %v3641_v38 = vadd.f32 1.0, %v4124_v31  ;;  %v4126_v41 = vpop.eup %4125 }
 0xfa7   :  { %v4128_v42 = vpop.eup %4127 }
 0xfa8   :  { %4131 = vrcp.f32 %v3641_v38  ;;  %v3648_v60 = vadd.f32 1.0, %v4128_v42 }
 0xfaa   :  { %4133 = vrcp.f32 %v3648_v60 }
 0xfb3   :  { %v4130_v43 = vpop.eup %4129 }
 0xfb4   :  { %v3652_v44 = vmul.f32 %v4130_v43, %v4126_v41 }
 0xfb5   :  { %v4132_v46 = vpop.eup %4131 }
 0xfb6   :  { %v3651_v30 = vmul.f32 %v4132_v46, %v7300_v45 }
 0xfb7   :  { %v4134_v20 = vpop.eup %4133 }
 0xfb8   :  { %v3653_v12 = vadd.f32 %v3652_v44, %v3651_v30 }
 0xfba   :  { %4135 = vtanh.f32 %v3653_v12 }
 0xfc7   :  { %v4136_v57 = vpop.eup %4135 }
 0xfc8   :  { %v3655_v61 = vmul.f32 %v4136_v57, %v4134_v20 }
 0xfca   :  { %3877 = vmatmul.mubr.f32.vlgmr.msra.gmra.mxu0 %v3655_v61 }
0x108a   :  { %v3745_v58 = vpop.f32.mrf.mxu0 }
0x108b   :  { %v3746_v52 = vadd.f32 %v3826_v8, %v3745_v58 }
0x108c   :  { %v3878_v27 = vpop.f32.mrf.mxu0 }
0x108d   :  { %3750 = vst.msk [vmem:[%s7391_s9] sm:$0xff] %vm3749_vm2, %v3746_v52 }

</bundles_post_ra>
